<compile_context>
chip_gen: v5e
topology: v5e:2x2
jax: 0.10.0
libtpu: 0.0.40
codegen_flags: <defaults>
</compile_context>

<pallas_src>
import math
import functools

import jax
import jax.numpy as jnp
from jax import lax
from jax.experimental import pallas as pl
from jax.experimental.pallas import tpu as pltpu

LN_EPS = 1e-6        # timm ViT norm / fc_norm eps
COS_EPS = 1e-8       # F.cosine_similarity eps
_SQRT_2_OVER_PI = math.sqrt(2.0 / math.pi)


# ----------------------------- in-kernel helpers ---------------------------- #

def _gelu(x):
    # TODO(synk): torch.nn.GELU default is the exact erf form; the tanh
    # approximation is used here for portable Mosaic lowering (EUP tanh).
    return 0.5 * x * (1.0 + jnp.tanh(_SQRT_2_OVER_PI * (x + 0.044715 * x * x * x)))


def _layernorm(x, g, b, eps=LN_EPS):
    mu = jnp.mean(x, axis=-1, keepdims=True)
    var = jnp.mean(jnp.square(x - mu), axis=-1, keepdims=True)
    return (x - mu) * lax.rsqrt(var + eps) * g + b


# ----------------------------- Pallas kernels ------------------------------ #

def _linear_kernel(x_ref, w_ref, b_ref, o_ref):
    o_ref[...] = (jnp.dot(x_ref[...], w_ref[...],
                          preferred_element_type=jnp.float32) + b_ref[...])


def pallas_linear(x, w, b, *, tile_m=256):
    """x: (M, K) bf16, w: (K, N) bf16, b: (N,) f32 -> (M, N) f32, tiled over M."""
    M, K = x.shape
    N = w.shape[1]
    if M % tile_m:
        tile_m = M                       # small / ragged M: one full block
    return pl.pallas_call(
        _linear_kernel,
        out_shape=jax.ShapeDtypeStruct((M, N), jnp.float32),
        grid=(M // tile_m,),
        in_specs=[pl.BlockSpec((tile_m, K), lambda i: (i, 0)),
                  pl.BlockSpec((K, N), lambda i: (0, 0)),
                  pl.BlockSpec((1, N), lambda i: (0, 0))],
        out_specs=pl.BlockSpec((tile_m, N), lambda i: (i, 0)),
        compiler_params=pltpu.CompilerParams(dimension_semantics=("parallel",)),
    )(x, w, b.reshape(1, N))


def _vit_pass_kernel(x_ref,
                     ln1_g, ln1_b, qkv_w, qkv_b, proj_w, proj_b,
                     ln2_g, ln2_b, fc1_w, fc1_b, fc2_w, fc2_b,
                     o_ref, attn_scratch, *, num_heads, head_dim, scale):
    """One transformer layer step of the fused per-pass grid (B, depth).

    The activation is carried in o_ref across the layer axis (same output block
    index for every layer step); per-layer weights stream in via the grid.
    """
    layer = pl.program_id(1)
    D = num_heads * head_dim

    @pl.when(layer == 0)
    def _():                              # seed the carry from the input tensor
        o_ref[0] = x_ref[0]

    x = o_ref[0]                          # (T, D) f32

    # ---- attention ----
    h = _layernorm(x, ln1_g[0], ln1_b[0]).astype(jnp.bfloat16)
    qkv = (jnp.dot(h, qkv_w[0], preferred_element_type=jnp.float32)
           + qkv_b[0])                    # (T, 3D) f32

    for hh in range(num_heads):           # static unrolled; outputs go to scratch
        lo = hh * head_dim
        q = qkv[:, lo:lo + head_dim].astype(jnp.bfloat16)
        k = qkv[:, D + lo:D + lo + head_dim].astype(jnp.bfloat16)
        v = qkv[:, 2 * D + lo:2 * D + lo + head_dim].astype(jnp.bfloat16)
        s = lax.dot_general(q, k, (((1,), (1,)), ((), ())),
                            preferred_element_type=jnp.float32) * scale
        s = s - jnp.max(s, axis=-1, keepdims=True)
        p = jnp.exp(s)
        p = p * pl.reciprocal(jnp.sum(p, axis=-1, keepdims=True), approx=True)
        attn_scratch[:, lo:lo + head_dim] = jnp.dot(
            p.astype(jnp.bfloat16), v, preferred_element_type=jnp.float32)

    a = (jnp.dot(attn_scratch[...].astype(jnp.bfloat16), proj_w[0],
                 preferred_element_type=jnp.float32) + proj_b[0])
    x = x + a                             # residual (f32)

    # ---- MLP ----
    h2 = _layernorm(x, ln2_g[0], ln2_b[0]).astype(jnp.bfloat16)
    h2 = _gelu(jnp.dot(h2, fc1_w[0], preferred_element_type=jnp.float32)
               + fc1_b[0])
    h2 = (jnp.dot(h2.astype(jnp.bfloat16), fc2_w[0],
                  preferred_element_type=jnp.float32) + fc2_b[0])
    o_ref[0] = x + h2                     # residual; stays resident for next layer


def pallas_vit_pass(x, blk, num_heads):
    """Full stack of transformer blocks in one pallas_call.

    x: (B, T, D) f32.  blk: dict of stacked per-layer weights with leading
    (depth,) axis (weight matrices bf16, LN params / biases f32).
    """
    B, T, D = x.shape
    depth = blk["qkv_w"].shape[0]
    hidden = blk["fc1_w"].shape[-1]
    hd = D // num_heads
    kern = functools.partial(_vit_pass_kernel, num_heads=num_heads,
                             head_dim=hd, scale=1.0 / math.sqrt(hd))

    def wspec(r, c):
        return pl.BlockSpec((1, r, c), lambda b, l: (l, 0, 0))

    xspec = pl.BlockSpec((1, T, D), lambda b, l: (b, 0, 0))
    return pl.pallas_call(
        kern,
        out_shape=jax.ShapeDtypeStruct((B, T, D), jnp.float32),
        grid=(B, depth),
        in_specs=[xspec,
                  wspec(1, D), wspec(1, D),
                  wspec(D, 3 * D), wspec(1, 3 * D),
                  wspec(D, D), wspec(1, D),
                  wspec(1, D), wspec(1, D),
                  wspec(D, hidden), wspec(1, hidden),
                  wspec(hidden, D), wspec(1, D)],
        out_specs=xspec,
        scratch_shapes=[pltpu.VMEM((T, D), jnp.float32)],
        compiler_params=pltpu.CompilerParams(
            dimension_semantics=("parallel", "arbitrary"),
            vmem_limit_bytes=64 * 1024 * 1024),
    )(x,
      blk["ln1_g"], blk["ln1_b"],
      blk["qkv_w"], blk["qkv_b"],
      blk["proj_w"], blk["proj_b"],
      blk["ln2_g"], blk["ln2_b"],
      blk["fc1_w"], blk["fc1_b"],
      blk["fc2_w"], blk["fc2_b"])


def _query_match_kernel(cls_ref, g_ref, b_ref, key_ref, kn_ref, o_ref):
    """Fused final-norm on CLS token + (1 - cosine_similarity(query, keys))."""
    q = _layernorm(cls_ref[...], g_ref[...], b_ref[...])         # (B, D) f32
    dot = lax.dot_general(q.astype(jnp.bfloat16),
                          key_ref[...].astype(jnp.bfloat16),
                          (((1,), (1,)), ((), ())),
                          preferred_element_type=jnp.float32)    # (B, P)
    qn = jnp.sqrt(jnp.sum(q * q, axis=-1, keepdims=True))        # (B, 1)
    # PyTorch cosine_similarity clamps each norm separately with eps
    denom = jnp.maximum(qn, COS_EPS) * jnp.maximum(kn_ref[...], COS_EPS)
    o_ref[...] = 1.0 - dot / denom


def pallas_query_match(cls_tok, norm_g, norm_b, key_param, key_norm):
    B, D = cls_tok.shape
    P = key_param.shape[0]
    return pl.pallas_call(
        _query_match_kernel,
        out_shape=jax.ShapeDtypeStruct((B, P), jnp.float32),
        grid=(1,),
        in_specs=[pl.BlockSpec((B, D), lambda i: (0, 0)),
                  pl.BlockSpec((1, D), lambda i: (0, 0)),
                  pl.BlockSpec((1, D), lambda i: (0, 0)),
                  pl.BlockSpec((P, D), lambda i: (0, 0)),
                  pl.BlockSpec((1, P), lambda i: (0, 0))],
        out_specs=pl.BlockSpec((B, P), lambda i: (0, 0)),
    )(cls_tok, norm_g.reshape(1, D), norm_b.reshape(1, D), key_param, key_norm)


def _tail_kernel(x_ref, ng, nb, fng, fnb, fcw, fcb, o_ref):
    """Fused: norm(prompt tokens) -> mean-pool -> fc_norm -> fc head."""
    xn = _layernorm(x_ref[...], ng[...], nb[...])                # (B, SL, D)
    pooled = jnp.mean(xn, axis=1)                                # (B, D)
    pooled = _layernorm(pooled, fng[...], fnb[...])
    o_ref[...] = (jnp.dot(pooled.astype(jnp.bfloat16), fcw[...],
                          preferred_element_type=jnp.float32) + fcb[...])


def pallas_tail(x_prompt, params):
    """x_prompt: (B, SL, D) — only the prompt-token window is DMA'd."""
    B, SL, D = x_prompt.shape
    C = params["fc_w"].shape[1]
    return pl.pallas_call(
        _tail_kernel,
        out_shape=jax.ShapeDtypeStruct((B, C), jnp.float32),
        grid=(1,),
        in_specs=[pl.BlockSpec((B, SL, D), lambda i: (0, 0, 0)),
                  pl.BlockSpec((1, D), lambda i: (0, 0)),
                  pl.BlockSpec((1, D), lambda i: (0, 0)),
                  pl.BlockSpec((1, D), lambda i: (0, 0)),
                  pl.BlockSpec((1, D), lambda i: (0, 0)),
                  pl.BlockSpec((D, C), lambda i: (0, 0)),
                  pl.BlockSpec((1, C), lambda i: (0, 0))],
        out_specs=pl.BlockSpec((B, C), lambda i: (0, 0)),
    )(x_prompt,
      params["norm_g"].reshape(1, D), params["norm_b"].reshape(1, D),
      params["fc_norm_g"].reshape(1, D), params["fc_norm_b"].reshape(1, D),
      params["fc_w"], params["fc_b"].reshape(1, C))


# ------------------------------- model glue -------------------------------- #

def patch_embed(imgs, w_flat_bf16, b, patch):
    """Conv2d(kernel=stride=patch) via im2col + Pallas matmul; output (B, N, D)."""
    B, C, H, W = imgs.shape
    Hp, Wp = H // patch, W // patch
    D = w_flat_bf16.shape[1]
    cols = imgs.reshape(B, C, Hp, patch, Wp, patch).transpose(0, 2, 4, 1, 3, 5)
    cols = cols.reshape(B * Hp * Wp, C * patch * patch).astype(jnp.bfloat16)
    y = pallas_linear(cols, w_flat_bf16, b)
    return y.reshape(B, Hp * Wp, D)


def prompt_forward(match, prompts_param, selection_size):
    """Inference-path Prompt.forward (eval: no diversed/batchwise selection)."""
    # topk(largest=False, sorted=True) -> ascending indices of smallest values
    topk = jnp.argsort(match, axis=-1)[:, :selection_size]      # (B, S)
    similarity = jnp.take_along_axis(match, topk, axis=1)       # (B, S)
    selection = jnp.take(prompts_param, topk, axis=0)           # (B, S, L, D)
    # TODO(synk): frequency/counter buffer updates (torch.bincount) are stateful
    # training-time side effects with no effect on the returned tensors; omitted.
    return similarity, selection


def l2p_forward(inputs, params, cfg):
    B = inputs.shape[0]
    x = patch_embed(inputs, params["patch_w_flat"], params["patch_b"],
                    cfg["patch"])
    _, N, D = x.shape

    cls = jnp.broadcast_to(params["cls_token"], (B, 1, D))
    token_appended = jnp.concatenate([cls, x], axis=1)           # (B, N+1, D)

    # first pass (query extraction); pos_drop is identity in eval
    x1 = token_appended + params["pos_embed"]
    x1 = pallas_vit_pass(x1, params["blocks"], cfg["num_heads"])
    key_norm = jnp.sqrt(jnp.sum(params["prompt_key"] ** 2,
                                axis=-1)).reshape(1, -1)         # (1, P) precomputed
    match = pallas_query_match(x1[:, 0, :], params["norm_g"], params["norm_b"],
                               params["prompt_key"], key_norm)   # (B, P)

    similarity, selection = prompt_forward(
        match, params["prompt_prompts"], cfg["selection_size"])
    _sim_mean = similarity.mean()   # computed (and discarded) as in the reference

    SL = cfg["selection_size"] * cfg["prompt_len"]
    prompts = selection.reshape(B, SL, D) + params["pos_embed"][:, 0]

    # second pass with prepended prompts
    x2 = token_appended + params["pos_embed"]
    x2 = jnp.concatenate([x2[:, :1], prompts, x2[:, 1:]], axis=1)  # (B, 1+SL+N, D)
    x2 = pallas_vit_pass(x2, params["blocks"], cfg["num_heads"])
    logits = pallas_tail(x2[:, 1:SL + 1, :], params)
    return logits


# ------------------------------ initialization ----------------------------- #

def init_params(key, cfg):
    C, D, patch = cfg["in_chans"], cfg["dim"], cfg["patch"]
    N = (cfg["img"] // patch) ** 2
    hidden = cfg["mlp_hidden"]
    depth = cfg["depth"]
    ks = iter(jax.random.split(key, 64))

    def nrm(shape, scale=0.02):
        return scale * jax.random.normal(next(ks), shape, dtype=jnp.float32)

    patch_w = nrm((D, C, patch, patch))
    params = {
        "patch_w_flat": patch_w.reshape(D, C * patch * patch).T.astype(jnp.bfloat16),
        "patch_b": jnp.zeros((D,), jnp.float32),
        "cls_token": nrm((1, 1, D)),
        "pos_embed": nrm((1, N + 1, D)),
        "norm_g": jnp.ones((D,), jnp.float32),
        "norm_b": jnp.zeros((D,), jnp.float32),
        "fc_norm_g": jnp.ones((D,), jnp.float32),
        "fc_norm_b": jnp.zeros((D,), jnp.float32),
        "fc_w": nrm((D, cfg["class_num"])).astype(jnp.bfloat16),
        "fc_b": jnp.zeros((cfg["class_num"],), jnp.float32),
        # Prompt module: torch.nn.init.uniform_(-1, 1)
        "prompt_key": jax.random.uniform(next(ks), (cfg["pool_size"], D),
                                         minval=-1.0, maxval=1.0,
                                         dtype=jnp.float32),
        "prompt_prompts": jax.random.uniform(
            next(ks), (cfg["pool_size"], cfg["prompt_len"], D),
            minval=-1.0, maxval=1.0, dtype=jnp.float32),
        # per-layer weights stacked along a leading (depth,) axis; matrices bf16
        "blocks": {
            "ln1_g": jnp.ones((depth, 1, D), jnp.float32),
            "ln1_b": jnp.zeros((depth, 1, D), jnp.float32),
            "qkv_w": nrm((depth, D, 3 * D)).astype(jnp.bfloat16),
            "qkv_b": jnp.zeros((depth, 1, 3 * D), jnp.float32),
            "proj_w": nrm((depth, D, D)).astype(jnp.bfloat16),
            "proj_b": jnp.zeros((depth, 1, D), jnp.float32),
            "ln2_g": jnp.ones((depth, 1, D), jnp.float32),
            "ln2_b": jnp.zeros((depth, 1, D), jnp.float32),
            "fc1_w": nrm((depth, D, hidden)).astype(jnp.bfloat16),
            "fc1_b": jnp.zeros((depth, 1, hidden), jnp.float32),
            "fc2_w": nrm((depth, hidden, D)).astype(jnp.bfloat16),
            "fc2_b": jnp.zeros((depth, 1, D), jnp.float32),
        },
    }
    return params


# ---------------------------------- main ------------------------------------ #

if __name__ == "__main__":
    cfg = dict(
        img=16, patch=4, in_chans=3, dim=32, depth=2, num_heads=2, mlp_hidden=128,
        class_num=10, pool_size=10, selection_size=5, prompt_len=10,
    )

    key = jax.random.PRNGKey(0)
    inputs = jax.random.normal(key, (2, cfg["in_chans"], cfg["img"], cfg["img"]),
                               dtype=jnp.float32)          # NCHW like PyTorch
    params = init_params(jax.random.PRNGKey(1), cfg)

    fwd = jax.jit(lambda inp, prm: l2p_forward(inp, prm, cfg))
    logits = fwd(inputs, params)
    logits = jax.block_until_ready(logits)
    assert logits.shape == (2, cfg["class_num"])
    assert bool(jnp.all(jnp.isfinite(logits)))
    print("KERNEL_OK")
</pallas_src>

<mosaic_0001>
module attributes {stable_mosaic.version = 11 : i64} {
  func.func @_linear_kernel(%arg0: i32, %arg1: memref<32x48xbf16, #tpu.memory_space<vmem>>, %arg2: memref<48x32xbf16, #tpu.memory_space<vmem>>, %arg3: memref<1x32xf32, #tpu.memory_space<vmem>>, %arg4: memref<32x32xf32, #tpu.memory_space<vmem>>) attributes {dimension_semantics = [#tpu.dimension_semantics<parallel>], iteration_bounds = array<i64: 1>, scalar_prefetch = 0 : i64, scratch_operands = 0 : i64, tpu.core_type = #tpu.core_type<tc>, window_params = [{transform_indices = @transform_0, window_bounds = array<i64: 32, 48>}, {pipeline_mode = #tpu.pipeline_mode<synchronous>, transform_indices = @transform_1, window_bounds = array<i64: 48, 32>}, {pipeline_mode = #tpu.pipeline_mode<synchronous>, transform_indices = @transform_2, window_bounds = array<i64: 1, 32>}, {transform_indices = @transform_3, window_bounds = array<i64: 32, 32>}]} {
    %c0 = arith.constant 0 : index
    %c0_0 = arith.constant 0 : index
    %0 = vector.load %arg1[%c0, %c0_0] : memref<32x48xbf16, #tpu.memory_space<vmem>>, vector<32x48xbf16>
    %c0_1 = arith.constant 0 : index
    %c0_2 = arith.constant 0 : index
    %1 = vector.load %arg2[%c0_1, %c0_2] : memref<48x32xbf16, #tpu.memory_space<vmem>>, vector<48x32xbf16>
    %cst = arith.constant dense<0.000000e+00> : vector<32x32xf32>
    %2 = tpu.matmul %0, %1, %cst {dimension_numbers = #tpu.dot_dimension_numbers<[1], [0], [0], [1], [0, 0, 1, 1], [], []>} : vector<32x48xbf16>, vector<48x32xbf16>, vector<32x32xf32> -> vector<32x32xf32>
    %c0_3 = arith.constant 0 : index
    %c0_4 = arith.constant 0 : index
    %3 = vector.load %arg3[%c0_3, %c0_4] : memref<1x32xf32, #tpu.memory_space<vmem>>, vector<1x32xf32>
    %4 = vector.broadcast %3 : vector<1x32xf32> to vector<32x32xf32>
    %5 = arith.addf %2, %4 : vector<32x32xf32>
    %c0_5 = arith.constant 0 : index
    %c0_6 = arith.constant 0 : index
    %6 = vector.load %arg4[%c0_5, %c0_6] : memref<32x32xf32, #tpu.memory_space<vmem>>, vector<32x32xf32>
    tpu.vector_store %arg4[%c0_5, %c0_6], %5 {strides = array<i32>} : memref<32x32xf32, #tpu.memory_space<vmem>>, vector<32x32xf32>,
    return
  }
  func.func @transform_0(%arg0: i32) -> (i32, i32) {
    %c0_i32 = arith.constant 0 : i32
    %c0_i32_0 = arith.constant 0 : i32
    return %arg0, %c0_i32 : i32, i32
  }
  func.func @transform_1(%arg0: i32) -> (i32, i32) {
    %c0_i32 = arith.constant 0 : i32
    %c0_i32_0 = arith.constant 0 : i32
    %c0_i32_1 = arith.constant 0 : i32
    return %c0_i32, %c0_i32_0 : i32, i32
  }
  func.func @transform_2(%arg0: i32) -> (i32, i32) {
    %c0_i32 = arith.constant 0 : i32
    %c0_i32_0 = arith.constant 0 : i32
    %c0_i32_1 = arith.constant 0 : i32
    return %c0_i32, %c0_i32_0 : i32, i32
  }
  func.func @transform_3(%arg0: i32) -> (i32, i32) {
    %c0_i32 = arith.constant 0 : i32
    %c0_i32_0 = arith.constant 0 : i32
    return %arg0, %c0_i32 : i32, i32
  }
}

module attributes {stable_mosaic.version = 11 : i64} {
  func.func @_vit_pass_kernel(%arg0: i32, %arg1: i32, %arg2: memref<1x17x32xf32, #tpu.memory_space<vmem>>, %arg3: memref<1x1x32xf32, #tpu.memory_space<vmem>>, %arg4: memref<1x1x32xf32, #tpu.memory_space<vmem>>, %arg5: memref<1x32x96xbf16, #tpu.memory_space<vmem>>, %arg6: memref<1x1x96xf32, #tpu.memory_space<vmem>>, %arg7: memref<1x32x32xbf16, #tpu.memory_space<vmem>>, %arg8: memref<1x1x32xf32, #tpu.memory_space<vmem>>, %arg9: memref<1x1x32xf32, #tpu.memory_space<vmem>>, %arg10: memref<1x1x32xf32, #tpu.memory_space<vmem>>, %arg11: memref<1x32x128xbf16, #tpu.memory_space<vmem>>, %arg12: memref<1x1x128xf32, #tpu.memory_space<vmem>>, %arg13: memref<1x128x32xbf16, #tpu.memory_space<vmem>>, %arg14: memref<1x1x32xf32, #tpu.memory_space<vmem>>, %arg15: memref<1x17x32xf32, #tpu.memory_space<vmem>>, %arg16: memref<17x32xf32, #tpu.memory_space<vmem>>) attributes {dimension_semantics = [#tpu.dimension_semantics<parallel>, #tpu.dimension_semantics<arbitrary>], iteration_bounds = array<i64: 2, 2>, scalar_prefetch = 0 : i64, scratch_operands = 1 : i64, tpu.core_type = #tpu.core_type<tc>, window_params = [{transform_indices = @transform_0, window_bounds = array<i64: 1, 17, 32>}, {transform_indices = @transform_1, window_bounds = array<i64: 1, 1, 32>}, {transform_indices = @transform_2, window_bounds = array<i64: 1, 1, 32>}, {transform_indices = @transform_3, window_bounds = array<i64: 1, 32, 96>}, {transform_indices = @transform_4, window_bounds = array<i64: 1, 1, 96>}, {transform_indices = @transform_5, window_bounds = array<i64: 1, 32, 32>}, {transform_indices = @transform_6, window_bounds = array<i64: 1, 1, 32>}, {transform_indices = @transform_7, window_bounds = array<i64: 1, 1, 32>}, {transform_indices = @transform_8, window_bounds = array<i64: 1, 1, 32>}, {transform_indices = @transform_9, window_bounds = array<i64: 1, 32, 128>}, {transform_indices = @transform_10, window_bounds = array<i64: 1, 1, 128>}, {transform_indices = @transform_11, window_bounds = array<i64: 1, 128, 32>}, {transform_indices = @transform_12, window_bounds = array<i64: 1, 1, 32>}, {transform_indices = @transform_13, window_bounds = array<i64: 1, 17, 32>}]} {
    %c0_i32 = arith.constant 0 : i32
    %0 = arith.cmpi eq, %arg1, %c0_i32 : i32
    %1 = arith.extui %0 : i1 to i32
    %c0_i32_0 = arith.constant 0 : i32
    %2 = arith.cmpi ne, %1, %c0_i32_0 : i32
    scf.if %2 {
      %c0_74 = arith.constant 0 : index
      %c0_75 = arith.constant 0 : index
      %c0_76 = arith.constant 0 : index
      %152 = vector.load %arg2[%c0_74, %c0_75, %c0_76] : memref<1x17x32xf32, #tpu.memory_space<vmem>>, vector<1x17x32xf32>
      %153 = vector.shape_cast %152 : vector<1x17x32xf32> to vector<17x32xf32>
      %c0_77 = arith.constant 0 : index
      %c0_78 = arith.constant 0 : index
      %c0_79 = arith.constant 0 : index
      %154 = vector.load %arg15[%c0_77, %c0_78, %c0_79] : memref<1x17x32xf32, #tpu.memory_space<vmem>>, vector<1x17x32xf32>
      %155 = vector.shape_cast %154 : vector<1x17x32xf32> to vector<17x32xf32>
      %156 = vector.shape_cast %153 : vector<17x32xf32> to vector<1x17x32xf32>
      tpu.vector_store %arg15[%c0_77, %c0_78, %c0_79], %156 {strides = array<i32>} : memref<1x17x32xf32, #tpu.memory_space<vmem>>, vector<1x17x32xf32>,
    } else {
    }
    %c0 = arith.constant 0 : index
    %c0_1 = arith.constant 0 : index
    %c0_2 = arith.constant 0 : index
    %3 = vector.load %arg15[%c0, %c0_1, %c0_2] : memref<1x17x32xf32, #tpu.memory_space<vmem>>, vector<1x17x32xf32>
    %4 = vector.shape_cast %3 : vector<1x17x32xf32> to vector<17x32xf32>
    %c0_3 = arith.constant 0 : index
    %c0_4 = arith.constant 0 : index
    %c0_5 = arith.constant 0 : index
    %5 = vector.load %arg3[%c0_3, %c0_4, %c0_5] : memref<1x1x32xf32, #tpu.memory_space<vmem>>, vector<1x1x32xf32>
    %6 = vector.shape_cast %5 : vector<1x1x32xf32> to vector<1x32xf32>
    %c0_6 = arith.constant 0 : index
    %c0_7 = arith.constant 0 : index
    %c0_8 = arith.constant 0 : index
    %7 = vector.load %arg4[%c0_6, %c0_7, %c0_8] : memref<1x1x32xf32, #tpu.memory_space<vmem>>, vector<1x1x32xf32>
    %8 = vector.shape_cast %7 : vector<1x1x32xf32> to vector<1x32xf32>
    %cst = arith.constant dense<0.000000e+00> : vector<17xf32>
    %9 = vector.multi_reduction <add>, %4, %cst [1] : vector<17x32xf32> to vector<17xf32>
    %10 = vector.shape_cast %9 : vector<17xf32> to vector<17x1xf32>
    %cst_9 = arith.constant 3.200000e+01 : f32
    %11 = vector.broadcast %cst_9 : f32 to vector<17x1xf32>
    %12 = arith.divf %10, %11 : vector<17x1xf32>
    %13 = vector.broadcast %12 : vector<17x1xf32> to vector<17x32xf32>
    %14 = arith.subf %4, %13 : vector<17x32xf32>
    %15 = arith.mulf %14, %14 : vector<17x32xf32>
    %cst_10 = arith.constant dense<0.000000e+00> : vector<17xf32>
    %16 = vector.multi_reduction <add>, %15, %cst_10 [1] : vector<17x32xf32> to vector<17xf32>
    %17 = vector.shape_cast %16 : vector<17xf32> to vector<17x1xf32>
    %cst_11 = arith.constant 3.200000e+01 : f32
    %18 = vector.broadcast %cst_11 : f32 to vector<17x1xf32>
    %19 = arith.divf %17, %18 : vector<17x1xf32>
    %20 = vector.broadcast %12 : vector<17x1xf32> to vector<17x32xf32>
    %21 = arith.subf %4, %20 : vector<17x32xf32>
    %cst_12 = arith.constant 9.99999997E-7 : f32
    %22 = vector.broadcast %cst_12 : f32 to vector<17x1xf32>
    %23 = arith.addf %19, %22 : vector<17x1xf32>
    %24 = math.rsqrt %23 : vector<17x1xf32>
    %25 = vector.broadcast %24 : vector<17x1xf32> to vector<17x32xf32>
    %26 = arith.mulf %21, %25 : vector<17x32xf32>
    %27 = vector.broadcast %6 : vector<1x32xf32> to vector<17x32xf32>
    %28 = arith.mulf %26, %27 : vector<17x32xf32>
    %29 = vector.broadcast %8 : vector<1x32xf32> to vector<17x32xf32>
    %30 = arith.addf %28, %29 : vector<17x32xf32>
    %31 = arith.truncf %30 : vector<17x32xf32> to vector<17x32xbf16>
    %c0_13 = arith.constant 0 : index
    %c0_14 = arith.constant 0 : index
    %c0_15 = arith.constant 0 : index
    %32 = vector.load %arg5[%c0_13, %c0_14, %c0_15] : memref<1x32x96xbf16, #tpu.memory_space<vmem>>, vector<1x32x96xbf16>
    %33 = vector.shape_cast %32 : vector<1x32x96xbf16> to vector<32x96xbf16>
    %cst_16 = arith.constant dense<0.000000e+00> : vector<17x96xf32>
    %34 = tpu.matmul %31, %33, %cst_16 {dimension_numbers = #tpu.dot_dimension_numbers<[1], [0], [0], [1], [0, 0, 1, 1], [], []>} : vector<17x32xbf16>, vector<32x96xbf16>, vector<17x96xf32> -> vector<17x96xf32>
    %c0_17 = arith.constant 0 : index
    %c0_18 = arith.constant 0 : index
    %c0_19 = arith.constant 0 : index
    %35 = vector.load %arg6[%c0_17, %c0_18, %c0_19] : memref<1x1x96xf32, #tpu.memory_space<vmem>>, vector<1x1x96xf32>
    %36 = vector.shape_cast %35 : vector<1x1x96xf32> to vector<1x96xf32>
    %37 = vector.broadcast %36 : vector<1x96xf32> to vector<17x96xf32>
    %38 = arith.addf %34, %37 : vector<17x96xf32>
    %39 = vector.extract_strided_slice %38 {offsets = [0, 0], sizes = [17, 16], strides = [1, 1]} : vector<17x96xf32> to vector<17x16xf32>
    %40 = arith.truncf %39 : vector<17x16xf32> to vector<17x16xbf16>
    %41 = vector.extract_strided_slice %38 {offsets = [0, 32], sizes = [17, 16], strides = [1, 1]} : vector<17x96xf32> to vector<17x16xf32>
    %42 = arith.truncf %41 : vector<17x16xf32> to vector<17x16xbf16>
    %43 = vector.extract_strided_slice %38 {offsets = [0, 64], sizes = [17, 16], strides = [1, 1]} : vector<17x96xf32> to vector<17x16xf32>
    %44 = arith.truncf %43 : vector<17x16xf32> to vector<17x16xbf16>
    %cst_20 = arith.constant dense<0.000000e+00> : vector<17x17xf32>
    %45 = tpu.matmul %40, %42, %cst_20 {dimension_numbers = #tpu.dot_dimension_numbers<[1], [1], [0], [0], [0, 0, 1, 0], [], []>} : vector<17x16xbf16>, vector<17x16xbf16>, vector<17x17xf32> -> vector<17x17xf32>
    %cst_21 = arith.constant 2.500000e-01 : f32
    %46 = vector.broadcast %cst_21 : f32 to vector<17x17xf32>
    %47 = arith.mulf %45, %46 : vector<17x17xf32>
    %cst_22 = arith.constant dense<0xFF800000> : vector<17xf32>
    %48 = vector.multi_reduction <maximumf>, %47, %cst_22 [1] : vector<17x17xf32> to vector<17xf32>
    %49 = vector.shape_cast %48 : vector<17xf32> to vector<17x1xf32>
    %50 = vector.broadcast %49 : vector<17x1xf32> to vector<17x17xf32>
    %51 = arith.subf %47, %50 : vector<17x17xf32>
    %52 = math.exp %51 : vector<17x17xf32>
    %cst_23 = arith.constant dense<0.000000e+00> : vector<17xf32>
    %53 = vector.multi_reduction <add>, %52, %cst_23 [1] : vector<17x17xf32> to vector<17xf32>
    %54 = vector.shape_cast %53 : vector<17xf32> to vector<17x1xf32>
    %55 = tpu.reciprocal %54 {approx = true} : vector<17x1xf32> -> vector<17x1xf32>
    %56 = vector.broadcast %55 : vector<17x1xf32> to vector<17x17xf32>
    %57 = arith.mulf %52, %56 : vector<17x17xf32>
    %58 = arith.truncf %57 : vector<17x17xf32> to vector<17x17xbf16>
    %cst_24 = arith.constant dense<0.000000e+00> : vector<17x16xf32>
    %59 = tpu.matmul %58, %44, %cst_24 {dimension_numbers = #tpu.dot_dimension_numbers<[1], [0], [0], [1], [0, 0, 1, 1], [], []>} : vector<17x17xbf16>, vector<17x16xbf16>, vector<17x16xf32> -> vector<17x16xf32>
    %c0_25 = arith.constant 0 : index
    %c0_26 = arith.constant 0 : index
    %60 = vector.load %arg16[%c0_25, %c0_26] : memref<17x32xf32, #tpu.memory_space<vmem>>, vector<17x16xf32>
    tpu.vector_store %arg16[%c0_25, %c0_26], %59 {strides = array<i32>} : memref<17x32xf32, #tpu.memory_space<vmem>>, vector<17x16xf32>,
    %61 = vector.extract_strided_slice %38 {offsets = [0, 16], sizes = [17, 16], strides = [1, 1]} : vector<17x96xf32> to vector<17x16xf32>
    %62 = arith.truncf %61 : vector<17x16xf32> to vector<17x16xbf16>
    %63 = vector.extract_strided_slice %38 {offsets = [0, 48], sizes = [17, 16], strides = [1, 1]} : vector<17x96xf32> to vector<17x16xf32>
    %64 = arith.truncf %63 : vector<17x16xf32> to vector<17x16xbf16>
    %65 = vector.extract_strided_slice %38 {offsets = [0, 80], sizes = [17, 16], strides = [1, 1]} : vector<17x96xf32> to vector<17x16xf32>
    %66 = arith.truncf %65 : vector<17x16xf32> to vector<17x16xbf16>
    %cst_27 = arith.constant dense<0.000000e+00> : vector<17x17xf32>
    %67 = tpu.matmul %62, %64, %cst_27 {dimension_numbers = #tpu.dot_dimension_numbers<[1], [1], [0], [0], [0, 0, 1, 0], [], []>} : vector<17x16xbf16>, vector<17x16xbf16>, vector<17x17xf32> -> vector<17x17xf32>
    %cst_28 = arith.constant 2.500000e-01 : f32
    %68 = vector.broadcast %cst_28 : f32 to vector<17x17xf32>
    %69 = arith.mulf %67, %68 : vector<17x17xf32>
    %cst_29 = arith.constant dense<0xFF800000> : vector<17xf32>
    %70 = vector.multi_reduction <maximumf>, %69, %cst_29 [1] : vector<17x17xf32> to vector<17xf32>
    %71 = vector.shape_cast %70 : vector<17xf32> to vector<17x1xf32>
    %72 = vector.broadcast %71 : vector<17x1xf32> to vector<17x17xf32>
    %73 = arith.subf %69, %72 : vector<17x17xf32>
    %74 = math.exp %73 : vector<17x17xf32>
    %cst_30 = arith.constant dense<0.000000e+00> : vector<17xf32>
    %75 = vector.multi_reduction <add>, %74, %cst_30 [1] : vector<17x17xf32> to vector<17xf32>
    %76 = vector.shape_cast %75 : vector<17xf32> to vector<17x1xf32>
    %77 = tpu.reciprocal %76 {approx = true} : vector<17x1xf32> -> vector<17x1xf32>
    %78 = vector.broadcast %77 : vector<17x1xf32> to vector<17x17xf32>
    %79 = arith.mulf %74, %78 : vector<17x17xf32>
    %80 = arith.truncf %79 : vector<17x17xf32> to vector<17x17xbf16>
    %cst_31 = arith.constant dense<0.000000e+00> : vector<17x16xf32>
    %81 = tpu.matmul %80, %66, %cst_31 {dimension_numbers = #tpu.dot_dimension_numbers<[1], [0], [0], [1], [0, 0, 1, 1], [], []>} : vector<17x17xbf16>, vector<17x16xbf16>, vector<17x16xf32> -> vector<17x16xf32>
    %c0_32 = arith.constant 0 : index
    %c16 = arith.constant 16 : index
    %82 = vector.load %arg16[%c0_32, %c16] : memref<17x32xf32, #tpu.memory_space<vmem>>, vector<17x16xf32>
    tpu.vector_store %arg16[%c0_32, %c16], %81 {strides = array<i32>} : memref<17x32xf32, #tpu.memory_space<vmem>>, vector<17x16xf32>,
    %c0_33 = arith.constant 0 : index
    %c0_34 = arith.constant 0 : index
    %83 = vector.load %arg16[%c0_33, %c0_34] : memref<17x32xf32, #tpu.memory_space<vmem>>, vector<17x32xf32>
    %84 = arith.truncf %83 : vector<17x32xf32> to vector<17x32xbf16>
    %c0_35 = arith.constant 0 : index
    %c0_36 = arith.constant 0 : index
    %c0_37 = arith.constant 0 : index
    %85 = vector.load %arg7[%c0_35, %c0_36, %c0_37] : memref<1x32x32xbf16, #tpu.memory_space<vmem>>, vector<1x32x32xbf16>
    %86 = vector.shape_cast %85 : vector<1x32x32xbf16> to vector<32x32xbf16>
    %cst_38 = arith.constant dense<0.000000e+00> : vector<17x32xf32>
    %87 = tpu.matmul %84, %86, %cst_38 {dimension_numbers = #tpu.dot_dimension_numbers<[1], [0], [0], [1], [0, 0, 1, 1], [], []>} : vector<17x32xbf16>, vector<32x32xbf16>, vector<17x32xf32> -> vector<17x32xf32>
    %c0_39 = arith.constant 0 : index
    %c0_40 = arith.constant 0 : index
    %c0_41 = arith.constant 0 : index
    %88 = vector.load %arg8[%c0_39, %c0_40, %c0_41] : memref<1x1x32xf32, #tpu.memory_space<vmem>>, vector<1x1x32xf32>
    %89 = vector.shape_cast %88 : vector<1x1x32xf32> to vector<1x32xf32>
    %90 = vector.broadcast %89 : vector<1x32xf32> to vector<17x32xf32>
    %91 = arith.addf %87, %90 : vector<17x32xf32>
    %92 = arith.addf %4, %91 : vector<17x32xf32>
    %c0_42 = arith.constant 0 : index
    %c0_43 = arith.constant 0 : index
    %c0_44 = arith.constant 0 : index
    %93 = vector.load %arg9[%c0_42, %c0_43, %c0_44] : memref<1x1x32xf32, #tpu.memory_space<vmem>>, vector<1x1x32xf32>
    %94 = vector.shape_cast %93 : vector<1x1x32xf32> to vector<1x32xf32>
    %c0_45 = arith.constant 0 : index
    %c0_46 = arith.constant 0 : index
    %c0_47 = arith.constant 0 : index
    %95 = vector.load %arg10[%c0_45, %c0_46, %c0_47] : memref<1x1x32xf32, #tpu.memory_space<vmem>>, vector<1x1x32xf32>
    %96 = vector.shape_cast %95 : vector<1x1x32xf32> to vector<1x32xf32>
    %cst_48 = arith.constant dense<0.000000e+00> : vector<17xf32>
    %97 = vector.multi_reduction <add>, %92, %cst_48 [1] : vector<17x32xf32> to vector<17xf32>
    %98 = vector.shape_cast %97 : vector<17xf32> to vector<17x1xf32>
    %cst_49 = arith.constant 3.200000e+01 : f32
    %99 = vector.broadcast %cst_49 : f32 to vector<17x1xf32>
    %100 = arith.divf %98, %99 : vector<17x1xf32>
    %101 = vector.broadcast %100 : vector<17x1xf32> to vector<17x32xf32>
    %102 = arith.subf %92, %101 : vector<17x32xf32>
    %103 = arith.mulf %102, %102 : vector<17x32xf32>
    %cst_50 = arith.constant dense<0.000000e+00> : vector<17xf32>
    %104 = vector.multi_reduction <add>, %103, %cst_50 [1] : vector<17x32xf32> to vector<17xf32>
    %105 = vector.shape_cast %104 : vector<17xf32> to vector<17x1xf32>
    %cst_51 = arith.constant 3.200000e+01 : f32
    %106 = vector.broadcast %cst_51 : f32 to vector<17x1xf32>
    %107 = arith.divf %105, %106 : vector<17x1xf32>
    %108 = vector.broadcast %100 : vector<17x1xf32> to vector<17x32xf32>
    %109 = arith.subf %92, %108 : vector<17x32xf32>
    %cst_52 = arith.constant 9.99999997E-7 : f32
    %110 = vector.broadcast %cst_52 : f32 to vector<17x1xf32>
    %111 = arith.addf %107, %110 : vector<17x1xf32>
    %112 = math.rsqrt %111 : vector<17x1xf32>
    %113 = vector.broadcast %112 : vector<17x1xf32> to vector<17x32xf32>
    %114 = arith.mulf %109, %113 : vector<17x32xf32>
    %115 = vector.broadcast %94 : vector<1x32xf32> to vector<17x32xf32>
    %116 = arith.mulf %114, %115 : vector<17x32xf32>
    %117 = vector.broadcast %96 : vector<1x32xf32> to vector<17x32xf32>
    %118 = arith.addf %116, %117 : vector<17x32xf32>
    %119 = arith.truncf %118 : vector<17x32xf32> to vector<17x32xbf16>
    %c0_53 = arith.constant 0 : index
    %c0_54 = arith.constant 0 : index
    %c0_55 = arith.constant 0 : index
    %120 = vector.load %arg11[%c0_53, %c0_54, %c0_55] : memref<1x32x128xbf16, #tpu.memory_space<vmem>>, vector<1x32x128xbf16>
    %121 = vector.shape_cast %120 : vector<1x32x128xbf16> to vector<32x128xbf16>
    %cst_56 = arith.constant dense<0.000000e+00> : vector<17x128xf32>
    %122 = tpu.matmul %119, %121, %cst_56 {dimension_numbers = #tpu.dot_dimension_numbers<[1], [0], [0], [1], [0, 0, 1, 1], [], []>} : vector<17x32xbf16>, vector<32x128xbf16>, vector<17x128xf32> -> vector<17x128xf32>
    %c0_57 = arith.constant 0 : index
    %c0_58 = arith.constant 0 : index
    %c0_59 = arith.constant 0 : index
    %123 = vector.load %arg12[%c0_57, %c0_58, %c0_59] : memref<1x1x128xf32, #tpu.memory_space<vmem>>, vector<1x1x128xf32>
    %124 = vector.shape_cast %123 : vector<1x1x128xf32> to vector<1x128xf32>
    %125 = vector.broadcast %124 : vector<1x128xf32> to vector<17x128xf32>
    %126 = arith.addf %122, %125 : vector<17x128xf32>
    %cst_60 = arith.constant 5.000000e-01 : f32
    %127 = vector.broadcast %cst_60 : f32 to vector<17x128xf32>
    %128 = arith.mulf %127, %126 : vector<17x128xf32>
    %cst_61 = arith.constant 4.471500e-02 : f32
    %129 = vector.broadcast %cst_61 : f32 to vector<17x128xf32>
    %130 = arith.mulf %129, %126 : vector<17x128xf32>
    %131 = arith.mulf %130, %126 : vector<17x128xf32>
    %132 = arith.mulf %131, %126 : vector<17x128xf32>
    %133 = arith.addf %126, %132 : vector<17x128xf32>
    %cst_62 = arith.constant 0.797884583 : f32
    %134 = vector.broadcast %cst_62 : f32 to vector<17x128xf32>
    %135 = arith.mulf %134, %133 : vector<17x128xf32>
    %136 = math.tanh %135 : vector<17x128xf32>
    %cst_63 = arith.constant 1.000000e+00 : f32
    %137 = vector.broadcast %cst_63 : f32 to vector<17x128xf32>
    %138 = arith.addf %137, %136 : vector<17x128xf32>
    %139 = arith.mulf %128, %138 : vector<17x128xf32>
    %140 = arith.truncf %139 : vector<17x128xf32> to vector<17x128xbf16>
    %c0_64 = arith.constant 0 : index
    %c0_65 = arith.constant 0 : index
    %c0_66 = arith.constant 0 : index
    %141 = vector.load %arg13[%c0_64, %c0_65, %c0_66] : memref<1x128x32xbf16, #tpu.memory_space<vmem>>, vector<1x128x32xbf16>
    %142 = vector.shape_cast %141 : vector<1x128x32xbf16> to vector<128x32xbf16>
    %cst_67 = arith.constant dense<0.000000e+00> : vector<17x32xf32>
    %143 = tpu.matmul %140, %142, %cst_67 {dimension_numbers = #tpu.dot_dimension_numbers<[1], [0], [0], [1], [0, 0, 1, 1], [], []>} : vector<17x128xbf16>, vector<128x32xbf16>, vector<17x32xf32> -> vector<17x32xf32>
    %c0_68 = arith.constant 0 : index
    %c0_69 = arith.constant 0 : index
    %c0_70 = arith.constant 0 : index
    %144 = vector.load %arg14[%c0_68, %c0_69, %c0_70] : memref<1x1x32xf32, #tpu.memory_space<vmem>>, vector<1x1x32xf32>
    %145 = vector.shape_cast %144 : vector<1x1x32xf32> to vector<1x32xf32>
    %146 = vector.broadcast %145 : vector<1x32xf32> to vector<17x32xf32>
    %147 = arith.addf %143, %146 : vector<17x32xf32>
    %148 = arith.addf %92, %147 : vector<17x32xf32>
    %c0_71 = arith.constant 0 : index
    %c0_72 = arith.constant 0 : index
    %c0_73 = arith.constant 0 : index
    %149 = vector.load %arg15[%c0_71, %c0_72, %c0_73] : memref<1x17x32xf32, #tpu.memory_space<vmem>>, vector<1x17x32xf32>
    %150 = vector.shape_cast %149 : vector<1x17x32xf32> to vector<17x32xf32>
    %151 = vector.shape_cast %148 : vector<17x32xf32> to vector<1x17x32xf32>
    tpu.vector_store %arg15[%c0_71, %c0_72, %c0_73], %151 {strides = array<i32>} : memref<1x17x32xf32, #tpu.memory_space<vmem>>, vector<1x17x32xf32>,
    return
  }
  func.func @transform_0(%arg0: i32, %arg1: i32) -> (i32, i32, i32) {
    %c0_i32 = arith.constant 0 : i32
    %c0_i32_0 = arith.constant 0 : i32
    %c0_i32_1 = arith.constant 0 : i32
    return %arg0, %c0_i32, %c0_i32_0 : i32, i32, i32
  }
  func.func @transform_1(%arg0: i32, %arg1: i32) -> (i32, i32, i32) {
    %c0_i32 = arith.constant 0 : i32
    %c0_i32_0 = arith.constant 0 : i32
    %c0_i32_1 = arith.constant 0 : i32
    return %arg1, %c0_i32, %c0_i32_0 : i32, i32, i32
  }
  func.func @transform_2(%arg0: i32, %arg1: i32) -> (i32, i32, i32) {
    %c0_i32 = arith.constant 0 : i32
    %c0_i32_0 = arith.constant 0 : i32
    %c0_i32_1 = arith.constant 0 : i32
    return %arg1, %c0_i32, %c0_i32_0 : i32, i32, i32
  }
  func.func @transform_3(%arg0: i32, %arg1: i32) -> (i32, i32, i32) {
    %c0_i32 = arith.constant 0 : i32
    %c0_i32_0 = arith.constant 0 : i32
    %c0_i32_1 = arith.constant 0 : i32
    return %arg1, %c0_i32, %c0_i32_0 : i32, i32, i32
  }
  func.func @transform_4(%arg0: i32, %arg1: i32) -> (i32, i32, i32) {
    %c0_i32 = arith.constant 0 : i32
    %c0_i32_0 = arith.constant 0 : i32
    %c0_i32_1 = arith.constant 0 : i32
    return %arg1, %c0_i32, %c0_i32_0 : i32, i32, i32
  }
  func.func @transform_5(%arg0: i32, %arg1: i32) -> (i32, i32, i32) {
    %c0_i32 = arith.constant 0 : i32
    %c0_i32_0 = arith.constant 0 : i32
    %c0_i32_1 = arith.constant 0 : i32
    return %arg1, %c0_i32, %c0_i32_0 : i32, i32, i32
  }
  func.func @transform_6(%arg0: i32, %arg1: i32) -> (i32, i32, i32) {
    %c0_i32 = arith.constant 0 : i32
    %c0_i32_0 = arith.constant 0 : i32
    %c0_i32_1 = arith.constant 0 : i32
    return %arg1, %c0_i32, %c0_i32_0 : i32, i32, i32
  }
  func.func @transform_7(%arg0: i32, %arg1: i32) -> (i32, i32, i32) {
    %c0_i32 = arith.constant 0 : i32
    %c0_i32_0 = arith.constant 0 : i32
    %c0_i32_1 = arith.constant 0 : i32
    return %arg1, %c0_i32, %c0_i32_0 : i32, i32, i32
  }
  func.func @transform_8(%arg0: i32, %arg1: i32) -> (i32, i32, i32) {
    %c0_i32 = arith.constant 0 : i32
    %c0_i32_0 = arith.constant 0 : i32
    %c0_i32_1 = arith.constant 0 : i32
    return %arg1, %c0_i32, %c0_i32_0 : i32, i32, i32
  }
  func.func @transform_9(%arg0: i32, %arg1: i32) -> (i32, i32, i32) {
    %c0_i32 = arith.constant 0 : i32
    %c0_i32_0 = arith.constant 0 : i32
    %c0_i32_1 = arith.constant 0 : i32
    return %arg1, %c0_i32, %c0_i32_0 : i32, i32, i32
  }
  func.func @transform_10(%arg0: i32, %arg1: i32) -> (i32, i32, i32) {
    %c0_i32 = arith.constant 0 : i32
    %c0_i32_0 = arith.constant 0 : i32
    %c0_i32_1 = arith.constant 0 : i32
    return %arg1, %c0_i32, %c0_i32_0 : i32, i32, i32
  }
  func.func @transform_11(%arg0: i32, %arg1: i32) -> (i32, i32, i32) {
    %c0_i32 = arith.constant 0 : i32
    %c0_i32_0 = arith.constant 0 : i32
    %c0_i32_1 = arith.constant 0 : i32
    return %arg1, %c0_i32, %c0_i32_0 : i32, i32, i32
  }
  func.func @transform_12(%arg0: i32, %arg1: i32) -> (i32, i32, i32) {
    %c0_i32 = arith.constant 0 : i32
    %c0_i32_0 = arith.constant 0 : i32
    %c0_i32_1 = arith.constant 0 : i32
    return %arg1, %c0_i32, %c0_i32_0 : i32, i32, i32
  }
  func.func @transform_13(%arg0: i32, %arg1: i32) -> (i32, i32, i32) {
    %c0_i32 = arith.constant 0 : i32
    %c0_i32_0 = arith.constant 0 : i32
    %c0_i32_1 = arith.constant 0 : i32
    return %arg0, %c0_i32, %c0_i32_0 : i32, i32, i32
  }
}

module attributes {stable_mosaic.version = 11 : i64} {
  func.func @_query_match_kernel(%arg0: i32, %arg1: memref<2x32xf32, #tpu.memory_space<vmem>>, %arg2: memref<1x32xf32, #tpu.memory_space<vmem>>, %arg3: memref<1x32xf32, #tpu.memory_space<vmem>>, %arg4: memref<10x32xf32, #tpu.memory_space<vmem>>, %arg5: memref<1x10xf32, #tpu.memory_space<vmem>>, %arg6: memref<2x10xf32, #tpu.memory_space<vmem>>) attributes {dimension_semantics = [#tpu.dimension_semantics<arbitrary>], iteration_bounds = array<i64: 1>, scalar_prefetch = 0 : i64, scratch_operands = 0 : i64, tpu.core_type = #tpu.core_type<tc>, window_params = [{pipeline_mode = #tpu.pipeline_mode<synchronous>, transform_indices = @transform_0, window_bounds = array<i64: 2, 32>}, {pipeline_mode = #tpu.pipeline_mode<synchronous>, transform_indices = @transform_1, window_bounds = array<i64: 1, 32>}, {pipeline_mode = #tpu.pipeline_mode<synchronous>, transform_indices = @transform_2, window_bounds = array<i64: 1, 32>}, {pipeline_mode = #tpu.pipeline_mode<synchronous>, transform_indices = @transform_3, window_bounds = array<i64: 10, 32>}, {pipeline_mode = #tpu.pipeline_mode<synchronous>, transform_indices = @transform_4, window_bounds = array<i64: 1, 10>}, {pipeline_mode = #tpu.pipeline_mode<synchronous>, transform_indices = @transform_5, window_bounds = array<i64: 2, 10>}]} {
    %c0 = arith.constant 0 : index
    %c0_0 = arith.constant 0 : index
    %0 = vector.load %arg1[%c0, %c0_0] : memref<2x32xf32, #tpu.memory_space<vmem>>, vector<2x32xf32>
    %c0_1 = arith.constant 0 : index
    %c0_2 = arith.constant 0 : index
    %1 = vector.load %arg2[%c0_1, %c0_2] : memref<1x32xf32, #tpu.memory_space<vmem>>, vector<1x32xf32>
    %c0_3 = arith.constant 0 : index
    %c0_4 = arith.constant 0 : index
    %2 = vector.load %arg3[%c0_3, %c0_4] : memref<1x32xf32, #tpu.memory_space<vmem>>, vector<1x32xf32>
    %cst = arith.constant dense<0.000000e+00> : vector<2xf32>
    %3 = vector.multi_reduction <add>, %0, %cst [1] : vector<2x32xf32> to vector<2xf32>
    %4 = vector.shape_cast %3 : vector<2xf32> to vector<2x1xf32>
    %cst_5 = arith.constant 3.200000e+01 : f32
    %5 = vector.broadcast %cst_5 : f32 to vector<2x1xf32>
    %6 = arith.divf %4, %5 : vector<2x1xf32>
    %7 = vector.broadcast %6 : vector<2x1xf32> to vector<2x32xf32>
    %8 = arith.subf %0, %7 : vector<2x32xf32>
    %9 = arith.mulf %8, %8 : vector<2x32xf32>
    %cst_6 = arith.constant dense<0.000000e+00> : vector<2xf32>
    %10 = vector.multi_reduction <add>, %9, %cst_6 [1] : vector<2x32xf32> to vector<2xf32>
    %11 = vector.shape_cast %10 : vector<2xf32> to vector<2x1xf32>
    %cst_7 = arith.constant 3.200000e+01 : f32
    %12 = vector.broadcast %cst_7 : f32 to vector<2x1xf32>
    %13 = arith.divf %11, %12 : vector<2x1xf32>
    %14 = vector.broadcast %6 : vector<2x1xf32> to vector<2x32xf32>
    %15 = arith.subf %0, %14 : vector<2x32xf32>
    %cst_8 = arith.constant 9.99999997E-7 : f32
    %16 = vector.broadcast %cst_8 : f32 to vector<2x1xf32>
    %17 = arith.addf %13, %16 : vector<2x1xf32>
    %18 = math.rsqrt %17 : vector<2x1xf32>
    %19 = vector.broadcast %18 : vector<2x1xf32> to vector<2x32xf32>
    %20 = arith.mulf %15, %19 : vector<2x32xf32>
    %21 = vector.broadcast %1 : vector<1x32xf32> to vector<2x32xf32>
    %22 = arith.mulf %20, %21 : vector<2x32xf32>
    %23 = vector.broadcast %2 : vector<1x32xf32> to vector<2x32xf32>
    %24 = arith.addf %22, %23 : vector<2x32xf32>
    %25 = arith.truncf %24 : vector<2x32xf32> to vector<2x32xbf16>
    %c0_9 = arith.constant 0 : index
    %c0_10 = arith.constant 0 : index
    %26 = vector.load %arg4[%c0_9, %c0_10] : memref<10x32xf32, #tpu.memory_space<vmem>>, vector<10x32xf32>
    %27 = arith.truncf %26 : vector<10x32xf32> to vector<10x32xbf16>
    %cst_11 = arith.constant dense<0.000000e+00> : vector<2x10xf32>
    %28 = tpu.matmul %25, %27, %cst_11 {dimension_numbers = #tpu.dot_dimension_numbers<[1], [1], [0], [0], [0, 0, 1, 0], [], []>} : vector<2x32xbf16>, vector<10x32xbf16>, vector<2x10xf32> -> vector<2x10xf32>
    %29 = arith.mulf %24, %24 : vector<2x32xf32>
    %cst_12 = arith.constant dense<0.000000e+00> : vector<2xf32>
    %30 = vector.multi_reduction <add>, %29, %cst_12 [1] : vector<2x32xf32> to vector<2xf32>
    %31 = vector.shape_cast %30 : vector<2xf32> to vector<2x1xf32>
    %32 = math.sqrt %31 : vector<2x1xf32>
    %cst_13 = arith.constant 9.99999993E-9 : f32
    %33 = vector.broadcast %cst_13 : f32 to vector<2x1xf32>
    %34 = arith.maximumf %32, %33 : vector<2x1xf32>
    %c0_14 = arith.constant 0 : index
    %c0_15 = arith.constant 0 : index
    %35 = vector.load %arg5[%c0_14, %c0_15] : memref<1x10xf32, #tpu.memory_space<vmem>>, vector<1x10xf32>
    %cst_16 = arith.constant 9.99999993E-9 : f32
    %36 = vector.broadcast %cst_16 : f32 to vector<1x10xf32>
    %37 = arith.maximumf %35, %36 : vector<1x10xf32>
    %38 = vector.broadcast %34 : vector<2x1xf32> to vector<2x10xf32>
    %39 = vector.broadcast %37 : vector<1x10xf32> to vector<2x10xf32>
    %40 = arith.mulf %38, %39 : vector<2x10xf32>
    %41 = arith.divf %28, %40 : vector<2x10xf32>
    %cst_17 = arith.constant 1.000000e+00 : f32
    %42 = vector.broadcast %cst_17 : f32 to vector<2x10xf32>
    %43 = arith.subf %42, %41 : vector<2x10xf32>
    %c0_18 = arith.constant 0 : index
    %c0_19 = arith.constant 0 : index
    %44 = vector.load %arg6[%c0_18, %c0_19] : memref<2x10xf32, #tpu.memory_space<vmem>>, vector<2x10xf32>
    tpu.vector_store %arg6[%c0_18, %c0_19], %43 {strides = array<i32>} : memref<2x10xf32, #tpu.memory_space<vmem>>, vector<2x10xf32>,
    return
  }
  func.func @transform_0(%arg0: i32) -> (i32, i32) {
    %c0_i32 = arith.constant 0 : i32
    %c0_i32_0 = arith.constant 0 : i32
    %c0_i32_1 = arith.constant 0 : i32
    return %c0_i32, %c0_i32_0 : i32, i32
  }
  func.func @transform_1(%arg0: i32) -> (i32, i32) {
    %c0_i32 = arith.constant 0 : i32
    %c0_i32_0 = arith.constant 0 : i32
    %c0_i32_1 = arith.constant 0 : i32
    return %c0_i32, %c0_i32_0 : i32, i32
  }
  func.func @transform_2(%arg0: i32) -> (i32, i32) {
    %c0_i32 = arith.constant 0 : i32
    %c0_i32_0 = arith.constant 0 : i32
    %c0_i32_1 = arith.constant 0 : i32
    return %c0_i32, %c0_i32_0 : i32, i32
  }
  func.func @transform_3(%arg0: i32) -> (i32, i32) {
    %c0_i32 = arith.constant 0 : i32
    %c0_i32_0 = arith.constant 0 : i32
    %c0_i32_1 = arith.constant 0 : i32
    return %c0_i32, %c0_i32_0 : i32, i32
  }
  func.func @transform_4(%arg0: i32) -> (i32, i32) {
    %c0_i32 = arith.constant 0 : i32
    %c0_i32_0 = arith.constant 0 : i32
    %c0_i32_1 = arith.constant 0 : i32
    return %c0_i32, %c0_i32_0 : i32, i32
  }
  func.func @transform_5(%arg0: i32) -> (i32, i32) {
    %c0_i32 = arith.constant 0 : i32
    %c0_i32_0 = arith.constant 0 : i32
    %c0_i32_1 = arith.constant 0 : i32
    return %c0_i32, %c0_i32_0 : i32, i32
  }
}

module attributes {stable_mosaic.version = 11 : i64} {
  func.func @_vit_pass_kernel(%arg0: i32, %arg1: i32, %arg2: memref<1x67x32xf32, #tpu.memory_space<vmem>>, %arg3: memref<1x1x32xf32, #tpu.memory_space<vmem>>, %arg4: memref<1x1x32xf32, #tpu.memory_space<vmem>>, %arg5: memref<1x32x96xbf16, #tpu.memory_space<vmem>>, %arg6: memref<1x1x96xf32, #tpu.memory_space<vmem>>, %arg7: memref<1x32x32xbf16, #tpu.memory_space<vmem>>, %arg8: memref<1x1x32xf32, #tpu.memory_space<vmem>>, %arg9: memref<1x1x32xf32, #tpu.memory_space<vmem>>, %arg10: memref<1x1x32xf32, #tpu.memory_space<vmem>>, %arg11: memref<1x32x128xbf16, #tpu.memory_space<vmem>>, %arg12: memref<1x1x128xf32, #tpu.memory_space<vmem>>, %arg13: memref<1x128x32xbf16, #tpu.memory_space<vmem>>, %arg14: memref<1x1x32xf32, #tpu.memory_space<vmem>>, %arg15: memref<1x67x32xf32, #tpu.memory_space<vmem>>, %arg16: memref<67x32xf32, #tpu.memory_space<vmem>>) attributes {dimension_semantics = [#tpu.dimension_semantics<parallel>, #tpu.dimension_semantics<arbitrary>], iteration_bounds = array<i64: 2, 2>, scalar_prefetch = 0 : i64, scratch_operands = 1 : i64, tpu.core_type = #tpu.core_type<tc>, window_params = [{transform_indices = @transform_0, window_bounds = array<i64: 1, 67, 32>}, {transform_indices = @transform_1, window_bounds = array<i64: 1, 1, 32>}, {transform_indices = @transform_2, window_bounds = array<i64: 1, 1, 32>}, {transform_indices = @transform_3, window_bounds = array<i64: 1, 32, 96>}, {transform_indices = @transform_4, window_bounds = array<i64: 1, 1, 96>}, {transform_indices = @transform_5, window_bounds = array<i64: 1, 32, 32>}, {transform_indices = @transform_6, window_bounds = array<i64: 1, 1, 32>}, {transform_indices = @transform_7, window_bounds = array<i64: 1, 1, 32>}, {transform_indices = @transform_8, window_bounds = array<i64: 1, 1, 32>}, {transform_indices = @transform_9, window_bounds = array<i64: 1, 32, 128>}, {transform_indices = @transform_10, window_bounds = array<i64: 1, 1, 128>}, {transform_indices = @transform_11, window_bounds = array<i64: 1, 128, 32>}, {transform_indices = @transform_12, window_bounds = array<i64: 1, 1, 32>}, {transform_indices = @transform_13, window_bounds = array<i64: 1, 67, 32>}]} {
    %c0_i32 = arith.constant 0 : i32
    %0 = arith.cmpi eq, %arg1, %c0_i32 : i32
    %1 = arith.extui %0 : i1 to i32
    %c0_i32_0 = arith.constant 0 : i32
    %2 = arith.cmpi ne, %1, %c0_i32_0 : i32
    scf.if %2 {
      %c0_74 = arith.constant 0 : index
      %c0_75 = arith.constant 0 : index
      %c0_76 = arith.constant 0 : index
      %152 = vector.load %arg2[%c0_74, %c0_75, %c0_76] : memref<1x67x32xf32, #tpu.memory_space<vmem>>, vector<1x67x32xf32>
      %153 = vector.shape_cast %152 : vector<1x67x32xf32> to vector<67x32xf32>
      %c0_77 = arith.constant 0 : index
      %c0_78 = arith.constant 0 : index
      %c0_79 = arith.constant 0 : index
      %154 = vector.load %arg15[%c0_77, %c0_78, %c0_79] : memref<1x67x32xf32, #tpu.memory_space<vmem>>, vector<1x67x32xf32>
      %155 = vector.shape_cast %154 : vector<1x67x32xf32> to vector<67x32xf32>
      %156 = vector.shape_cast %153 : vector<67x32xf32> to vector<1x67x32xf32>
      tpu.vector_store %arg15[%c0_77, %c0_78, %c0_79], %156 {strides = array<i32>} : memref<1x67x32xf32, #tpu.memory_space<vmem>>, vector<1x67x32xf32>,
    } else {
    }
    %c0 = arith.constant 0 : index
    %c0_1 = arith.constant 0 : index
    %c0_2 = arith.constant 0 : index
    %3 = vector.load %arg15[%c0, %c0_1, %c0_2] : memref<1x67x32xf32, #tpu.memory_space<vmem>>, vector<1x67x32xf32>
    %4 = vector.shape_cast %3 : vector<1x67x32xf32> to vector<67x32xf32>
    %c0_3 = arith.constant 0 : index
    %c0_4 = arith.constant 0 : index
    %c0_5 = arith.constant 0 : index
    %5 = vector.load %arg3[%c0_3, %c0_4, %c0_5] : memref<1x1x32xf32, #tpu.memory_space<vmem>>, vector<1x1x32xf32>
    %6 = vector.shape_cast %5 : vector<1x1x32xf32> to vector<1x32xf32>
    %c0_6 = arith.constant 0 : index
    %c0_7 = arith.constant 0 : index
    %c0_8 = arith.constant 0 : index
    %7 = vector.load %arg4[%c0_6, %c0_7, %c0_8] : memref<1x1x32xf32, #tpu.memory_space<vmem>>, vector<1x1x32xf32>
    %8 = vector.shape_cast %7 : vector<1x1x32xf32> to vector<1x32xf32>
    %cst = arith.constant dense<0.000000e+00> : vector<67xf32>
    %9 = vector.multi_reduction <add>, %4, %cst [1] : vector<67x32xf32> to vector<67xf32>
    %10 = vector.shape_cast %9 : vector<67xf32> to vector<67x1xf32>
    %cst_9 = arith.constant 3.200000e+01 : f32
    %11 = vector.broadcast %cst_9 : f32 to vector<67x1xf32>
    %12 = arith.divf %10, %11 : vector<67x1xf32>
    %13 = vector.broadcast %12 : vector<67x1xf32> to vector<67x32xf32>
    %14 = arith.subf %4, %13 : vector<67x32xf32>
    %15 = arith.mulf %14, %14 : vector<67x32xf32>
    %cst_10 = arith.constant dense<0.000000e+00> : vector<67xf32>
    %16 = vector.multi_reduction <add>, %15, %cst_10 [1] : vector<67x32xf32> to vector<67xf32>
    %17 = vector.shape_cast %16 : vector<67xf32> to vector<67x1xf32>
    %cst_11 = arith.constant 3.200000e+01 : f32
    %18 = vector.broadcast %cst_11 : f32 to vector<67x1xf32>
    %19 = arith.divf %17, %18 : vector<67x1xf32>
    %20 = vector.broadcast %12 : vector<67x1xf32> to vector<67x32xf32>
    %21 = arith.subf %4, %20 : vector<67x32xf32>
    %cst_12 = arith.constant 9.99999997E-7 : f32
    %22 = vector.broadcast %cst_12 : f32 to vector<67x1xf32>
    %23 = arith.addf %19, %22 : vector<67x1xf32>
    %24 = math.rsqrt %23 : vector<67x1xf32>
    %25 = vector.broadcast %24 : vector<67x1xf32> to vector<67x32xf32>
    %26 = arith.mulf %21, %25 : vector<67x32xf32>
    %27 = vector.broadcast %6 : vector<1x32xf32> to vector<67x32xf32>
    %28 = arith.mulf %26, %27 : vector<67x32xf32>
    %29 = vector.broadcast %8 : vector<1x32xf32> to vector<67x32xf32>
    %30 = arith.addf %28, %29 : vector<67x32xf32>
    %31 = arith.truncf %30 : vector<67x32xf32> to vector<67x32xbf16>
    %c0_13 = arith.constant 0 : index
    %c0_14 = arith.constant 0 : index
    %c0_15 = arith.constant 0 : index
    %32 = vector.load %arg5[%c0_13, %c0_14, %c0_15] : memref<1x32x96xbf16, #tpu.memory_space<vmem>>, vector<1x32x96xbf16>
    %33 = vector.shape_cast %32 : vector<1x32x96xbf16> to vector<32x96xbf16>
    %cst_16 = arith.constant dense<0.000000e+00> : vector<67x96xf32>
    %34 = tpu.matmul %31, %33, %cst_16 {dimension_numbers = #tpu.dot_dimension_numbers<[1], [0], [0], [1], [0, 0, 1, 1], [], []>} : vector<67x32xbf16>, vector<32x96xbf16>, vector<67x96xf32> -> vector<67x96xf32>
    %c0_17 = arith.constant 0 : index
    %c0_18 = arith.constant 0 : index
    %c0_19 = arith.constant 0 : index
    %35 = vector.load %arg6[%c0_17, %c0_18, %c0_19] : memref<1x1x96xf32, #tpu.memory_space<vmem>>, vector<1x1x96xf32>
    %36 = vector.shape_cast %35 : vector<1x1x96xf32> to vector<1x96xf32>
    %37 = vector.broadcast %36 : vector<1x96xf32> to vector<67x96xf32>
    %38 = arith.addf %34, %37 : vector<67x96xf32>
    %39 = vector.extract_strided_slice %38 {offsets = [0, 0], sizes = [67, 16], strides = [1, 1]} : vector<67x96xf32> to vector<67x16xf32>
    %40 = arith.truncf %39 : vector<67x16xf32> to vector<67x16xbf16>
    %41 = vector.extract_strided_slice %38 {offsets = [0, 32], sizes = [67, 16], strides = [1, 1]} : vector<67x96xf32> to vector<67x16xf32>
    %42 = arith.truncf %41 : vector<67x16xf32> to vector<67x16xbf16>
    %43 = vector.extract_strided_slice %38 {offsets = [0, 64], sizes = [67, 16], strides = [1, 1]} : vector<67x96xf32> to vector<67x16xf32>
    %44 = arith.truncf %43 : vector<67x16xf32> to vector<67x16xbf16>
    %cst_20 = arith.constant dense<0.000000e+00> : vector<67x67xf32>
    %45 = tpu.matmul %40, %42, %cst_20 {dimension_numbers = #tpu.dot_dimension_numbers<[1], [1], [0], [0], [0, 0, 1, 0], [], []>} : vector<67x16xbf16>, vector<67x16xbf16>, vector<67x67xf32> -> vector<67x67xf32>
    %cst_21 = arith.constant 2.500000e-01 : f32
    %46 = vector.broadcast %cst_21 : f32 to vector<67x67xf32>
    %47 = arith.mulf %45, %46 : vector<67x67xf32>
    %cst_22 = arith.constant dense<0xFF800000> : vector<67xf32>
    %48 = vector.multi_reduction <maximumf>, %47, %cst_22 [1] : vector<67x67xf32> to vector<67xf32>
    %49 = vector.shape_cast %48 : vector<67xf32> to vector<67x1xf32>
    %50 = vector.broadcast %49 : vector<67x1xf32> to vector<67x67xf32>
    %51 = arith.subf %47, %50 : vector<67x67xf32>
    %52 = math.exp %51 : vector<67x67xf32>
    %cst_23 = arith.constant dense<0.000000e+00> : vector<67xf32>
    %53 = vector.multi_reduction <add>, %52, %cst_23 [1] : vector<67x67xf32> to vector<67xf32>
    %54 = vector.shape_cast %53 : vector<67xf32> to vector<67x1xf32>
    %55 = tpu.reciprocal %54 {approx = true} : vector<67x1xf32> -> vector<67x1xf32>
    %56 = vector.broadcast %55 : vector<67x1xf32> to vector<67x67xf32>
    %57 = arith.mulf %52, %56 : vector<67x67xf32>
    %58 = arith.truncf %57 : vector<67x67xf32> to vector<67x67xbf16>
    %cst_24 = arith.constant dense<0.000000e+00> : vector<67x16xf32>
    %59 = tpu.matmul %58, %44, %cst_24 {dimension_numbers = #tpu.dot_dimension_numbers<[1], [0], [0], [1], [0, 0, 1, 1], [], []>} : vector<67x67xbf16>, vector<67x16xbf16>, vector<67x16xf32> -> vector<67x16xf32>
    %c0_25 = arith.constant 0 : index
    %c0_26 = arith.constant 0 : index
    %60 = vector.load %arg16[%c0_25, %c0_26] : memref<67x32xf32, #tpu.memory_space<vmem>>, vector<67x16xf32>
    tpu.vector_store %arg16[%c0_25, %c0_26], %59 {strides = array<i32>} : memref<67x32xf32, #tpu.memory_space<vmem>>, vector<67x16xf32>,
    %61 = vector.extract_strided_slice %38 {offsets = [0, 16], sizes = [67, 16], strides = [1, 1]} : vector<67x96xf32> to vector<67x16xf32>
    %62 = arith.truncf %61 : vector<67x16xf32> to vector<67x16xbf16>
    %63 = vector.extract_strided_slice %38 {offsets = [0, 48], sizes = [67, 16], strides = [1, 1]} : vector<67x96xf32> to vector<67x16xf32>
    %64 = arith.truncf %63 : vector<67x16xf32> to vector<67x16xbf16>
    %65 = vector.extract_strided_slice %38 {offsets = [0, 80], sizes = [67, 16], strides = [1, 1]} : vector<67x96xf32> to vector<67x16xf32>
    %66 = arith.truncf %65 : vector<67x16xf32> to vector<67x16xbf16>
    %cst_27 = arith.constant dense<0.000000e+00> : vector<67x67xf32>
    %67 = tpu.matmul %62, %64, %cst_27 {dimension_numbers = #tpu.dot_dimension_numbers<[1], [1], [0], [0], [0, 0, 1, 0], [], []>} : vector<67x16xbf16>, vector<67x16xbf16>, vector<67x67xf32> -> vector<67x67xf32>
    %cst_28 = arith.constant 2.500000e-01 : f32
    %68 = vector.broadcast %cst_28 : f32 to vector<67x67xf32>
    %69 = arith.mulf %67, %68 : vector<67x67xf32>
    %cst_29 = arith.constant dense<0xFF800000> : vector<67xf32>
    %70 = vector.multi_reduction <maximumf>, %69, %cst_29 [1] : vector<67x67xf32> to vector<67xf32>
    %71 = vector.shape_cast %70 : vector<67xf32> to vector<67x1xf32>
    %72 = vector.broadcast %71 : vector<67x1xf32> to vector<67x67xf32>
    %73 = arith.subf %69, %72 : vector<67x67xf32>
    %74 = math.exp %73 : vector<67x67xf32>
    %cst_30 = arith.constant dense<0.000000e+00> : vector<67xf32>
    %75 = vector.multi_reduction <add>, %74, %cst_30 [1] : vector<67x67xf32> to vector<67xf32>
    %76 = vector.shape_cast %75 : vector<67xf32> to vector<67x1xf32>
    %77 = tpu.reciprocal %76 {approx = true} : vector<67x1xf32> -> vector<67x1xf32>
    %78 = vector.broadcast %77 : vector<67x1xf32> to vector<67x67xf32>
    %79 = arith.mulf %74, %78 : vector<67x67xf32>
    %80 = arith.truncf %79 : vector<67x67xf32> to vector<67x67xbf16>
    %cst_31 = arith.constant dense<0.000000e+00> : vector<67x16xf32>
    %81 = tpu.matmul %80, %66, %cst_31 {dimension_numbers = #tpu.dot_dimension_numbers<[1], [0], [0], [1], [0, 0, 1, 1], [], []>} : vector<67x67xbf16>, vector<67x16xbf16>, vector<67x16xf32> -> vector<67x16xf32>
    %c0_32 = arith.constant 0 : index
    %c16 = arith.constant 16 : index
    %82 = vector.load %arg16[%c0_32, %c16] : memref<67x32xf32, #tpu.memory_space<vmem>>, vector<67x16xf32>
    tpu.vector_store %arg16[%c0_32, %c16], %81 {strides = array<i32>} : memref<67x32xf32, #tpu.memory_space<vmem>>, vector<67x16xf32>,
    %c0_33 = arith.constant 0 : index
    %c0_34 = arith.constant 0 : index
    %83 = vector.load %arg16[%c0_33, %c0_34] : memref<67x32xf32, #tpu.memory_space<vmem>>, vector<67x32xf32>
    %84 = arith.truncf %83 : vector<67x32xf32> to vector<67x32xbf16>
    %c0_35 = arith.constant 0 : index
    %c0_36 = arith.constant 0 : index
    %c0_37 = arith.constant 0 : index
    %85 = vector.load %arg7[%c0_35, %c0_36, %c0_37] : memref<1x32x32xbf16, #tpu.memory_space<vmem>>, vector<1x32x32xbf16>
    %86 = vector.shape_cast %85 : vector<1x32x32xbf16> to vector<32x32xbf16>
    %cst_38 = arith.constant dense<0.000000e+00> : vector<67x32xf32>
    %87 = tpu.matmul %84, %86, %cst_38 {dimension_numbers = #tpu.dot_dimension_numbers<[1], [0], [0], [1], [0, 0, 1, 1], [], []>} : vector<67x32xbf16>, vector<32x32xbf16>, vector<67x32xf32> -> vector<67x32xf32>
    %c0_39 = arith.constant 0 : index
    %c0_40 = arith.constant 0 : index
    %c0_41 = arith.constant 0 : index
    %88 = vector.load %arg8[%c0_39, %c0_40, %c0_41] : memref<1x1x32xf32, #tpu.memory_space<vmem>>, vector<1x1x32xf32>
    %89 = vector.shape_cast %88 : vector<1x1x32xf32> to vector<1x32xf32>
    %90 = vector.broadcast %89 : vector<1x32xf32> to vector<67x32xf32>
    %91 = arith.addf %87, %90 : vector<67x32xf32>
    %92 = arith.addf %4, %91 : vector<67x32xf32>
    %c0_42 = arith.constant 0 : index
    %c0_43 = arith.constant 0 : index
    %c0_44 = arith.constant 0 : index
    %93 = vector.load %arg9[%c0_42, %c0_43, %c0_44] : memref<1x1x32xf32, #tpu.memory_space<vmem>>, vector<1x1x32xf32>
    %94 = vector.shape_cast %93 : vector<1x1x32xf32> to vector<1x32xf32>
    %c0_45 = arith.constant 0 : index
    %c0_46 = arith.constant 0 : index
    %c0_47 = arith.constant 0 : index
    %95 = vector.load %arg10[%c0_45, %c0_46, %c0_47] : memref<1x1x32xf32, #tpu.memory_space<vmem>>, vector<1x1x32xf32>
    %96 = vector.shape_cast %95 : vector<1x1x32xf32> to vector<1x32xf32>
    %cst_48 = arith.constant dense<0.000000e+00> : vector<67xf32>
    %97 = vector.multi_reduction <add>, %92, %cst_48 [1] : vector<67x32xf32> to vector<67xf32>
    %98 = vector.shape_cast %97 : vector<67xf32> to vector<67x1xf32>
    %cst_49 = arith.constant 3.200000e+01 : f32
    %99 = vector.broadcast %cst_49 : f32 to vector<67x1xf32>
    %100 = arith.divf %98, %99 : vector<67x1xf32>
    %101 = vector.broadcast %100 : vector<67x1xf32> to vector<67x32xf32>
    %102 = arith.subf %92, %101 : vector<67x32xf32>
    %103 = arith.mulf %102, %102 : vector<67x32xf32>
    %cst_50 = arith.constant dense<0.000000e+00> : vector<67xf32>
    %104 = vector.multi_reduction <add>, %103, %cst_50 [1] : vector<67x32xf32> to vector<67xf32>
    %105 = vector.shape_cast %104 : vector<67xf32> to vector<67x1xf32>
    %cst_51 = arith.constant 3.200000e+01 : f32
    %106 = vector.broadcast %cst_51 : f32 to vector<67x1xf32>
    %107 = arith.divf %105, %106 : vector<67x1xf32>
    %108 = vector.broadcast %100 : vector<67x1xf32> to vector<67x32xf32>
    %109 = arith.subf %92, %108 : vector<67x32xf32>
    %cst_52 = arith.constant 9.99999997E-7 : f32
    %110 = vector.broadcast %cst_52 : f32 to vector<67x1xf32>
    %111 = arith.addf %107, %110 : vector<67x1xf32>
    %112 = math.rsqrt %111 : vector<67x1xf32>
    %113 = vector.broadcast %112 : vector<67x1xf32> to vector<67x32xf32>
    %114 = arith.mulf %109, %113 : vector<67x32xf32>
    %115 = vector.broadcast %94 : vector<1x32xf32> to vector<67x32xf32>
    %116 = arith.mulf %114, %115 : vector<67x32xf32>
    %117 = vector.broadcast %96 : vector<1x32xf32> to vector<67x32xf32>
    %118 = arith.addf %116, %117 : vector<67x32xf32>
    %119 = arith.truncf %118 : vector<67x32xf32> to vector<67x32xbf16>
    %c0_53 = arith.constant 0 : index
    %c0_54 = arith.constant 0 : index
    %c0_55 = arith.constant 0 : index
    %120 = vector.load %arg11[%c0_53, %c0_54, %c0_55] : memref<1x32x128xbf16, #tpu.memory_space<vmem>>, vector<1x32x128xbf16>
    %121 = vector.shape_cast %120 : vector<1x32x128xbf16> to vector<32x128xbf16>
    %cst_56 = arith.constant dense<0.000000e+00> : vector<67x128xf32>
    %122 = tpu.matmul %119, %121, %cst_56 {dimension_numbers = #tpu.dot_dimension_numbers<[1], [0], [0], [1], [0, 0, 1, 1], [], []>} : vector<67x32xbf16>, vector<32x128xbf16>, vector<67x128xf32> -> vector<67x128xf32>
    %c0_57 = arith.constant 0 : index
    %c0_58 = arith.constant 0 : index
    %c0_59 = arith.constant 0 : index
    %123 = vector.load %arg12[%c0_57, %c0_58, %c0_59] : memref<1x1x128xf32, #tpu.memory_space<vmem>>, vector<1x1x128xf32>
    %124 = vector.shape_cast %123 : vector<1x1x128xf32> to vector<1x128xf32>
    %125 = vector.broadcast %124 : vector<1x128xf32> to vector<67x128xf32>
    %126 = arith.addf %122, %125 : vector<67x128xf32>
    %cst_60 = arith.constant 5.000000e-01 : f32
    %127 = vector.broadcast %cst_60 : f32 to vector<67x128xf32>
    %128 = arith.mulf %127, %126 : vector<67x128xf32>
    %cst_61 = arith.constant 4.471500e-02 : f32
    %129 = vector.broadcast %cst_61 : f32 to vector<67x128xf32>
    %130 = arith.mulf %129, %126 : vector<67x128xf32>
    %131 = arith.mulf %130, %126 : vector<67x128xf32>
    %132 = arith.mulf %131, %126 : vector<67x128xf32>
    %133 = arith.addf %126, %132 : vector<67x128xf32>
    %cst_62 = arith.constant 0.797884583 : f32
    %134 = vector.broadcast %cst_62 : f32 to vector<67x128xf32>
    %135 = arith.mulf %134, %133 : vector<67x128xf32>
    %136 = math.tanh %135 : vector<67x128xf32>
    %cst_63 = arith.constant 1.000000e+00 : f32
    %137 = vector.broadcast %cst_63 : f32 to vector<67x128xf32>
    %138 = arith.addf %137, %136 : vector<67x128xf32>
    %139 = arith.mulf %128, %138 : vector<67x128xf32>
    %140 = arith.truncf %139 : vector<67x128xf32> to vector<67x128xbf16>
    %c0_64 = arith.constant 0 : index
    %c0_65 = arith.constant 0 : index
    %c0_66 = arith.constant 0 : index
    %141 = vector.load %arg13[%c0_64, %c0_65, %c0_66] : memref<1x128x32xbf16, #tpu.memory_space<vmem>>, vector<1x128x32xbf16>
    %142 = vector.shape_cast %141 : vector<1x128x32xbf16> to vector<128x32xbf16>
    %cst_67 = arith.constant dense<0.000000e+00> : vector<67x32xf32>
    %143 = tpu.matmul %140, %142, %cst_67 {dimension_numbers = #tpu.dot_dimension_numbers<[1], [0], [0], [1], [0, 0, 1, 1], [], []>} : vector<67x128xbf16>, vector<128x32xbf16>, vector<67x32xf32> -> vector<67x32xf32>
    %c0_68 = arith.constant 0 : index
    %c0_69 = arith.constant 0 : index
    %c0_70 = arith.constant 0 : index
    %144 = vector.load %arg14[%c0_68, %c0_69, %c0_70] : memref<1x1x32xf32, #tpu.memory_space<vmem>>, vector<1x1x32xf32>
    %145 = vector.shape_cast %144 : vector<1x1x32xf32> to vector<1x32xf32>
    %146 = vector.broadcast %145 : vector<1x32xf32> to vector<67x32xf32>
    %147 = arith.addf %143, %146 : vector<67x32xf32>
    %148 = arith.addf %92, %147 : vector<67x32xf32>
    %c0_71 = arith.constant 0 : index
    %c0_72 = arith.constant 0 : index
    %c0_73 = arith.constant 0 : index
    %149 = vector.load %arg15[%c0_71, %c0_72, %c0_73] : memref<1x67x32xf32, #tpu.memory_space<vmem>>, vector<1x67x32xf32>
    %150 = vector.shape_cast %149 : vector<1x67x32xf32> to vector<67x32xf32>
    %151 = vector.shape_cast %148 : vector<67x32xf32> to vector<1x67x32xf32>
    tpu.vector_store %arg15[%c0_71, %c0_72, %c0_73], %151 {strides = array<i32>} : memref<1x67x32xf32, #tpu.memory_space<vmem>>, vector<1x67x32xf32>,
    return
  }
  func.func @transform_0(%arg0: i32, %arg1: i32) -> (i32, i32, i32) {
    %c0_i32 = arith.constant 0 : i32
    %c0_i32_0 = arith.constant 0 : i32
    %c0_i32_1 = arith.constant 0 : i32
    return %arg0, %c0_i32, %c0_i32_0 : i32, i32, i32
  }
  func.func @transform_1(%arg0: i32, %arg1: i32) -> (i32, i32, i32) {
    %c0_i32 = arith.constant 0 : i32
    %c0_i32_0 = arith.constant 0 : i32
    %c0_i32_1 = arith.constant 0 : i32
    return %arg1, %c0_i32, %c0_i32_0 : i32, i32, i32
  }
  func.func @transform_2(%arg0: i32, %arg1: i32) -> (i32, i32, i32) {
    %c0_i32 = arith.constant 0 : i32
    %c0_i32_0 = arith.constant 0 : i32
    %c0_i32_1 = arith.constant 0 : i32
    return %arg1, %c0_i32, %c0_i32_0 : i32, i32, i32
  }
  func.func @transform_3(%arg0: i32, %arg1: i32) -> (i32, i32, i32) {
    %c0_i32 = arith.constant 0 : i32
    %c0_i32_0 = arith.constant 0 : i32
    %c0_i32_1 = arith.constant 0 : i32
    return %arg1, %c0_i32, %c0_i32_0 : i32, i32, i32
  }
  func.func @transform_4(%arg0: i32, %arg1: i32) -> (i32, i32, i32) {
    %c0_i32 = arith.constant 0 : i32
    %c0_i32_0 = arith.constant 0 : i32
    %c0_i32_1 = arith.constant 0 : i32
    return %arg1, %c0_i32, %c0_i32_0 : i32, i32, i32
  }
  func.func @transform_5(%arg0: i32, %arg1: i32) -> (i32, i32, i32) {
    %c0_i32 = arith.constant 0 : i32
    %c0_i32_0 = arith.constant 0 : i32
    %c0_i32_1 = arith.constant 0 : i32
    return %arg1, %c0_i32, %c0_i32_0 : i32, i32, i32
  }
  func.func @transform_6(%arg0: i32, %arg1: i32) -> (i32, i32, i32) {
    %c0_i32 = arith.constant 0 : i32
    %c0_i32_0 = arith.constant 0 : i32
    %c0_i32_1 = arith.constant 0 : i32
    return %arg1, %c0_i32, %c0_i32_0 : i32, i32, i32
  }
  func.func @transform_7(%arg0: i32, %arg1: i32) -> (i32, i32, i32) {
    %c0_i32 = arith.constant 0 : i32
    %c0_i32_0 = arith.constant 0 : i32
    %c0_i32_1 = arith.constant 0 : i32
    return %arg1, %c0_i32, %c0_i32_0 : i32, i32, i32
  }
  func.func @transform_8(%arg0: i32, %arg1: i32) -> (i32, i32, i32) {
    %c0_i32 = arith.constant 0 : i32
    %c0_i32_0 = arith.constant 0 : i32
    %c0_i32_1 = arith.constant 0 : i32
    return %arg1, %c0_i32, %c0_i32_0 : i32, i32, i32
  }
  func.func @transform_9(%arg0: i32, %arg1: i32) -> (i32, i32, i32) {
    %c0_i32 = arith.constant 0 : i32
    %c0_i32_0 = arith.constant 0 : i32
    %c0_i32_1 = arith.constant 0 : i32
    return %arg1, %c0_i32, %c0_i32_0 : i32, i32, i32
  }
  func.func @transform_10(%arg0: i32, %arg1: i32) -> (i32, i32, i32) {
    %c0_i32 = arith.constant 0 : i32
    %c0_i32_0 = arith.constant 0 : i32
    %c0_i32_1 = arith.constant 0 : i32
    return %arg1, %c0_i32, %c0_i32_0 : i32, i32, i32
  }
  func.func @transform_11(%arg0: i32, %arg1: i32) -> (i32, i32, i32) {
    %c0_i32 = arith.constant 0 : i32
    %c0_i32_0 = arith.constant 0 : i32
    %c0_i32_1 = arith.constant 0 : i32
    return %arg1, %c0_i32, %c0_i32_0 : i32, i32, i32
  }
  func.func @transform_12(%arg0: i32, %arg1: i32) -> (i32, i32, i32) {
    %c0_i32 = arith.constant 0 : i32
    %c0_i32_0 = arith.constant 0 : i32
    %c0_i32_1 = arith.constant 0 : i32
    return %arg1, %c0_i32, %c0_i32_0 : i32, i32, i32
  }
  func.func @transform_13(%arg0: i32, %arg1: i32) -> (i32, i32, i32) {
    %c0_i32 = arith.constant 0 : i32
    %c0_i32_0 = arith.constant 0 : i32
    %c0_i32_1 = arith.constant 0 : i32
    return %arg0, %c0_i32, %c0_i32_0 : i32, i32, i32
  }
}

module attributes {stable_mosaic.version = 11 : i64} {
  func.func @_tail_kernel(%arg0: i32, %arg1: memref<2x50x32xf32, #tpu.memory_space<vmem>>, %arg2: memref<1x32xf32, #tpu.memory_space<vmem>>, %arg3: memref<1x32xf32, #tpu.memory_space<vmem>>, %arg4: memref<1x32xf32, #tpu.memory_space<vmem>>, %arg5: memref<1x32xf32, #tpu.memory_space<vmem>>, %arg6: memref<32x10xbf16, #tpu.memory_space<vmem>>, %arg7: memref<1x10xf32, #tpu.memory_space<vmem>>, %arg8: memref<2x10xf32, #tpu.memory_space<vmem>>) attributes {dimension_semantics = [#tpu.dimension_semantics<arbitrary>], iteration_bounds = array<i64: 1>, scalar_prefetch = 0 : i64, scratch_operands = 0 : i64, tpu.core_type = #tpu.core_type<tc>, window_params = [{pipeline_mode = #tpu.pipeline_mode<synchronous>, transform_indices = @transform_0, window_bounds = array<i64: 2, 50, 32>}, {pipeline_mode = #tpu.pipeline_mode<synchronous>, transform_indices = @transform_1, window_bounds = array<i64: 1, 32>}, {pipeline_mode = #tpu.pipeline_mode<synchronous>, transform_indices = @transform_2, window_bounds = array<i64: 1, 32>}, {pipeline_mode = #tpu.pipeline_mode<synchronous>, transform_indices = @transform_3, window_bounds = array<i64: 1, 32>}, {pipeline_mode = #tpu.pipeline_mode<synchronous>, transform_indices = @transform_4, window_bounds = array<i64: 1, 32>}, {pipeline_mode = #tpu.pipeline_mode<synchronous>, transform_indices = @transform_5, window_bounds = array<i64: 32, 10>}, {pipeline_mode = #tpu.pipeline_mode<synchronous>, transform_indices = @transform_6, window_bounds = array<i64: 1, 10>}, {pipeline_mode = #tpu.pipeline_mode<synchronous>, transform_indices = @transform_7, window_bounds = array<i64: 2, 10>}]} {
    %c0 = arith.constant 0 : index
    %c0_0 = arith.constant 0 : index
    %c0_1 = arith.constant 0 : index
    %0 = vector.load %arg1[%c0, %c0_0, %c0_1] : memref<2x50x32xf32, #tpu.memory_space<vmem>>, vector<2x50x32xf32>
    %c0_2 = arith.constant 0 : index
    %c0_3 = arith.constant 0 : index
    %1 = vector.load %arg2[%c0_2, %c0_3] : memref<1x32xf32, #tpu.memory_space<vmem>>, vector<1x32xf32>
    %c0_4 = arith.constant 0 : index
    %c0_5 = arith.constant 0 : index
    %2 = vector.load %arg3[%c0_4, %c0_5] : memref<1x32xf32, #tpu.memory_space<vmem>>, vector<1x32xf32>
    %cst = arith.constant dense<0.000000e+00> : vector<2x50xf32>
    %3 = vector.multi_reduction <add>, %0, %cst [2] : vector<2x50x32xf32> to vector<2x50xf32>
    %4 = vector.shape_cast %3 : vector<2x50xf32> to vector<2x50x1xf32>
    %cst_6 = arith.constant 3.200000e+01 : f32
    %5 = vector.broadcast %cst_6 : f32 to vector<2x50x1xf32>
    %6 = arith.divf %4, %5 : vector<2x50x1xf32>
    %7 = vector.broadcast %6 : vector<2x50x1xf32> to vector<2x50x32xf32>
    %8 = arith.subf %0, %7 : vector<2x50x32xf32>
    %9 = arith.mulf %8, %8 : vector<2x50x32xf32>
    %cst_7 = arith.constant dense<0.000000e+00> : vector<2x50xf32>
    %10 = vector.multi_reduction <add>, %9, %cst_7 [2] : vector<2x50x32xf32> to vector<2x50xf32>
    %11 = vector.shape_cast %10 : vector<2x50xf32> to vector<2x50x1xf32>
    %cst_8 = arith.constant 3.200000e+01 : f32
    %12 = vector.broadcast %cst_8 : f32 to vector<2x50x1xf32>
    %13 = arith.divf %11, %12 : vector<2x50x1xf32>
    %14 = vector.broadcast %6 : vector<2x50x1xf32> to vector<2x50x32xf32>
    %15 = arith.subf %0, %14 : vector<2x50x32xf32>
    %cst_9 = arith.constant 9.99999997E-7 : f32
    %16 = vector.broadcast %cst_9 : f32 to vector<2x50x1xf32>
    %17 = arith.addf %13, %16 : vector<2x50x1xf32>
    %18 = math.rsqrt %17 : vector<2x50x1xf32>
    %19 = vector.broadcast %18 : vector<2x50x1xf32> to vector<2x50x32xf32>
    %20 = arith.mulf %15, %19 : vector<2x50x32xf32>
    %21 = vector.shape_cast %1 : vector<1x32xf32> to vector<1x1x32xf32>
    %22 = vector.broadcast %21 : vector<1x1x32xf32> to vector<2x50x32xf32>
    %23 = arith.mulf %20, %22 : vector<2x50x32xf32>
    %24 = vector.shape_cast %2 : vector<1x32xf32> to vector<1x1x32xf32>
    %25 = vector.broadcast %24 : vector<1x1x32xf32> to vector<2x50x32xf32>
    %26 = arith.addf %23, %25 : vector<2x50x32xf32>
    %cst_10 = arith.constant dense<0.000000e+00> : vector<2x32xf32>
    %27 = vector.multi_reduction <add>, %26, %cst_10 [1] : vector<2x50x32xf32> to vector<2x32xf32>
    %cst_11 = arith.constant 5.000000e+01 : f32
    %28 = vector.broadcast %cst_11 : f32 to vector<2x32xf32>
    %29 = arith.divf %27, %28 : vector<2x32xf32>
    %c0_12 = arith.constant 0 : index
    %c0_13 = arith.constant 0 : index
    %30 = vector.load %arg4[%c0_12, %c0_13] : memref<1x32xf32, #tpu.memory_space<vmem>>, vector<1x32xf32>
    %c0_14 = arith.constant 0 : index
    %c0_15 = arith.constant 0 : index
    %31 = vector.load %arg5[%c0_14, %c0_15] : memref<1x32xf32, #tpu.memory_space<vmem>>, vector<1x32xf32>
    %cst_16 = arith.constant dense<0.000000e+00> : vector<2xf32>
    %32 = vector.multi_reduction <add>, %29, %cst_16 [1] : vector<2x32xf32> to vector<2xf32>
    %33 = vector.shape_cast %32 : vector<2xf32> to vector<2x1xf32>
    %cst_17 = arith.constant 3.200000e+01 : f32
    %34 = vector.broadcast %cst_17 : f32 to vector<2x1xf32>
    %35 = arith.divf %33, %34 : vector<2x1xf32>
    %36 = vector.broadcast %35 : vector<2x1xf32> to vector<2x32xf32>
    %37 = arith.subf %29, %36 : vector<2x32xf32>
    %38 = arith.mulf %37, %37 : vector<2x32xf32>
    %cst_18 = arith.constant dense<0.000000e+00> : vector<2xf32>
    %39 = vector.multi_reduction <add>, %38, %cst_18 [1] : vector<2x32xf32> to vector<2xf32>
    %40 = vector.shape_cast %39 : vector<2xf32> to vector<2x1xf32>
    %cst_19 = arith.constant 3.200000e+01 : f32
    %41 = vector.broadcast %cst_19 : f32 to vector<2x1xf32>
    %42 = arith.divf %40, %41 : vector<2x1xf32>
    %43 = vector.broadcast %35 : vector<2x1xf32> to vector<2x32xf32>
    %44 = arith.subf %29, %43 : vector<2x32xf32>
    %cst_20 = arith.constant 9.99999997E-7 : f32
    %45 = vector.broadcast %cst_20 : f32 to vector<2x1xf32>
    %46 = arith.addf %42, %45 : vector<2x1xf32>
    %47 = math.rsqrt %46 : vector<2x1xf32>
    %48 = vector.broadcast %47 : vector<2x1xf32> to vector<2x32xf32>
    %49 = arith.mulf %44, %48 : vector<2x32xf32>
    %50 = vector.broadcast %30 : vector<1x32xf32> to vector<2x32xf32>
    %51 = arith.mulf %49, %50 : vector<2x32xf32>
    %52 = vector.broadcast %31 : vector<1x32xf32> to vector<2x32xf32>
    %53 = arith.addf %51, %52 : vector<2x32xf32>
    %54 = arith.truncf %53 : vector<2x32xf32> to vector<2x32xbf16>
    %c0_21 = arith.constant 0 : index
    %c0_22 = arith.constant 0 : index
    %55 = vector.load %arg6[%c0_21, %c0_22] : memref<32x10xbf16, #tpu.memory_space<vmem>>, vector<32x10xbf16>
    %cst_23 = arith.constant dense<0.000000e+00> : vector<2x10xf32>
    %56 = tpu.matmul %54, %55, %cst_23 {dimension_numbers = #tpu.dot_dimension_numbers<[1], [0], [0], [1], [0, 0, 1, 1], [], []>} : vector<2x32xbf16>, vector<32x10xbf16>, vector<2x10xf32> -> vector<2x10xf32>
    %c0_24 = arith.constant 0 : index
    %c0_25 = arith.constant 0 : index
    %57 = vector.load %arg7[%c0_24, %c0_25] : memref<1x10xf32, #tpu.memory_space<vmem>>, vector<1x10xf32>
    %58 = vector.broadcast %57 : vector<1x10xf32> to vector<2x10xf32>
    %59 = arith.addf %56, %58 : vector<2x10xf32>
    %c0_26 = arith.constant 0 : index
    %c0_27 = arith.constant 0 : index
    %60 = vector.load %arg8[%c0_26, %c0_27] : memref<2x10xf32, #tpu.memory_space<vmem>>, vector<2x10xf32>
    tpu.vector_store %arg8[%c0_26, %c0_27], %59 {strides = array<i32>} : memref<2x10xf32, #tpu.memory_space<vmem>>, vector<2x10xf32>,
    return
  }
  func.func @transform_0(%arg0: i32) -> (i32, i32, i32) {
    %c0_i32 = arith.constant 0 : i32
    %c0_i32_0 = arith.constant 0 : i32
    %c0_i32_1 = arith.constant 0 : i32
    %c0_i32_2 = arith.constant 0 : i32
    return %c0_i32, %c0_i32_0, %c0_i32_1 : i32, i32, i32
  }
  func.func @transform_1(%arg0: i32) -> (i32, i32) {
    %c0_i32 = arith.constant 0 : i32
    %c0_i32_0 = arith.constant 0 : i32
    %c0_i32_1 = arith.constant 0 : i32
    return %c0_i32, %c0_i32_0 : i32, i32
  }
  func.func @transform_2(%arg0: i32) -> (i32, i32) {
    %c0_i32 = arith.constant 0 : i32
    %c0_i32_0 = arith.constant 0 : i32
    %c0_i32_1 = arith.constant 0 : i32
    return %c0_i32, %c0_i32_0 : i32, i32
  }
  func.func @transform_3(%arg0: i32) -> (i32, i32) {
    %c0_i32 = arith.constant 0 : i32
    %c0_i32_0 = arith.constant 0 : i32
    %c0_i32_1 = arith.constant 0 : i32
    return %c0_i32, %c0_i32_0 : i32, i32
  }
  func.func @transform_4(%arg0: i32) -> (i32, i32) {
    %c0_i32 = arith.constant 0 : i32
    %c0_i32_0 = arith.constant 0 : i32
    %c0_i32_1 = arith.constant 0 : i32
    return %c0_i32, %c0_i32_0 : i32, i32
  }
  func.func @transform_5(%arg0: i32) -> (i32, i32) {
    %c0_i32 = arith.constant 0 : i32
    %c0_i32_0 = arith.constant 0 : i32
    %c0_i32_1 = arith.constant 0 : i32
    return %c0_i32, %c0_i32_0 : i32, i32
  }
  func.func @transform_6(%arg0: i32) -> (i32, i32) {
    %c0_i32 = arith.constant 0 : i32
    %c0_i32_0 = arith.constant 0 : i32
    %c0_i32_1 = arith.constant 0 : i32
    return %c0_i32, %c0_i32_0 : i32, i32
  }
  func.func @transform_7(%arg0: i32) -> (i32, i32) {
    %c0_i32 = arith.constant 0 : i32
    %c0_i32_0 = arith.constant 0 : i32
    %c0_i32_1 = arith.constant 0 : i32
    return %c0_i32, %c0_i32_0 : i32, i32
  }
}

</mosaic_0001>

<bundles_post_ra>
// kernel: _lambda_.5
= control target key start
LH: loop header
LB: loop body
LE: loop exit
PB: predicated region body
PF: predicated region fallthrough
CT: control target
= control target key end

     0   :  { %vm57_vm0 = vcmask 392192   ;;  %vm83_vm1 = vcmask 261120   ;;  %s173_s1 = inlined_call_operand.vmem [shape: bf16[48,32], index: 1, kind: input, shape index: {}]   ;;  %s174_s2 = inlined_call_operand.vmem [shape: f32[1,32], index: 2, kind: input, shape index: {}]   ;;  %s175_s0 = inlined_call_operand.vmem [shape: bf16[32,48], index: 0, kind: input, shape index: {}]   ;;  %s176_s3 = inlined_call_operand.vmem [shape: f32[32,32], index: 3, kind: output, shape index: {}]  }
   0x1   :  { %v118_v0 = vld [vmem:[%s173_s1 + $0x10] sm:$0xff]  ;;  %v117_v1 = vld [vmem:[%s173_s1 + $0x8] sm:$0xff]  ;;  %v116_v2 = vld [vmem:[%s173_s1] sm:$0xff] }
   0x2   :  { %69 = vmatpush.bf16.msra.mxu0 %v118_v0  ;;  %119 = vmatpush.bf16.msra.mxu1 %v118_v0  ;;  %v114_v3 = vld [vmem:[%s175_s0] sm:$0xff]  ;;  %v115_v4 = vld [vmem:[%s175_s0 + $0x8] sm:$0xff] }
   0x3   :  { %v122_v5 = vld [vmem:[%s174_s2] ss:$0 sm:$0xff] }
   0x6   :  { %70 = vmatpush.bf16.msra.mxu0 %v117_v1  ;;  %120 = vmatpush.bf16.msra.mxu1 %v117_v1 }
   0xa   :  { %71 = vmatpush.bf16.msra.mxu0 %v116_v2  ;;  %121 = vmatpush.bf16.msra.mxu1 %v116_v2 }
   0xd   :  { %112 = vmatmul.msk.bf16.vlgmr.msra.gmra.mxu0 %vm57_vm0, %v114_v3  ;;  %113 = vmatmul.msk.bf16.vlgmr.msra.gmra.mxu1 %vm57_vm0, %v115_v4 }
  0x8a   :  { %v73_v6 = vpop.f32.mrf.mxu0  ;;  %v78_v7 = vpop.f32.mrf.mxu1 }
  0x8b   :  { %v74_v8 = vadd.f32 %v122_v5, %v73_v6  ;;  %v79_v9 = vadd.f32 %v122_v5, %v78_v7 }
  0x8d   :  { %84 = vst.msk [vmem:[%s176_s3] sm:$0xff] %vm83_vm1, %v74_v8 }
  0x8e   :  { %86 = vst.msk [vmem:[%s176_s3 + $0x10] sm:$0xff] %vm83_vm1, %v79_v9 }
  0x92   :  { %v75_v10 = vpop.f32.mrf.mxu0  ;;  %v80_v11 = vpop.f32.mrf.mxu1 }
  0x93   :  { %v76_v12 = vadd.f32 %v122_v5, %v75_v10  ;;  %v81_v13 = vadd.f32 %v122_v5, %v80_v11 }
  0x95   :  { %85 = vst.msk [vmem:[%s176_s3 + $0x8] sm:$0xff] %vm83_vm1, %v76_v12 }
  0x96   :  { %87 = vst.msk [vmem:[%s176_s3 + $0x18] sm:$0xff] %vm83_vm1, %v81_v13 }

// kernel: _lambda_.7
= control target key start
LH: loop header
LB: loop body
LE: loop exit
PB: predicated region body
PF: predicated region fallthrough
CT: control target
= control target key end

     0   :  { %vm24_vm0 = vcmask 254976   ;;  %v143_v2 = vmov 32.0   ;;  %vm66_vm2 = vcmask 261120   ;;  %vm125_vm12 = vcmask 74752   ;;  %s200_s0 = inlined_call_operand.vmem [shape: f32[2,32], index: 0, kind: input, shape index: {}]   ;;  %s201_s1 = inlined_call_operand.vmem [shape: f32[1,32], index: 1, kind: input, shape index: {}]   ;;  %s202_s2 = inlined_call_operand.vmem [shape: f32[1,32], index: 2, kind: input, shape index: {}]   ;;  %s203_s3 = inlined_call_operand.vmem [shape: f32[10,32], index: 3, kind: input, shape index: {}]   ;;  %s204_s4 = inlined_call_operand.vmem [shape: f32[1,10], index: 4, kind: input, shape index: {}]   ;;  %s205_s5 = inlined_call_operand.vmem [shape: f32[2,10], index: 5, kind: output, shape index: {}]  }
   0x1   :  { %v21_v0 = vld [vmem:[%s200_s0] sm:$0x3]  ;;  %135 = vrcp.f32 %v143_v2  ;;  %v64_v15 = vld [vmem:[%s203_s3 + $0x8] sm:$0x3] }
   0x2   :  { %v25_v1 = vsel %vm24_vm0, %v21_v0, 0.0  ;;  %v63_v14 = vld [vmem:[%s203_s3] sm:$0xff] }
   0x3   :  { %26 = vadd.xlane.f32.xlu0 %v25_v1  ;;  %v65_v16 = vpack.c.bf16 %v64_v15, %v63_v14  ;;  %v133_v27 = vld [vmem:[%s201_s1] ss:$0 sm:$0xff] }
   0x4   :  { %v134_v30 = vld [vmem:[%s202_s2] ss:$0 sm:$0xff] }
   0x5   :  { %v71_v17 = vsel %vm66_vm2, %v65_v16, 0  ;;  %v103_v42 = vld [vmem:[%s204_s4] sm:$0x1] }
   0x6   :  { %80 = vmatpush.bf16.xpose.msra.mxu0 %v71_v17  ;;  %v104_v44 = vmax.f32 %v103_v42, 1e-08 }
   0x7   :  { %v136_v3 = vpop.eup %135 }
   0x8   :  { %v29_v4 = vmul.f32 32.0, %v136_v3  ;;  %vm33_vm1 = vweird.f32 %v136_v3  ;;  %v106_v49 = vperm.slane %v104_v44, 0 }
   0xa   :  { %v30_v5 = vsub.f32 1.0, %v29_v4 }
   0xc   :  { %v31_v6 = vmul.f32 %v136_v3, %v30_v5 }
   0xe   :  { %v32_v7 = vadd.f32 %v136_v3, %v31_v6 }
  0x10   :  { %v34_v8 = vsel %vm33_vm1, %v136_v3, %v32_v7 }
  0x76   :  { %v27_v9 = vpop.xlane.xlu0 %26 }
  0x77   :  { %v35_v10 = vmul.f32 %v34_v8, %v27_v9 }
  0x79   :  { %v36_v11 = vsub.f32 %v21_v0, %v35_v10 }
  0x7b   :  { %v37_v12 = vmul.f32 %v36_v11, %v36_v11 }
  0x7d   :  { %v38_v13 = vsel %vm24_vm0, %v37_v12, 0.0 }
  0x7e   :  { %39 = vadd.xlane.f32.xlu0 %v38_v13 }
  0xf1   :  { %v40_v18 = vpop.xlane.xlu0 %39 }
  0xf2   :  { %v41_v19 = vmul.f32 %v40_v18, %v34_v8 }
  0xf4   :  { %v42_v20 = vadd.f32 1e-06, %v41_v19 }
  0xf6   :  { %137 = vrsqrt.f32 %v42_v20  ;;  %vm49_vm4 = vweird.f32 %v42_v20 }
  0xfc   :  { %v138_v21 = vpop.eup %137 }
  0xfd   :  { %v44_v22 = vmul.f32 %v138_v21, %v42_v20  ;;  %vm50_vm3 = vweird.f32 %v138_v21 }
  0xfe   :  { %vm51_vm5 = vmor %vm49_vm4, %vm50_vm3 }
  0xff   :  { %v45_v23 = vmul.f32 %v138_v21, %v44_v22 }
 0x101   :  { %v46_v24 = vmul.f32 0.5, %v45_v23 }
 0x103   :  { %v47_v25 = vsub.f32 1.5, %v46_v24 }
 0x105   :  { %v48_v26 = vmul.f32 %v138_v21, %v47_v25 }
 0x107   :  { %v52_v28 = vsel %vm51_vm5, %v138_v21, %v48_v26 }
 0x108   :  { %v53_v29 = vmul.f32 %v52_v28, %v36_v11 }
 0x10a   :  { %v57_v31 = vmul.f32 %v133_v27, %v53_v29 }
 0x10c   :  { %v61_v32 = vadd.f32 %v134_v30, %v57_v31 }
 0x10e   :  { %v62_v33 = vpack.c.bf16 %v61_v32, %v61_v32  ;;  %v86_v34 = vmul.f32 %v61_v32, %v61_v32 }
 0x110   :  { %131 = vmatmul.msk.bf16.vlgmr.msra.gmra.mxu0 %vm66_vm2, %v62_v33  ;;  %v87_v35 = vsel %vm24_vm0, %v86_v34, 0.0 }
 0x111   :  { %88 = vadd.xlane.f32.xlu1 %v87_v35 }
 0x184   :  { %v89_v36 = vpop.xlane.xlu1 %88 }
 0x185   :  { %139 = vrsqrt.f32 %v89_v36  ;;  %vm97_vm6 = vcmp.eq.f32.partialorder %v89_v36, inf  ;;  %v100_v48 = vand.u32 2147483648, %v89_v36  ;;  %vm99_vm7 = vcmp.eq.f32.partialorder %v89_v36, 0.0 }
 0x18b   :  { %v140_v37 = vpop.eup %139 }
 0x18c   :  { %v91_v38 = vmul.f32 %v140_v37, %v89_v36 }
 0x18d   :  { %v82_v39 = vpop.f32.mrf.mxu0 }
 0x18e   :  { %v92_v40 = vmul.f32 %v140_v37, %v91_v38 }
 0x190   :  { %v93_v41 = vmul.f32 0.5, %v92_v40 }
 0x192   :  { %v94_v43 = vsub.f32 1.5, %v93_v41 }
 0x194   :  { %v95_v45 = vmul.f32 %v140_v37, %v94_v43 }
 0x195   :  { %v84_v46 = vpop.f32.mrf.mxu0 }
 0x196   :  { %v96_v47 = vmul.f32 %v95_v45, %v89_v36 }
 0x198   :  { %v98_v50 = vsel %vm97_vm6, %v89_v36, %v96_v47 }
 0x199   :  { %v101_v51 = vsel %vm99_vm7, %v100_v48, %v98_v50 }
 0x19a   :  { %v102_v52 = vmax.f32 %v101_v51, 1e-08 }
 0x19c   :  { %v108_v53 = vmul.f32 %v106_v49, %v102_v52 }
 0x19e   :  { %141 = vrcp.f32 %v108_v53  ;;  %v120_v57 = vand.u32 2147483648, %v108_v53  ;;  %v118_v59 = vand.u32 2147483647, %v108_v53  ;;  %vm114_vm9 = vweird.f32 %v108_v53 }
 0x1a0   :  { %v121_v61 = vor.u32 1.1754944e-38, %v120_v57  ;;  %vm119_vm11 = vcmp.eq.f32.partialorder %v118_v59, 8.507059e+37 }
 0x1a4   :  { %v142_v54 = vpop.eup %141 }
 0x1a5   :  { %v110_v55 = vmul.f32 %v142_v54, %v108_v53  ;;  %vm115_vm8 = vweird.f32 %v142_v54 }
 0x1a6   :  { %vm116_vm10 = vmor %vm114_vm9, %vm115_vm8 }
 0x1a7   :  { %v111_v56 = vsub.f32 1.0, %v110_v55 }
 0x1a9   :  { %v112_v58 = vmul.f32 %v142_v54, %v111_v56 }
 0x1ab   :  { %v113_v60 = vadd.f32 %v142_v54, %v112_v58 }
 0x1ad   :  { %v117_v62 = vsel %vm116_vm10, %v142_v54, %v113_v60 }
 0x1ae   :  { %v122_v63 = vsel %vm119_vm11, %v121_v61, %v117_v62 }
 0x1af   :  { %v123_v0 = vmul.f32 %v122_v63, %v82_v39 }
 0x1b1   :  { %v124_v1 = vsub.f32 1.0, %v123_v0 }
 0x1b3   :  { %126 = vst.msk [vmem:[%s205_s5] sm:$0x3] %vm125_vm12, %v124_v1 }

// kernel: _lambda_.6
= control target key start
LH: loop header
LB: loop body
LE: loop exit
PB: predicated region body
PF: predicated region fallthrough
CT: control target
= control target key end

     0   :  { %s1849_s25 = smov 0   ;;  %s1851_s26 = smov 0   ;;  %s2134_s0 = inlined_call_operand.vmem [shape: f32[2,17,32], index: 0, kind: input, shape index: {}]   ;;  %s2135_s1 = inlined_call_operand.vmem [shape: f32[2,1,32], index: 1, kind: input, shape index: {}]   ;;  %s2136_s2 = inlined_call_operand.vmem [shape: f32[2,1,32], index: 2, kind: input, shape index: {}]   ;;  %s2137_s3 = inlined_call_operand.vmem [shape: bf16[2,32,96], index: 3, kind: input, shape index: {}]   ;;  %s2138_s4 = inlined_call_operand.vmem [shape: f32[2,1,96], index: 4, kind: input, shape index: {}]   ;;  %s2139_s5 = inlined_call_operand.vmem [shape: bf16[2,32,32], index: 5, kind: input, shape index: {}]   ;;  %s2140_s6 = inlined_call_operand.vmem [shape: f32[2,1,32], index: 6, kind: input, shape index: {}]   ;;  %s2141_s7 = inlined_call_operand.vmem [shape: f32[2,1,32], index: 7, kind: input, shape index: {}]   ;;  %s2142_s8 = inlined_call_operand.vmem [shape: f32[2,1,32], index: 8, kind: input, shape index: {}]   ;;  %s2143_s9 = inlined_call_operand.vmem [shape: bf16[2,32,128], index: 9, kind: input, shape index: {}]   ;;  %s2144_s10 = inlined_call_operand.vmem [shape: f32[2,1,128], index: 10, kind: input, shape index: {}]   ;;  %s2145_s11 = inlined_call_operand.vmem [shape: bf16[2,128,32], index: 11, kind: input, shape index: {}]   ;;  %s2146_s12 = inlined_call_operand.vmem [shape: f32[2,1,32], index: 12, kind: input, shape index: {}]   ;;  %s2147_s13 = inlined_call_operand.vmem [shape: f32[2,17,32], index: 13, kind: output, shape index: {}]  }
   0x1   :  { %2152 = sst [smem:[#allocation9_spill]] %s2134_s0  ;;  %s1853_s27 = smov 0  }
   0x2   :  { %2153 = sst [smem:[#allocation10_spill]] %s2136_s2  ;;  %s1855_s28 = smov 0  }
   0x3   :  { %2154 = sst [smem:[#allocation11_spill]] %s2137_s3  ;;  %s1857_s29 = smov 0  }
   0x4   :  { %2155 = sst [smem:[#allocation12_spill]] %s2139_s5 }
   0x5   :  { %2156 = sst [smem:[#allocation13_spill]] %s2147_s13 }
   0x6 LB: > { %2157 = sst [smem:[#allocation3_spill]] %s1753_s25  ;;  %s32_s30 = sadd.s32 1, %s1761_s27  ;;  %s1769_s29 = sphi %s1857_s29, %s23_s29   ;;  %s1765_s28 = sphi %s1855_s28, %s2180_s28   ;;  %s1761_s27 = sphi %s1853_s27, %s2179_s27   ;;  %s1757_s26 = sphi %s1851_s26, %s2178_s26   ;;  %s1753_s25 = sphi %s1849_s25, %s2177_s25  }
   0x7   : > { %2158 = sst [smem:[#allocation4_spill]] %s1761_s27  ;;  %s35_s14 = sadd.s32 1, %s1765_s28 }
   0x8   : > { %2159 = sst [smem:[#allocation5_spill]] %s1765_s28  ;;  %p33_p0 = scmp.ge.s32.totalorder %s32_s30, 2 }
   0x9   : > { %2160 = sst [smem:[#allocation6_spill]] %s1769_s29  ;;  %p1528_p1 = scmp.ge.s32.totalorder %s1769_s29, 1 }
   0xa   : > { %p503_p2 = scmp.lt.s32.totalorder %s1769_s29, 5  ;;  %s2182_s30 = smov (%p33_p0, %s32_s30), 0 }
   0xb   : > { %2161 = sst [smem:[#allocation7_spill]] %s2182_s30  ;;  %s2184_s14 = smov (!%p33_p0, %s35_s14), %s1765_s28 }
   0xc   : > { %p504_p3 = pnand %p1528_p1, %p503_p2  ;;  %p37_p4 = scmp.ge.s32.totalorder %s2184_s14, 2 }
   0xd   : > { %p591_p5 = scmp.lt.s32.totalorder (!%p504_p3), %s1757_s26, 1  ;;  %p596_p6 = scmp.lt.s32.totalorder (!%p504_p3), %s1753_s25, 1 }
   0xe   : > { %s2186_s14 = smov (%p37_p4, %s2184_s14), 0  ;;  %507 = sbr.rel (%p504_p3) target bundleno = 2010 (0x7da), region = 72 }
   0xf   : > { %2162 = sst [smem:[#allocation8_spill]] %s2186_s14 }
  0x10   : > { %s2164_s0 = sld [smem:[#allocation9_spill]] (!%p504_p3) }
  0x11   : > { %s2165_s3 = sld [smem:[#allocation11_spill]] (!%p504_p3) }
  0x12   : > { %s2166_s5 = sld [smem:[#allocation12_spill]] (!%p504_p3) }
  0x13   : > { %s2188_s26 = smov (!%p591_p5, %s1757_s26), 1 }
  0x14   : > { %s1883_s15 = scalar_select %p596_p6, %s1753_s25, 1 }
  0x15   : > { %s1630_s16 = smul.u32 24, %s2188_s26 }
  0x16   : > { %s1612_s30 = sshll.u32 %s1883_s15, 4  ;;  %s631_s13 = scalar_lea.vmem %s2144_s10, %s1883_s15 }
  0x17   : > { %s595_s14 = scalar_lea.vmem %s2164_s0, %s1630_s16  ;;  %s1900_s29 = scalar_lea.vmem %s2165_s3, %s1612_s30 }
  0x18   : > { %s1909_s19 = scalar_lea.vmem %s2166_s5, %s1612_s30  ;;  %s1926_s26 = scalar_lea.vmem %s2143_s9, %s1612_s30 }
  0x19   : > { %s1615_s5 = sshll.u32 %s1883_s15, 6  ;;  %s639_s23 = scalar_lea.vmem %s2146_s12, %s1883_s15 }
  0x1a   : > { %s1940_s0 = scalar_lea.vmem %s2145_s11, %s1615_s5  ;;  %s2167_s3 = sld [smem:[#allocation13_spill]] }
  0x1b   : > { %s2168_s30 = sld [smem:[#allocation3_spill]] }
  0x20   : > { %s1945_s2 = scalar_lea.vmem %s2167_s3, %s1630_s16 }
  0x21   : > { %p1539_p7 = scmp.ne.s32.totalorder %s2168_s30, 0 }
  0x23   : > { %649 = sbr.rel (%p1539_p7) target bundleno = 44 (0x2c), region = 76 }
  0x28   : > { %v650_v0 = vld [vmem:[%s595_s14] sm:$0xff]  ;;  %vm653_vm0 = vcmask 261120   ;;  %v651_v1 = vld [vmem:[%s595_s14 + $0x8] sm:$0xff]  ;;  %v652_v2 = vld [vmem:[%s595_s14 + $0x10] sm:$0x1]  ;;  %vm656_vm1 = vcmask 253952  }
  0x29   : > { %654 = vst.msk [vmem:[%s1945_s2] sm:$0xff] %vm653_vm0, %v650_v0 }
  0x2a   : > { %655 = vst.msk [vmem:[%s1945_s2 + $0x8] sm:$0xff] %vm653_vm0, %v651_v1 }
  0x2b   : > { %657 = vst.msk [vmem:[%s1945_s2 + $0x10] sm:$0x1] %vm656_vm1, %v652_v2 }
  0x2c PF: > { %vm663_vm2 = vcmask 261120   ;;  %vm670_vm3 = vcmask 253952   ;;  %v1771_v9 = vmov 32.0   ;;  %v1617_v31 = vld [vmem:[%s1900_s29 + $0x8] sm:$0xff]  ;;  %v1616_v34 = vld [vmem:[%s1900_s29] sm:$0xff]  ;;  %s2169_s29 = scalar_lea.vmem %s2135_s1, %s1883_s15  ;;  %s2170_s25 = sld [smem:[#allocation10_spill]] }
  0x2d   : > { %1687 = vrcp.f32 %v1771_v9  ;;  %784 = vmatpush.bf16.msra.mxu0 %v1617_v31  ;;  %v1679_v56 = vld [vmem:[%s2169_s29] ss:$0 sm:$0xff]  ;;  %s2172_s21 = scalar_lea.vmem %s2138_s4, %s1883_s15  ;;  %s1772_s22 = smov 112   ;;  %vm804_vm14 = vcmask 130048   ;;  %vm838_vm15 = vcmask 138240   ;;  %vm845_vm0 = vcmask 131072  }
  0x2e   : > { %s1773_s24 = smov 80   ;;  %s1774_s27 = smov 96   ;;  %vm886_vm1 = vcmask 1040384  }
  0x2f   : > { %s1775_s28 = smov 48   ;;  %s1776_s30 = smov 64  }
  0x30   : > { %v1952_v3 = vld [vmem:[%s1945_s2] sm:$0xff]  ;;  %s1778_s3 = smov 16   ;;  %s2173_s29 = scalar_lea.vmem %s2140_s6, %s1883_s15 }
  0x31   : > { %v664_v5 = vsel %vm663_vm2, %v1952_v3, 0.0  ;;  %v1962_v7 = vld [vmem:[%s1945_s2 + $0x8] sm:$0xff]  ;;  %785 = vmatpush.bf16.msra.mxu0 %v1616_v34  ;;  %s2174_s16 = scalar_lea.vmem %s2141_s7, %s1883_s15  ;;  %s2175_s18 = scalar_lea.vmem %s2142_s8, %s1883_s15 }
  0x32   : > { %v1955_v4 = vld [vmem:[%s1945_s2 + $0x10] sm:$0x1]  ;;  %665 = vadd.xlane.f32.xlu0 %v664_v5  ;;  %v667_v8 = vsel %vm663_vm2, %v1962_v7, 0.0  ;;  %s2171_s17 = scalar_lea.vmem %s2170_s25, %s1883_s15 }
  0x33   : > { %v671_v6 = vsel %vm670_vm3, %v1955_v4, 0.0  ;;  %v1688_v10 = vpop.eup %1687  ;;  %v1680_v63 = vld [vmem:[%s2171_s17] ss:$0 sm:$0xff] }
  0x34   : > { %672 = vadd.xlane.f32.xlu1 %v671_v6  ;;  %v675_v11 = vmul.f32 32.0, %v1688_v10  ;;  %vm679_vm4 = vweird.f32 %v1688_v10 }
  0x36   : > { %v676_v12 = vsub.f32 1.0, %v675_v11 }
  0x38   : > { %v677_v13 = vmul.f32 %v1688_v10, %v676_v12 }
  0x3a   : > { %668 = vadd.xlane.f32.xlu0 %v667_v8  ;;  %v678_v14 = vadd.f32 %v1688_v10, %v677_v13 }
  0x3c   : > { %v1966_v15 = vsel %vm679_vm4, %v1688_v10, %v678_v14  ;;  %vm912_vm4 = vcmask 122880  }
  0xa5   : > { %v666_v16 = vpop.xlane.xlu0 %665 }
  0xa6   : > { %v681_v17 = vmul.f32 %v1966_v15, %v666_v16 }
  0xa7   : > { %v673_v20 = vpop.xlane.xlu1 %672 }
  0xa8   : > { %v684_v18 = vsub.f32 %v1952_v3, %v681_v17  ;;  %v683_v24 = vmul.f32 %v1966_v15, %v673_v20  ;;  %v1681_v17 = vld [vmem:[%s2172_s21] ss:$0 sm:$0xff] }
  0xaa   : > { %v687_v19 = vmul.f32 %v684_v18, %v684_v18  ;;  %v1975_v26 = vsub.f32 %v1955_v4, %v683_v24 }
  0xac   : > { %v690_v21 = vsel %vm663_vm2, %v687_v19, 0.0  ;;  %v689_v29 = vmul.f32 %v1975_v26, %v1975_v26 }
  0xad   : > { %691 = vadd.xlane.f32.xlu1 %v690_v21  ;;  %v669_v22 = vpop.xlane.xlu0 %668 }
  0xae   : > { %v682_v23 = vmul.f32 %v1966_v15, %v669_v22  ;;  %v696_v30 = vsel %vm670_vm3, %v689_v29, 0.0 }
  0xb0   : > { %v685_v25 = vsub.f32 %v1962_v7, %v682_v23 }
  0xb2   : > { %v688_v27 = vmul.f32 %v685_v25, %v685_v25 }
  0xb4   : > { %v693_v28 = vsel %vm663_vm2, %v688_v27, 0.0 }
  0xb5   : > { %694 = vadd.xlane.f32.xlu2 %v693_v28 }
  0xbd   : > { %697 = vadd.xlane.f32.xlu2 %v696_v30 }
 0x120   : > { %v692_v32 = vpop.xlane.xlu1 %691 }
 0x121   : > { %v699_v33 = vmul.f32 %v692_v32, %v1966_v15 }
 0x123   : > { %v702_v35 = vadd.f32 1e-06, %v699_v33 }
 0x125   : > { %1689 = vrsqrt.f32 %v702_v35  ;;  %vm711_vm6 = vweird.f32 %v702_v35 }
 0x128   : > { %v695_v36 = vpop.xlane.xlu2 %694 }
 0x129   : > { %v700_v37 = vmul.f32 %v695_v36, %v1966_v15 }
 0x12b   : > { %v1690_v38 = vpop.eup %1689  ;;  %v703_v39 = vadd.f32 1e-06, %v700_v37 }
 0x12c   : > { %v706_v40 = vmul.f32 %v1690_v38, %v702_v35  ;;  %vm712_vm5 = vweird.f32 %v1690_v38 }
 0x12d   : > { %1691 = vrsqrt.f32 %v703_v39  ;;  %vm713_vm7 = vmor %vm711_vm6, %vm712_vm5  ;;  %vm721_vm9 = vweird.f32 %v703_v39  ;;  %vm1034_vm5 = vcmask 261248   ;;  %vm1037_vm6 = vcmask 254080  }
 0x12e   : > { %v707_v41 = vmul.f32 %v1690_v38, %v706_v40 }
 0x130   : > { %v708_v42 = vmul.f32 0.5, %v707_v41  ;;  %v698_v43 = vpop.xlane.xlu2 %697 }
 0x131   : > { %v701_v44 = vmul.f32 %v698_v43, %v1966_v15 }
 0x132   : > { %v709_v45 = vsub.f32 1.5, %v708_v42 }
 0x133   : > { %v1692_v46 = vpop.eup %1691  ;;  %v704_v47 = vadd.f32 1e-06, %v701_v44 }
 0x134   : > { %v710_v48 = vmul.f32 %v1690_v38, %v709_v45  ;;  %v716_v49 = vmul.f32 %v1692_v46, %v703_v39  ;;  %vm722_vm8 = vweird.f32 %v1692_v46 }
 0x135   : > { %1693 = vrsqrt.f32 %v704_v47  ;;  %vm723_vm10 = vmor %vm721_vm9, %vm722_vm8  ;;  %vm731_vm11 = vweird.f32 %v704_v47 }
 0x136   : > { %v717_v50 = vmul.f32 %v1692_v46, %v716_v49  ;;  %v714_v51 = vsel %vm713_vm7, %v1690_v38, %v710_v48 }
 0x137   : > { %v735_v55 = vmul.f32 %v714_v51, %v684_v18 }
 0x138   : > { %v718_v52 = vmul.f32 0.5, %v717_v50 }
 0x139   : > { %v741_v62 = vmul.f32 %v1679_v56, %v735_v55 }
 0x13a   : > { %v719_v53 = vsub.f32 1.5, %v718_v52 }
 0x13b   : > { %v1694_v54 = vpop.eup %1693  ;;  %v747_v5 = vadd.f32 %v1680_v63, %v741_v62 }
 0x13c   : > { %v720_v57 = vmul.f32 %v1692_v46, %v719_v53  ;;  %v726_v58 = vmul.f32 %v1694_v54, %v704_v47  ;;  %vm732_vm12 = vweird.f32 %v1694_v54 }
 0x13d   : > { %vm733_vm13 = vmor %vm731_vm11, %vm732_vm12 }
 0x13e   : > { %v724_v59 = vsel %vm723_vm10, %v1692_v46, %v720_v57  ;;  %v727_v60 = vmul.f32 %v1694_v54, %v726_v58 }
 0x13f   : > { %v736_v61 = vmul.f32 %v724_v59, %v685_v25 }
 0x140   : > { %v728_v0 = vmul.f32 0.5, %v727_v60 }
 0x141   : > { %v742_v1 = vmul.f32 %v1679_v56, %v736_v61 }
 0x142   : > { %v729_v2 = vsub.f32 1.5, %v728_v0 }
 0x143   : > { %v748_v6 = vadd.f32 %v1680_v63, %v742_v1 }
 0x144   : > { %v730_v8 = vmul.f32 %v1694_v54, %v729_v2 }
 0x145   : > { %v750_v9 = vpack.c.bf16 %v748_v6, %v747_v5 }
 0x146   : > { %v734_v10 = vsel %vm733_vm13, %v1694_v54, %v730_v8 }
 0x147   : > { %1548 = vmatmul.msk.bf16.vlgmr.msra.gmra.mxu0 %vm663_vm2, %v750_v9  ;;  %v737_v11 = vmul.f32 %v734_v10, %v1975_v26 }
 0x149   : > { %v743_v12 = vmul.f32 %v1679_v56, %v737_v11 }
 0x14b   : > { %v749_v13 = vadd.f32 %v1680_v63, %v743_v12 }
 0x14d   : > { %v751_v14 = vpack.c.bf16 %v749_v13, %v749_v13 }
 0x157   : > { %1549 = vmatmul.msk.bf16.gmra.mxu0 %vm663_vm2, %v751_v14 }
 0x1c4   : > { %v787_v16 = vpop.f32.mrf.mxu0 }
 0x1c5   : > { %v788_v19 = vadd.f32 %v1681_v17, %v787_v16 }
 0x1cc   : > { %v789_v18 = vpop.f32.mrf.mxu0 }
 0x1cd   : > { %v790_v20 = vadd.f32 %v1681_v17, %v789_v18  ;;  %v1777_v18 = vmov 0  }
 0x1cf   : > { %v2004_v21 = vpack.c.bf16 %v790_v20, %v788_v19  ;;  %v888_v19 = vsel %vm886_vm1, 65535, %v1777_v18 }
 0x1d1   : > { %914 = vrot.lane.b32.xlu2 %v2004_v21, %s1772_s22  ;;  %918 = vrot.lane.b32.xlu1 %v2004_v21, %s1773_s24 }
 0x1d4   : > { %v792_v22 = vpop.f32.mrf.mxu0 }
 0x1d5   : > { %v793_v23 = vadd.f32 %v1681_v17, %v792_v22 }
 0x1d7   : > { %v797_v24 = vpack.c.bf16 %v793_v23, %v793_v23 }
 0x1d9   : > { %800 = vrot.lane.b32.xlu2 %v2004_v21, %s1774_s27  ;;  %916 = vrot.lane.b32.xlu1 %v797_v24, %s1772_s22 }
 0x1da   : > { %920 = vrot.lane.b32.xlu0 %v797_v24, %s1773_s24 }
 0x1dc   : > { %v794_v25 = vpop.f32.mrf.mxu0 }
 0x1e2   : > { %802 = vrot.lane.b32.xlu0 %v797_v24, %s1774_s27 }
 0x22b   : > { %v915_v28 = vpop.permute.xlu2 %914 }
 0x233   : > { %v801_v33 = vpop.permute.xlu2 %800 }
 0x234   : > { %v812_v34 = vsel %vm804_vm14, %v801_v33, 0 }
 0x243   : > { %v919_v29 = vpop.permute.xlu1 %918 }
 0x244   : > { %v929_v32 = vsel %vm804_vm14, %v919_v29, 0 }
 0x24b   : > { %v917_v35 = vpop.permute.xlu1 %916 }
 0x24c   : > { %v921_v26 = vpop.permute.xlu0 %920 }
 0x24d   : > { %v932_v27 = vsel %vm804_vm14, %v921_v26, 0 }
 0x24e   : > { %940 = vmatpush.bf16.xpose.msra.mxu3 %v932_v27 }
 0x254   : > { %v803_v30 = vpop.permute.xlu0 %802 }
 0x255   : > { %v815_v31 = vsel %vm804_vm14, %v803_v30, 0 }
 0x256   : > { %823 = vmatpush.bf16.xpose.msra.mxu1 %v815_v31  ;;  %941 = vmatpush.bf16.xpose.msra.mxu3 %v929_v32 }
 0x25d   : > { %1554 = vmatmul.msk.bf16.vlgmr.msra.gmra.mxu3 %vm804_vm14, %v915_v28 }
 0x25e   : > { %824 = vmatpush.bf16.xpose.msra.mxu1 %v812_v34 }
 0x265   : > { %1550 = vmatmul.msk.bf16.vlgmr.msra.gmra.mxu1 %vm804_vm14, %v2004_v21 }
 0x26d   : > { %1555 = vmatmul.msk.bf16.gmra.mxu3 %vm804_vm14, %v917_v35 }
 0x275   : > { %1551 = vmatmul.msk.bf16.gmra.mxu1 %vm804_vm14, %v797_v24 }
 0x2e0   : > { %v943_v36 = vpop.f32.mrf.mxu3 }
 0x2e1   : > { %v952_v37 = vmul.f32 0.25, %v943_v36 }
 0x2e2   : > { %v826_v38 = vpop.f32.mrf.mxu1 }
 0x2e3   : > { %v835_v39 = vmul.f32 0.25, %v826_v38  ;;  %v955_v40 = vsel %vm838_vm15, %v952_v37, -inf }
 0x2e4   : > { %956 = vmax.xlane.f32.xlu0 %v955_v40 }
 0x2e5   : > { %v839_v41 = vsel %vm838_vm15, %v835_v39, -inf }
 0x2e6   : > { %840 = vmax.xlane.f32.xlu1 %v839_v41 }
 0x2e8   : > { %v945_v42 = vpop.f32.mrf.mxu3 }
 0x2e9   : > { %v953_v43 = vmul.f32 0.25, %v945_v42 }
 0x2ea   : > { %v828_v44 = vpop.f32.mrf.mxu1 }
 0x2eb   : > { %v836_v45 = vmul.f32 0.25, %v828_v44  ;;  %v958_v46 = vsel %vm838_vm15, %v953_v43, -inf }
 0x2ec   : > { %959 = vmax.xlane.f32.xlu2 %v958_v46 }
 0x2ed   : > { %v842_v47 = vsel %vm838_vm15, %v836_v45, -inf }
 0x2ee   : > { %843 = vmax.xlane.f32.xlu0 %v842_v47 }
 0x2f0   : > { %v948_v48 = vpop.f32.mrf.mxu3 }
 0x2f1   : > { %v954_v49 = vmul.f32 0.25, %v948_v48 }
 0x2f2   : > { %v831_v50 = vpop.f32.mrf.mxu1 }
 0x2f3   : > { %v837_v51 = vmul.f32 0.25, %v831_v50  ;;  %v961_v52 = vsel %vm845_vm0, %v954_v49, -inf }
 0x2f4   : > { %962 = vmax.xlane.f32.xlu2 %v961_v52 }
 0x2f5   : > { %v846_v53 = vsel %vm845_vm0, %v837_v51, -inf }
 0x2f6   : > { %847 = vmax.xlane.f32.xlu0 %v846_v53 }
 0x2f8   : > { %v950_v54 = vpop.f32.mrf.mxu3 }
 0x2fa   : > { %v833_v55 = vpop.f32.mrf.mxu1 }
 0x30c   : > { %992 = vrot.lane.b32.xlu2 %v797_v24, %s1775_s28 }
 0x314   : > { %877 = vrot.lane.b32.xlu2 %v797_v24, %s1776_s30 }
 0x357   : > { %v957_v56 = vpop.xlane.xlu0 %956 }
 0x358   : > { %v964_v57 = vsub.f32 %v952_v37, %v957_v56 }
 0x359   : > { %v841_v58 = vpop.xlane.xlu1 %840 }
 0x35a   : > { %v967_v59 = vmul.f32 1.442695, %v964_v57  ;;  %v849_v60 = vsub.f32 %v835_v39, %v841_v58 }
 0x35c   : > { %1695 = vpow2.f32 %v967_v59  ;;  %v852_v61 = vmul.f32 1.442695, %v849_v60  ;;  %v1619_v60 = vld [vmem:[%s1909_s19 + $0x8] sm:$0xff] }
 0x35e   : > { %1697 = vpow2.f32 %v852_v61 }
 0x35f   : > { %v960_v62 = vpop.xlane.xlu2 %959 }
 0x360   : > { %v965_v6 = vsub.f32 %v953_v43, %v960_v62 }
 0x361   : > { %v844_v63 = vpop.xlane.xlu0 %843 }
 0x362   : > { %v1696_v0 = vpop.eup %1695  ;;  %v850_v1 = vsub.f32 %v836_v45, %v844_v63  ;;  %v969_v11 = vmul.f32 1.442695, %v965_v6 }
 0x363   : > { %v973_v2 = vsel %vm838_vm15, %v1696_v0, 0.0 }
 0x364   : > { %v1698_v5 = vpop.eup %1697  ;;  %v854_v8 = vmul.f32 1.442695, %v850_v1  ;;  %974 = vadd.xlane.f32.xlu1 %v973_v2  ;;  %v1618_v1 = vld [vmem:[%s1909_s19] sm:$0xff] }
 0x365   : > { %v858_v9 = vsel %vm838_vm15, %v1698_v5, 0.0 }
 0x366   : > { %1699 = vpow2.f32 %v854_v8  ;;  %859 = vadd.xlane.f32.xlu0 %v858_v9 }
 0x367   : > { %v963_v10 = vpop.xlane.xlu2 %962  ;;  %1701 = vpow2.f32 %v969_v11 }
 0x368   : > { %v966_v29 = vsub.f32 %v954_v49, %v963_v10 }
 0x369   : > { %v848_v12 = vpop.xlane.xlu0 %847 }
 0x36a   : > { %v851_v13 = vsub.f32 %v837_v51, %v848_v12  ;;  %v971_v30 = vmul.f32 1.442695, %v966_v29 }
 0x36c   : > { %v1700_v14 = vpop.eup %1699  ;;  %v856_v16 = vmul.f32 1.442695, %v851_v13  ;;  %v1682_v13 = vld [vmem:[%s2173_s29] ss:$0 sm:$0xff] }
 0x36d   : > { %v861_v17 = vsel %vm838_vm15, %v1700_v14, 0.0  ;;  %v1702_v23 = vpop.eup %1701 }
 0x36e   : > { %1703 = vpow2.f32 %v856_v16  ;;  %862 = vadd.xlane.f32.xlu0 %v861_v17  ;;  %v976_v26 = vsel %vm838_vm15, %v1702_v23, 0.0 }
 0x36f   : > { %v993_v20 = vpop.permute.xlu2 %992  ;;  %1705 = vpow2.f32 %v971_v30 }
 0x370   : > { %v1002_v22 = vand.u32 %v993_v20, %v888_v19 }
 0x372   : > { %1010 = vmatpush.bf16.msrb.mxu0 %v1002_v22 }
 0x374   : > { %v1704_v24 = vpop.eup %1703 }
 0x375   : > { %v864_v25 = vsel %vm845_vm0, %v1704_v24, 0.0  ;;  %v1706_v31 = vpop.eup %1705 }
 0x376   : > { %865 = vadd.xlane.f32.xlu2 %v864_v25  ;;  %977 = vadd.xlane.f32.xlu0 %v976_v26  ;;  %v979_v32 = vsel %vm845_vm0, %v1706_v31, 0.0 }
 0x377   : > { %v878_v27 = vpop.permute.xlu2 %877 }
 0x378   : > { %v890_v28 = vand.u32 %v888_v19, %v878_v27 }
 0x37a   : > { %898 = vmatpush.bf16.msra.mxu2 %v890_v28 }
 0x37d   : > { %990 = vrot.lane.b32.xlu1 %v2004_v21, %s1775_s28 }
 0x38a   : > { %875 = vrot.lane.b32.xlu0 %v2004_v21, %s1776_s30 }
 0x3a7   : > { %980 = vadd.xlane.f32.xlu1 %v979_v32 }
 0x3d7   : > { %v975_v35 = vpop.xlane.xlu1 %974 }
 0x3d8   : > { %1707 = vrcp.f32 %v975_v35 }
 0x3d9   : > { %v860_v33 = vpop.xlane.xlu0 %859 }
 0x3de   : > { %v1708_v37 = vpop.eup %1707 }
 0x3df   : > { %v985_v40 = vmul.f32 %v1708_v37, %v1696_v0 }
 0x3e1   : > { %v863_v34 = vpop.xlane.xlu0 %862 }
 0x3e9   : > { %v978_v36 = vpop.xlane.xlu0 %977  ;;  %v866_v47 = vpop.xlane.xlu2 %865 }
 0x3ea   : > { %1709 = vrcp.f32 %v978_v36 }
 0x3eb   : > { %1711 = vrcp.f32 %v863_v34 }
 0x3ec   : > { %1713 = vrcp.f32 %v860_v33 }
 0x3ed   : > { %1715 = vrcp.f32 %v866_v47 }
 0x3ef   : > { %v991_v38 = vpop.permute.xlu1 %990 }
 0x3f0   : > { %v1710_v39 = vpop.eup %1709  ;;  %1011 = vmatpush.bf16.msrb.mxu0 %v991_v38 }
 0x3f1   : > { %v986_v21 = vmul.f32 %v1710_v39, %v1702_v23  ;;  %v1712_v42 = vpop.eup %1711 }
 0x3f2   : > { %v1714_v43 = vpop.eup %1713  ;;  %v871_v44 = vmul.f32 %v1712_v42, %v1700_v14 }
 0x3f3   : > { %v988_v41 = vpack.c.bf16 %v986_v21, %v985_v40  ;;  %v870_v46 = vmul.f32 %v1714_v43, %v1698_v5  ;;  %v1716_v49 = vpop.eup %1715  ;;  %v1621_v21 = vld [vmem:[%s1926_s26 + $0x8] sm:$0xff]  ;;  %v1620_v43 = vld [vmem:[%s1926_s26] sm:$0xff] }
 0x3f4   : > { %v872_v50 = vmul.f32 %v1716_v49, %v1704_v24  ;;  %1205 = vmatpush.bf16.msrb.mxu1 %v1621_v21 }
 0x3f5   : > { %1556 = vmatmul.msk.bf16.vlgmr.msrb.gmra.mxu0 %vm838_vm15, %v988_v41  ;;  %v873_v48 = vpack.c.bf16 %v871_v44, %v870_v46 }
 0x3f6   : > { %v874_v51 = vpack.c.bf16 %v872_v50, %v872_v50 }
 0x3f8   : > { %1206 = vmatpush.bf16.msrb.mxu1 %v1620_v43 }
 0x3fc   : > { %v876_v45 = vpop.permute.xlu0 %875 }
 0x3fd   : > { %899 = vmatpush.bf16.msra.mxu2 %v876_v45 }
 0x400   : > { %1552 = vmatmul.msk.bf16.vlgmr.msra.gmra.mxu2 %vm838_vm15, %v873_v48 }
 0x401   : > { %1076 = vmatpush.bf16.msrb.mxu2 %v1619_v60 }
 0x405   : > { %1077 = vmatpush.bf16.msrb.mxu2 %v1618_v1 }
 0x410   : > { %1553 = vmatmul.msk.bf16.gmra.mxu2 %vm838_vm15, %v874_v51 }
 0x41a   : > { %v981_v52 = vpop.xlane.xlu1 %980 }
 0x41b   : > { %1717 = vrcp.f32 %v981_v52 }
 0x421   : > { %v1718_v53 = vpop.eup %1717 }
 0x422   : > { %v987_v54 = vmul.f32 %v1718_v53, %v1706_v31 }
 0x424   : > { %v989_v55 = vpack.c.bf16 %v987_v54, %v987_v54 }
 0x426   : > { %1557 = vmatmul.msk.bf16.gmra.mxu0 %vm838_vm15, %v989_v55 }
 0x472   : > { %v1013_v56 = vpop.f32.mrf.mxu0 }
 0x473   : > { %1025 = vrot.lane.b32.xlu0 %v1013_v56, %s1778_s3 }
 0x47a   : > { %v1015_v57 = vpop.f32.mrf.mxu0 }
 0x47b   : > { %1027 = vrot.lane.b32.xlu0 %v1015_v57, %s1778_s3 }
 0x483   : > { %v901_v58 = vpop.f32.mrf.mxu2 }
 0x484   : > { %910 = vst.msk [vmem:[#allocation2] sm:$0xff] %vm804_vm14, %v901_v58 }
 0x48b   : > { %v903_v59 = vpop.f32.mrf.mxu2 }
 0x48c   : > { %911 = vst.msk [vmem:[#allocation2 + $0x8] sm:$0xff] %vm804_vm14, %v903_v59 }
 0x493   : > { %v906_v61 = vpop.f32.mrf.mxu2 }
 0x494   : > { %913 = vst.msk [vmem:[#allocation2 + $0x10] sm:$0x1] %vm912_vm4, %v906_v61  ;;  %v1683_v61 = vld [vmem:[%s2174_s16] ss:$0 sm:$0xff] }
 0x49b   : > { %v908_v62 = vpop.f32.mrf.mxu2 }
 0x4a3   : > { %v1018_v63 = vpop.f32.mrf.mxu0 }
 0x4a4   : > { %1029 = vrot.lane.b32.xlu0 %v1018_v63, %s1778_s3 }
 0x4ab   : > { %v1020_v0 = vpop.f32.mrf.mxu0 }
 0x4e5   : > { %v1026_v2 = vpop.permute.xlu0 %1025 }
 0x4e6   : > { %1035 = vst.msk [vmem:[#allocation2] sm:$0xff] %vm1034_vm5, %v1026_v2  ;;  %v1684_v2 = vld [vmem:[%s2175_s18] ss:$0 sm:$0xff] }
 0x4ed   : > { %v1028_v5 = vpop.permute.xlu0 %1027  ;;  %v1039_v6 = vld [vmem:[#allocation2] sm:$0xff] }
 0x4ee   : > { %1036 = vst.msk [vmem:[#allocation2 + $0x8] sm:$0xff] %vm1034_vm5, %v1028_v5 }
 0x4f5   : > { %v1040_v8 = vld [vmem:[#allocation2 + $0x8] sm:$0xff] }
 0x4f6   : > { %v1042_v9 = vpack.c.bf16 %v1040_v8, %v1039_v6 }
 0x4f8   : > { %1566 = vmatmul.msk.bf16.vlgmr.msrb.gmra.mxu2 %vm663_vm2, %v1042_v9 }
 0x516   : > { %v1030_v10 = vpop.permute.xlu0 %1029 }
 0x517   : > { %1038 = vst.msk [vmem:[#allocation2 + $0x10] sm:$0x1] %vm1037_vm6, %v1030_v10 }
 0x51e   : > { %v1041_v11 = vld [vmem:[#allocation2 + $0x10] sm:$0x1] }
 0x51f   : > { %v1043_v12 = vpack.c.bf16 %v1041_v11, %v1041_v11 }
 0x521   : > { %1567 = vmatmul.msk.bf16.gmra.mxu2 %vm663_vm2, %v1043_v12 }
 0x57b   : > { %v1079_v14 = vpop.f32.mrf.mxu2 }
 0x57c   : > { %v1080_v16 = vadd.f32 %v1682_v13, %v1079_v14 }
 0x57e   : > { %v2052_v17 = vadd.f32 %v1080_v16, %v1952_v3 }
 0x580   : > { %v1093_v18 = vsel %vm663_vm2, %v2052_v17, 0.0 }
 0x581   : > { %1094 = vadd.xlane.f32.xlu1 %v1093_v18 }
 0x583   : > { %v1081_v19 = vpop.f32.mrf.mxu2 }
 0x584   : > { %v1082_v20 = vadd.f32 %v1682_v13, %v1081_v19 }
 0x586   : > { %v2057_v22 = vadd.f32 %v1082_v20, %v1962_v7 }
 0x588   : > { %v1096_v23 = vsel %vm663_vm2, %v2057_v22, 0.0 }
 0x589   : > { %1097 = vadd.xlane.f32.xlu0 %v1096_v23 }
 0x5a4   : > { %v1084_v24 = vpop.f32.mrf.mxu2 }
 0x5a5   : > { %v1085_v25 = vadd.f32 %v1682_v13, %v1084_v24 }
 0x5a7   : > { %v2062_v26 = vadd.f32 %v1085_v25, %v1955_v4 }
 0x5a9   : > { %v1099_v3 = vsel %vm670_vm3, %v2062_v26, 0.0 }
 0x5aa   : > { %1100 = vadd.xlane.f32.xlu2 %v1099_v3 }
 0x5ac   : > { %v1086_v27 = vpop.f32.mrf.mxu2 }
 0x5ad   : > { %v1629_v27 = vld [vmem:[%s1940_s0 + $0x38] sm:$0xff] }
 0x5ae   : > { %1314 = vmatpush.bf16.msrb.mxu3 %v1629_v27 }
 0x5f4   : > { %v1095_v28 = vpop.xlane.xlu1 %1094 }
 0x5f5   : > { %v1102_v29 = vmul.f32 %v1095_v28, %v1966_v15  ;;  %v1628_v28 = vld [vmem:[%s1940_s0 + $0x30] sm:$0xff] }
 0x5f6   : > { %1315 = vmatpush.bf16.msrb.mxu3 %v1628_v28 }
 0x5f7   : > { %v1105_v7 = vsub.f32 %v2052_v17, %v1102_v29  ;;  %v1627_v29 = vld [vmem:[%s1940_s0 + $0x28] sm:$0xff] }
 0x5f9   : > { %v1108_v30 = vmul.f32 %v1105_v7, %v1105_v7 }
 0x5fa   : > { %1316 = vmatpush.bf16.msrb.mxu3 %v1627_v29 }
 0x5fb   : > { %v1111_v31 = vsel %vm663_vm2, %v1108_v30, 0.0  ;;  %v1625_v30 = vld [vmem:[%s1940_s0 + $0x18] sm:$0xff] }
 0x5fc   : > { %v1098_v32 = vpop.xlane.xlu0 %1097  ;;  %1112 = vadd.xlane.f32.xlu1 %v1111_v31  ;;  %v1624_v31 = vld [vmem:[%s1940_s0 + $0x10] sm:$0xff] }
 0x5fd   : > { %v1103_v4 = vmul.f32 %v1098_v32, %v1966_v15  ;;  %v1623_v32 = vld [vmem:[%s1940_s0 + $0x8] sm:$0xff] }
 0x5ff   : > { %v1106_v33 = vsub.f32 %v2057_v22, %v1103_v4  ;;  %v1622_v4 = vld [vmem:[%s1940_s0] sm:$0xff] }
 0x601   : > { %v1109_v34 = vmul.f32 %v1106_v33, %v1106_v33 }
 0x603   : > { %v1114_v35 = vsel %vm663_vm2, %v1109_v34, 0.0 }
 0x604   : > { %1115 = vadd.xlane.f32.xlu2 %v1114_v35 }
 0x61d   : > { %v1101_v36 = vpop.xlane.xlu2 %1100 }
 0x61e   : > { %v1104_v37 = vmul.f32 %v1101_v36, %v1966_v15 }
 0x620   : > { %v1107_v38 = vsub.f32 %v2062_v26, %v1104_v37 }
 0x622   : > { %v1110_v39 = vmul.f32 %v1107_v38, %v1107_v38 }
 0x624   : > { %v1117_v40 = vsel %vm670_vm3, %v1110_v39, 0.0 }
 0x625   : > { %1118 = vadd.xlane.f32.xlu1 %v1117_v40 }
 0x66f   : > { %v1113_v41 = vpop.xlane.xlu1 %1112 }
 0x670   : > { %v1120_v42 = vmul.f32 %v1113_v41, %v1966_v15 }
 0x672   : > { %v1123_v44 = vadd.f32 1e-06, %v1120_v42 }
 0x674   : > { %1719 = vrsqrt.f32 %v1123_v44  ;;  %vm1132_vm8 = vweird.f32 %v1123_v44 }
 0x677   : > { %v1116_v45 = vpop.xlane.xlu2 %1115 }
 0x678   : > { %v1121_v46 = vmul.f32 %v1116_v45, %v1966_v15 }
 0x67a   : > { %v1720_v47 = vpop.eup %1719  ;;  %v1124_v48 = vadd.f32 1e-06, %v1121_v46 }
 0x67b   : > { %v1127_v49 = vmul.f32 %v1720_v47, %v1123_v44  ;;  %vm1133_vm7 = vweird.f32 %v1720_v47 }
 0x67c   : > { %1721 = vrsqrt.f32 %v1124_v48  ;;  %vm1134_vm9 = vmor %vm1132_vm8, %vm1133_vm7  ;;  %vm1142_vm11 = vweird.f32 %v1124_v48 }
 0x67d   : > { %v1128_v50 = vmul.f32 %v1720_v47, %v1127_v49 }
 0x67f   : > { %v1129_v51 = vmul.f32 0.5, %v1128_v50 }
 0x681   : > { %v1130_v52 = vsub.f32 1.5, %v1129_v51 }
 0x682   : > { %v1722_v53 = vpop.eup %1721 }
 0x683   : > { %v1131_v54 = vmul.f32 %v1720_v47, %v1130_v52  ;;  %v1137_v55 = vmul.f32 %v1722_v53, %v1124_v48  ;;  %vm1143_vm10 = vweird.f32 %v1722_v53 }
 0x684   : > { %vm1144_vm12 = vmor %vm1142_vm11, %vm1143_vm10 }
 0x685   : > { %v1138_v56 = vmul.f32 %v1722_v53, %v1137_v55  ;;  %v1135_v57 = vsel %vm1134_vm9, %v1720_v47, %v1131_v54 }
 0x686   : > { %v1156_v60 = vmul.f32 %v1135_v57, %v1105_v7  ;;  %v1626_v7 = vld [vmem:[%s1940_s0 + $0x20] sm:$0xff] }
 0x687   : > { %v1139_v58 = vmul.f32 0.5, %v1138_v56  ;;  %1317 = vmatpush.bf16.msrb.mxu3 %v1626_v7 }
 0x688   : > { %v1162_v1 = vmul.f32 %v1683_v61, %v1156_v60 }
 0x689   : > { %v1140_v59 = vsub.f32 1.5, %v1139_v58 }
 0x68a   : > { %v1168_v6 = vadd.f32 %v1684_v2, %v1162_v1 }
 0x68b   : > { %v1141_v62 = vmul.f32 %v1722_v53, %v1140_v59  ;;  %1318 = vmatpush.bf16.msrb.mxu3 %v1625_v30 }
 0x68d   : > { %v1145_v63 = vsel %vm1144_vm12, %v1722_v53, %v1141_v62 }
 0x68e   : > { %v1157_v0 = vmul.f32 %v1145_v63, %v1106_v33  ;;  %v1685_v33 = vld [vmem:[%s631_s13] ss:$0 sm:$0xff] }
 0x68f   : > { %1319 = vmatpush.bf16.msrb.mxu3 %v1624_v31 }
 0x690   : > { %v1163_v5 = vmul.f32 %v1683_v61, %v1157_v0 }
 0x692   : > { %v1169_v8 = vadd.f32 %v1684_v2, %v1163_v5 }
 0x693   : > { %1320 = vmatpush.bf16.msrb.mxu3 %v1623_v32 }
 0x694   : > { %v1171_v9 = vpack.c.bf16 %v1169_v8, %v1168_v6  ;;  %v1686_v8 = vld [vmem:[%s639_s23] ss:$0 sm:$0xff] }
 0x696   : > { %1576 = vmatmul.msk.bf16.vlgmr.msrb.gmra.mxu1 %vm663_vm2, %v1171_v9 }
 0x697   : > { %1321 = vmatpush.bf16.msrb.mxu3 %v1622_v4 }
 0x698   : > { %v1119_v10 = vpop.xlane.xlu1 %1118 }
 0x699   : > { %v1122_v11 = vmul.f32 %v1119_v10, %v1966_v15 }
 0x69b   : > { %v1125_v12 = vadd.f32 1e-06, %v1122_v11 }
 0x69d   : > { %1723 = vrsqrt.f32 %v1125_v12  ;;  %vm1152_vm14 = vweird.f32 %v1125_v12 }
 0x6a3   : > { %v1724_v13 = vpop.eup %1723 }
 0x6a4   : > { %v1147_v14 = vmul.f32 %v1724_v13, %v1125_v12  ;;  %vm1153_vm13 = vweird.f32 %v1724_v13 }
 0x6a5   : > { %vm1154_vm15 = vmor %vm1152_vm14, %vm1153_vm13 }
 0x6a6   : > { %v1148_v16 = vmul.f32 %v1724_v13, %v1147_v14 }
 0x6a8   : > { %v1149_v18 = vmul.f32 0.5, %v1148_v16 }
 0x6aa   : > { %v1150_v19 = vsub.f32 1.5, %v1149_v18 }
 0x6ac   : > { %v1151_v20 = vmul.f32 %v1724_v13, %v1150_v19 }
 0x6ae   : > { %v1155_v23 = vsel %vm1154_vm15, %v1724_v13, %v1151_v20 }
 0x6af   : > { %v1158_v24 = vmul.f32 %v1155_v23, %v1107_v38 }
 0x6b1   : > { %v1164_v15 = vmul.f32 %v1683_v61, %v1158_v24 }
 0x6b3   : > { %v1170_v25 = vadd.f32 %v1684_v2, %v1164_v15 }
 0x6b5   : > { %v1172_v3 = vpack.c.bf16 %v1170_v25, %v1170_v25 }
 0x6b7   : > { %1577 = vmatmul.msk.bf16.gmra.mxu1 %vm663_vm2, %v1172_v3 }
 0x713   : > { %v1208_v34 = vpop.f32.mrf.mxu1 }
 0x714   : > { %v1209_v35 = vadd.f32 %v1685_v33, %v1208_v34 }
 0x716   : > { %v1220_v36 = vmul.f32 0.044715, %v1209_v35  ;;  %v1217_v50 = vmul.f32 0.5, %v1209_v35 }
 0x718   : > { %v1223_v37 = vmul.f32 %v1220_v36, %v1209_v35 }
 0x71a   : > { %v1226_v38 = vmul.f32 %v1223_v37, %v1209_v35 }
 0x71b   : > { %v1210_v39 = vpop.f32.mrf.mxu1 }
 0x71c   : > { %v1211_v40 = vadd.f32 %v1685_v33, %v1210_v39  ;;  %v1229_v21 = vadd.f32 %v1226_v38, %v1209_v35 }
 0x71e   : > { %v1221_v41 = vmul.f32 0.044715, %v1211_v40  ;;  %v1232_v43 = vmul.f32 0.7978846, %v1229_v21  ;;  %v1218_v51 = vmul.f32 0.5, %v1211_v40 }
 0x720   : > { %v1224_v42 = vmul.f32 %v1221_v41, %v1211_v40  ;;  %1725 = vtanh.f32 %v1232_v43 }
 0x722   : > { %v1227_v44 = vmul.f32 %v1224_v42, %v1211_v40 }
 0x724   : > { %v1230_v45 = vadd.f32 %v1227_v44, %v1211_v40 }
 0x726   : > { %v1233_v46 = vmul.f32 0.7978846, %v1230_v45  ;;  %v1726_v47 = vpop.eup %1725 }
 0x727   : > { %v1238_v48 = vadd.f32 1.0, %v1726_v47 }
 0x728   : > { %1727 = vtanh.f32 %v1233_v46 }
 0x729   : > { %v1241_v53 = vmul.f32 %v1238_v48, %v1217_v50 }
 0x72e   : > { %v1728_v49 = vpop.eup %1727 }
 0x72f   : > { %v1239_v52 = vadd.f32 1.0, %v1728_v49 }
 0x731   : > { %v1242_v54 = vmul.f32 %v1239_v52, %v1218_v51 }
 0x733   : > { %v1244_v55 = vpack.c.bf16 %v1242_v54, %v1241_v53 }
 0x734   : > { %v1213_v56 = vpop.f32.mrf.mxu1 }
 0x735   : > { %v1214_v57 = vadd.f32 %v1685_v33, %v1213_v56  ;;  %1322 = vmatmul.bf16.vlgmr.msrb.gmra.mxu3 %v1244_v55 }
 0x737   : > { %v1222_v58 = vmul.f32 0.044715, %v1214_v57  ;;  %v1219_v1 = vmul.f32 0.5, %v1214_v57 }
 0x739   : > { %v1225_v59 = vmul.f32 %v1222_v58, %v1214_v57 }
 0x73b   : > { %v1228_v60 = vmul.f32 %v1225_v59, %v1214_v57 }
 0x73c   : > { %v1215_v61 = vpop.f32.mrf.mxu1 }
 0x73d   : > { %v1231_v62 = vadd.f32 %v1228_v60, %v1214_v57 }
 0x73f   : > { %v1234_v63 = vmul.f32 0.7978846, %v1231_v62 }
 0x741   : > { %1729 = vtanh.f32 %v1234_v63 }
 0x747   : > { %v1730_v0 = vpop.eup %1729 }
 0x748   : > { %v1240_v2 = vadd.f32 1.0, %v1730_v0 }
 0x74a   : > { %v1243_v5 = vmul.f32 %v1240_v2, %v1219_v1 }
 0x74c   : > { %v1245_v6 = vpack.c.bf16 %v1243_v5, %v1243_v5 }
 0x74e   : > { %1327 = vmatmul.bf16.gmra.mxu3 %v1245_v6 }
 0x7b8   : > { %v1323_v9 = vpop.f32.mrf.mxu3 }
 0x7b9   : > { %v1324_v10 = vadd.f32 %v1686_v8, %v1323_v9 }
 0x7bb   : > { %v1332_v11 = vadd.f32 %v1324_v10, %v2052_v17 }
 0x7bd   : > { %1335 = vst.msk [vmem:[%s1945_s2] sm:$0xff] %vm663_vm2, %v1332_v11 }
 0x7c0   : > { %v1325_v12 = vpop.f32.mrf.mxu3 }
 0x7c1   : > { %v1326_v13 = vadd.f32 %v1686_v8, %v1325_v12 }
 0x7c3   : > { %v1333_v14 = vadd.f32 %v1326_v13, %v2057_v22 }
 0x7c5   : > { %1336 = vst.msk [vmem:[%s1945_s2 + $0x8] sm:$0xff] %vm663_vm2, %v1333_v14 }
 0x7d1   : > { %v1328_v16 = vpop.f32.mrf.mxu3 }
 0x7d2   : > { %v1329_v18 = vadd.f32 %v1686_v8, %v1328_v16 }
 0x7d4   : > { %v1334_v19 = vadd.f32 %v1329_v18, %v2062_v26 }
 0x7d6   : > { %1337 = vst.msk [vmem:[%s1945_s2 + $0x10] sm:$0x1] %vm670_vm3, %v1334_v19 }
 0x7d9   : > { %v1330_v20 = vpop.f32.mrf.mxu3 }
 0x7da PF: > { %s2176_s15 = sld [smem:[#allocation6_spill]] }
 0x7db   : > { %s2177_s25 = sld [smem:[#allocation4_spill]] }
 0x7dc   : > { %s2178_s26 = sld [smem:[#allocation5_spill]] }
 0x7dd   : > { %s2179_s27 = sld [smem:[#allocation7_spill]] }
 0x7de   : > { %s2180_s28 = sld [smem:[#allocation8_spill]] }
 0x7e0   : > { %s23_s29 = sadd.s32 1, %s2176_s15  }
 0x7e1   : > { %p20_p8 = scmp.ge.s32.totalorder %s23_s29, 6  }
 0x7e3   :  { %22 = sbr.rel (!%p20_p8) target bundleno = 6 (0x6), region = 142 }

// kernel: _lambda_.9
= control target key start
LH: loop header
LB: loop body
LE: loop exit
PB: predicated region body
PF: predicated region fallthrough
CT: control target
= control target key end

     0   :  { %vm44_vm0 = vcmask 261120   ;;  %s1188_s0 = inlined_call_operand.vmem [shape: f32[2,50,32], index: 0, kind: input, shape index: {}]   ;;  %s1189_s1 = inlined_call_operand.vmem [shape: f32[1,32], index: 1, kind: input, shape index: {}]   ;;  %s1190_s2 = inlined_call_operand.vmem [shape: f32[1,32], index: 2, kind: input, shape index: {}]   ;;  %s1191_s3 = inlined_call_operand.vmem [shape: f32[1,32], index: 3, kind: input, shape index: {}]   ;;  %s1192_s4 = inlined_call_operand.vmem [shape: f32[1,32], index: 4, kind: input, shape index: {}]   ;;  %s1193_s5 = inlined_call_operand.vmem [shape: bf16[32,10], index: 5, kind: input, shape index: {}]   ;;  %s1194_s6 = inlined_call_operand.vmem [shape: f32[1,10], index: 6, kind: input, shape index: {}]   ;;  %s1195_s7 = inlined_call_operand.hbm [shape: f32[2,10], index: 7, kind: output, shape index: {}]  }
   0x1   :  { %v35_v0 = vld [vmem:[%s1188_s0 + $0x38] sm:$0xff]  ;;  %v688_v1 = vld [vmem:[%s1188_s0 + $0x10] sm:$0xff]  ;;  %v28_v2 = vld [vmem:[%s1188_s0] sm:$0xff] }
   0x2   :  { %v67_v3 = vsel %vm44_vm0, %v35_v0, 0.0  ;;  %v51_v4 = vsel %vm44_vm0, %v688_v1, 0.0  ;;  %v45_v5 = vsel %vm44_vm0, %v28_v2, 0.0  ;;  %v700_v6 = vld [vmem:[%s1188_s0 + $0x40] sm:$0xff]  ;;  %v705_v7 = vld [vmem:[%s1188_s0 + $0x48] sm:$0xff] }
   0x3   :  { %68 = vadd.xlane.f32.xlu1 %v67_v3  ;;  %52 = vadd.xlane.f32.xlu2 %v51_v4  ;;  %v710_v8 = vld [vmem:[%s1188_s0 + $0x8] sm:$0xff]  ;;  %v70_v9 = vsel %vm44_vm0, %v700_v6, 0.0  ;;  %v73_v10 = vsel %vm44_vm0, %v705_v7, 0.0 }
   0x4   :  { %46 = vadd.xlane.f32.xlu0 %v45_v5 }
   0x5   :  { %12 = vsyncpa [#allocation3], 0  ;;  %v48_v11 = vsel %vm44_vm0, %v710_v8, 0.0  ;;  %v721_v12 = vld [vmem:[%s1188_s0 + $0x20] sm:$0xff]  ;;  %v726_v13 = vld [vmem:[%s1188_s0 + $0x50] sm:$0xff]  ;;  %vm63_vm1 = vcmask 254976  }
   0x6   :  { %v731_v14 = vld [vmem:[%s1188_s0 + $0x18] sm:$0xff]  ;;  %v57_v15 = vsel %vm44_vm0, %v721_v12, 0.0  ;;  %v76_v16 = vsel %vm44_vm0, %v726_v13, 0.0  ;;  %v742_v18 = vld [vmem:[%s1188_s0 + $0x60] sm:$0xff]  ;;  %v747_v19 = vld [vmem:[%s1188_s0 + $0x28] sm:$0xff]  ;;  %v639_v28 = vmov 32.0  }
   0x7   :  { %v54_v17 = vsel %vm44_vm0, %v731_v14, 0.0  ;;  %v752_v20 = vld [vmem:[%s1188_s0 + $0x58] sm:$0xff]  ;;  %v82_v21 = vsel %vm44_vm0, %v742_v18, 0.0  ;;  %v60_v22 = vsel %vm44_vm0, %v747_v19, 0.0  ;;  %v763_v24 = vld [vmem:[%s1188_s0 + $0x68] sm:$0x3]  ;;  %579 = vrcp.f32 %v639_v28 }
   0x8   :  { %v79_v23 = vsel %vm44_vm0, %v752_v20, 0.0  ;;  %v768_v25 = vld [vmem:[%s1188_s0 + $0x30] sm:$0x3]  ;;  %v85_v26 = vsel %vm63_vm1, %v763_v24, 0.0  ;;  %s551_s18 = sshll.u32 %s1195_s7, 4  ;;  %s552_s18 = int_to_ptr.hbm [resolvable:$true] %s551_s18 }
   0x9   :  { %v64_v27 = vsel %vm63_vm1, %v768_v25, 0.0 }
   0xb   :  { %71 = vadd.xlane.f32.xlu1 %v70_v9  ;;  %74 = vadd.xlane.f32.xlu2 %v73_v10 }
   0xc   :  { %49 = vadd.xlane.f32.xlu0 %v48_v11 }
   0xd   :  { %v580_v29 = vpop.eup %579 }
   0xe   :  { %v89_v30 = vmul.f32 32.0, %v580_v29  ;;  %vm93_vm2 = vweird.f32 %v580_v29 }
  0x10   :  { %v90_v31 = vsub.f32 1.0, %v89_v30 }
  0x12   :  { %v91_v32 = vmul.f32 %v580_v29, %v90_v31 }
  0x13   :  { %58 = vadd.xlane.f32.xlu2 %v57_v15  ;;  %77 = vadd.xlane.f32.xlu1 %v76_v16 }
  0x14   :  { %55 = vadd.xlane.f32.xlu0 %v54_v17  ;;  %v92_v33 = vadd.f32 %v580_v29, %v91_v32 }
  0x16   :  { %v774_v34 = vsel %vm93_vm2, %v580_v29, %v92_v33 }
  0x1b   :  { %83 = vadd.xlane.f32.xlu2 %v82_v21  ;;  %61 = vadd.xlane.f32.xlu1 %v60_v22 }
  0x1c   :  { %80 = vadd.xlane.f32.xlu0 %v79_v23 }
  0x23   :  { %86 = vadd.xlane.f32.xlu1 %v85_v26 }
  0x24   :  { %65 = vadd.xlane.f32.xlu0 %v64_v27 }
  0x76   :  { %v69_v35 = vpop.xlane.xlu1 %68  ;;  %v53_v36 = vpop.xlane.xlu2 %52 }
  0x77   :  { %v102_v37 = vmul.f32 %v774_v34, %v69_v35  ;;  %v47_v38 = vpop.xlane.xlu0 %46  ;;  %v97_v54 = vmul.f32 %v774_v34, %v53_v36 }
  0x78   :  { %v95_v39 = vmul.f32 %v774_v34, %v47_v38 }
  0x79   :  { %v778_v40 = vsub.f32 %v35_v0, %v102_v37  ;;  %v810_v61 = vsub.f32 %v688_v1, %v97_v54 }
  0x7a   :  { %v780_v41 = vsub.f32 %v28_v2, %v95_v39 }
  0x7b   :  { %v130_v42 = vmul.f32 %v778_v40, %v778_v40 }
  0x7c   :  { %v123_v43 = vmul.f32 %v780_v41, %v780_v41 }
  0x7d   :  { %v158_v44 = vsel %vm44_vm0, %v130_v42, 0.0 }
  0x7e   :  { %v72_v45 = vpop.xlane.xlu1 %71  ;;  %159 = vadd.xlane.f32.xlu1 %v158_v44  ;;  %v75_v46 = vpop.xlane.xlu2 %74  ;;  %v137_v47 = vsel %vm44_vm0, %v123_v43, 0.0 }
  0x7f   :  { %v103_v48 = vmul.f32 %v774_v34, %v72_v45  ;;  %v104_v49 = vmul.f32 %v774_v34, %v75_v46  ;;  %138 = vadd.xlane.f32.xlu2 %v137_v47  ;;  %v50_v50 = vpop.xlane.xlu0 %49 }
  0x80   :  { %v96_v51 = vmul.f32 %v774_v34, %v50_v50 }
  0x81   :  { %v792_v52 = vsub.f32 %v700_v6, %v103_v48  ;;  %v795_v53 = vsub.f32 %v705_v7, %v104_v49  ;;  %v125_v7 = vmul.f32 %v810_v61, %v810_v61 }
  0x82   :  { %v799_v55 = vsub.f32 %v710_v8, %v96_v51 }
  0x83   :  { %v132_v56 = vmul.f32 %v795_v53, %v795_v53  ;;  %v131_v57 = vmul.f32 %v792_v52, %v792_v52  ;;  %v143_v15 = vsel %vm44_vm0, %v125_v7, 0.0 }
  0x84   :  { %v124_v58 = vmul.f32 %v799_v55, %v799_v55 }
  0x85   :  { %v164_v59 = vsel %vm44_vm0, %v132_v56, 0.0  ;;  %v161_v60 = vsel %vm44_vm0, %v131_v57, 0.0 }
  0x86   :  { %165 = vadd.xlane.f32.xlu1 %v164_v59  ;;  %v59_v62 = vpop.xlane.xlu2 %58  ;;  %v140_v63 = vsel %vm44_vm0, %v124_v58, 0.0  ;;  %v78_v0 = vpop.xlane.xlu1 %77 }
  0x87   :  { %v99_v2 = vmul.f32 %v774_v34, %v59_v62  ;;  %162 = vadd.xlane.f32.xlu2 %v161_v60  ;;  %141 = vadd.xlane.f32.xlu0 %v140_v63  ;;  %v56_v3 = vpop.xlane.xlu0 %55  ;;  %v105_v5 = vmul.f32 %v774_v34, %v78_v0 }
  0x88   :  { %v98_v4 = vmul.f32 %v774_v34, %v56_v3 }
  0x89   :  { %v817_v6 = vsub.f32 %v721_v12, %v99_v2  ;;  %v827_v9 = vsub.f32 %v726_v13, %v105_v5 }
  0x8a   :  { %v820_v1 = vsub.f32 %v731_v14, %v98_v4 }
  0x8b   :  { %v127_v8 = vmul.f32 %v817_v6, %v817_v6  ;;  %v133_v23 = vmul.f32 %v827_v9, %v827_v9 }
  0x8c   :  { %v126_v10 = vmul.f32 %v820_v1, %v820_v1 }
  0x8d   :  { %v149_v11 = vsel %vm44_vm0, %v127_v8, 0.0  ;;  %v167_v30 = vsel %vm44_vm0, %v133_v23, 0.0 }
  0x8e   :  { %150 = vadd.xlane.f32.xlu1 %v149_v11  ;;  %v84_v12 = vpop.xlane.xlu2 %83  ;;  %v146_v14 = vsel %vm44_vm0, %v126_v10, 0.0  ;;  %v62_v16 = vpop.xlane.xlu1 %61 }
  0x8f   :  { %v107_v17 = vmul.f32 %v774_v34, %v84_v12  ;;  %144 = vadd.xlane.f32.xlu0 %v143_v15  ;;  %147 = vadd.xlane.f32.xlu2 %v146_v14  ;;  %v81_v21 = vpop.xlane.xlu0 %80  ;;  %v100_v22 = vmul.f32 %v774_v34, %v62_v16 }
  0x90   :  { %v106_v13 = vmul.f32 %v774_v34, %v81_v21 }
  0x91   :  { %v840_v26 = vsub.f32 %v742_v18, %v107_v17  ;;  %v848_v29 = vsub.f32 %v747_v19, %v100_v22 }
  0x92   :  { %v843_v27 = vsub.f32 %v752_v20, %v106_v13 }
  0x93   :  { %v135_v28 = vmul.f32 %v840_v26, %v840_v26  ;;  %v128_v19 = vmul.f32 %v848_v29, %v848_v29 }
  0x94   :  { %v134_v31 = vmul.f32 %v843_v27, %v843_v27 }
  0x95   :  { %v173_v32 = vsel %vm44_vm0, %v135_v28, 0.0  ;;  %v152_v39 = vsel %vm44_vm0, %v128_v19, 0.0 }
  0x96   :  { %174 = vadd.xlane.f32.xlu1 %v173_v32  ;;  %v170_v18 = vsel %vm44_vm0, %v134_v31, 0.0  ;;  %v87_v33 = vpop.xlane.xlu1 %86 }
  0x97   :  { %168 = vadd.xlane.f32.xlu0 %v167_v30  ;;  %171 = vadd.xlane.f32.xlu2 %v170_v18  ;;  %v66_v20 = vpop.xlane.xlu0 %65  ;;  %v108_v36 = vmul.f32 %v774_v34, %v87_v33 }
  0x98   :  { %v101_v35 = vmul.f32 %v774_v34, %v66_v20 }
  0x99   :  { %v863_v38 = vsub.f32 %v763_v24, %v108_v36 }
  0x9a   :  { %v860_v37 = vsub.f32 %v768_v25, %v101_v35 }
  0x9b   :  { %v136_v44 = vmul.f32 %v863_v38, %v863_v38 }
  0x9c   :  { %v129_v42 = vmul.f32 %v860_v37, %v860_v37 }
  0x9d   :  { %v176_v45 = vsel %vm63_vm1, %v136_v44, 0.0 }
  0x9e   :  { %v155_v43 = vsel %vm63_vm1, %v129_v42, 0.0 }
  0x9f   :  { %153 = vadd.xlane.f32.xlu0 %v152_v39  ;;  %156 = vadd.xlane.f32.xlu2 %v155_v43 }
  0xa7   :  { %177 = vadd.xlane.f32.xlu0 %v176_v45 }
  0xf1   :  { %v160_v25 = vpop.xlane.xlu1 %159 }
  0xf2   :  { %v186_v46 = vmul.f32 %v160_v25, %v774_v34  ;;  %v139_v24 = vpop.xlane.xlu2 %138 }
  0xf3   :  { %v179_v47 = vmul.f32 %v139_v24, %v774_v34 }
  0xf4   :  { %v874_v48 = vadd.f32 1e-06, %v186_v46 }
  0xf5   :  { %v876_v49 = vadd.f32 1e-06, %v179_v47 }
  0xf6   :  { %581 = vrsqrt.f32 %v874_v48  ;;  %vm283_vm3 = vweird.f32 %v874_v48 }
  0xf7   :  { %583 = vrsqrt.f32 %v876_v49  ;;  %vm213_vm11 = vweird.f32 %v876_v49 }
  0xf9   :  { %v166_v50 = vpop.xlane.xlu1 %165 }
  0xfa   :  { %v188_v51 = vmul.f32 %v166_v50, %v774_v34  ;;  %v163_v54 = vpop.xlane.xlu2 %162  ;;  %v142_v56 = vpop.xlane.xlu0 %141 }
  0xfb   :  { %v187_v57 = vmul.f32 %v163_v54, %v774_v34  ;;  %v180_v58 = vmul.f32 %v142_v56, %v774_v34 }
  0xfc   :  { %v883_v59 = vpop.eup %581  ;;  %v885_v60 = vadd.f32 1e-06, %v188_v51 }
  0xfd   :  { %v887_v62 = vpop.eup %583  ;;  %v278_v63 = vmul.f32 %v883_v59, %v874_v48  ;;  %v201_v0 = vadd.f32 1e-06, %v187_v57  ;;  %v891_v2 = vadd.f32 1e-06, %v180_v58  ;;  %vm284_vm4 = vweird.f32 %v883_v59 }
  0xfe   :  { %585 = vrsqrt.f32 %v885_v60  ;;  %v208_v4 = vmul.f32 %v887_v62, %v876_v49  ;;  %vm938_vm7 = vmor %vm283_vm3, %vm284_vm4  ;;  %vm303_vm8 = vweird.f32 %v885_v60  ;;  %vm214_vm10 = vweird.f32 %v887_v62 }
  0xff   :  { %v279_v3 = vmul.f32 %v883_v59, %v278_v63  ;;  %587 = vrsqrt.f32 %v201_v0  ;;  %vm293_vm5 = vweird.f32 %v201_v0  ;;  %vm988_vm15 = vmor %vm213_vm11, %vm214_vm10  ;;  %vm223_vm2 = vweird.f32 %v891_v2 }
 0x100   :  { %589 = vrsqrt.f32 %v891_v2  ;;  %v209_v12 = vmul.f32 %v887_v62, %v208_v4 }
 0x101   :  { %v151_v5 = vpop.xlane.xlu1 %150  ;;  %v280_v11 = vmul.f32 0.5, %v279_v3 }
 0x102   :  { %v183_v7 = vmul.f32 %v151_v5, %v774_v34  ;;  %v148_v8 = vpop.xlane.xlu2 %147  ;;  %v145_v10 = vpop.xlane.xlu0 %144  ;;  %v210_v31 = vmul.f32 0.5, %v209_v12  ;;  %v983_v12 = vld [vmem:[%s1189_s1] ss:$0 sm:$0xff] }
 0x103   :  { %v182_v15 = vmul.f32 %v148_v8, %v774_v34  ;;  %v181_v28 = vmul.f32 %v145_v10, %v774_v34  ;;  %v281_v30 = vsub.f32 1.5, %v280_v11 }
 0x104   :  { %v901_v14 = vpop.eup %585  ;;  %v903_v16 = vadd.f32 1e-06, %v183_v7  ;;  %v211_v44 = vsub.f32 1.5, %v210_v31 }
 0x105   :  { %v905_v17 = vpop.eup %587  ;;  %v298_v21 = vmul.f32 %v901_v14, %v885_v60  ;;  %v909_v13 = vadd.f32 1e-06, %v182_v15  ;;  %v924_v39 = vadd.f32 1e-06, %v181_v28  ;;  %v282_v43 = vmul.f32 %v883_v59, %v281_v30 }
 0x106   :  { %v911_v22 = vpop.eup %589  ;;  %v288_v23 = vmul.f32 %v905_v17, %v201_v0  ;;  %591 = vrsqrt.f32 %v903_v16  ;;  %vm294_vm6 = vweird.f32 %v905_v17  ;;  %vm304_vm9 = vweird.f32 %v901_v14 }
 0x107   :  { %v299_v32 = vmul.f32 %v901_v14, %v298_v21  ;;  %v218_v18 = vmul.f32 %v911_v22, %v891_v2  ;;  %593 = vrsqrt.f32 %v909_v13  ;;  %v286_v63 = vsel %vm938_vm7, %v883_v59, %v282_v43  ;;  %vm960_vm12 = vmor %vm293_vm5, %vm294_vm6 }
 0x108   :  { %v289_v33 = vmul.f32 %v905_v17, %v288_v23  ;;  %595 = vrsqrt.f32 %v924_v39  ;;  %v212_v48 = vmul.f32 %v887_v62, %v211_v44  ;;  %vm224_vm13 = vweird.f32 %v911_v22  ;;  %vm969_vm14 = vmor %vm303_vm8, %vm304_vm9 }
 0x109   :  { %v300_v20 = vmul.f32 0.5, %v299_v32  ;;  %v219_v35 = vmul.f32 %v911_v22, %v218_v18  ;;  %v175_v36 = vpop.xlane.xlu1 %174  ;;  %v354_v60 = vmul.f32 %v286_v63, %v778_v40  ;;  %vm1005_vm3 = vmor %vm223_vm2, %vm224_vm13  ;;  %vm253_vm4 = vweird.f32 %v903_v16 }
 0x10a   :  { %v290_v19 = vmul.f32 0.5, %v289_v33  ;;  %v169_v42 = vpop.xlane.xlu0 %168  ;;  %v191_v25 = vmul.f32 %v175_v36, %v774_v34  ;;  %v172_v4 = vpop.xlane.xlu2 %171  ;;  %v216_v23 = vsel %vm988_vm15, %v887_v62, %v212_v48  ;;  %vm243_vm6 = vweird.f32 %v909_v13 }
 0x10b   :  { %v220_v45 = vmul.f32 0.5, %v219_v35  ;;  %v301_v24 = vsub.f32 1.5, %v300_v20  ;;  %v190_v62 = vmul.f32 %v172_v4, %v774_v34  ;;  %v371_v20 = vmul.f32 %v983_v12, %v354_v60 }
 0x10c   :  { %v928_v46 = vpop.eup %591  ;;  %v291_v47 = vsub.f32 1.5, %v290_v19  ;;  %v945_v57 = vadd.f32 1e-06, %v191_v25  ;;  %v347_v35 = vmul.f32 %v216_v23, %v780_v41  ;;  %vm233_vm10 = vweird.f32 %v924_v39 }
 0x10d   :  { %v221_v50 = vsub.f32 1.5, %v220_v45  ;;  %v248_v51 = vmul.f32 %v928_v46, %v903_v16  ;;  %v947_v58 = vpop.eup %593  ;;  %v302_v5 = vmul.f32 %v901_v14, %v301_v24  ;;  %v1022_v36 = vadd.f32 1e-06, %v190_v62 }
 0x10e   :  { %v292_v56 = vmul.f32 %v905_v17, %v291_v47  ;;  %v238_v59 = vmul.f32 %v947_v58, %v909_v13  ;;  %597 = vrsqrt.f32 %v945_v57  ;;  %v978_v11 = vpop.eup %595  ;;  %vm254_vm5 = vweird.f32 %v928_v46 }
 0x10f   :  { %v249_v3 = vmul.f32 %v928_v46, %v248_v51  ;;  %v222_v0 = vmul.f32 %v911_v22, %v221_v50  ;;  %v228_v28 = vmul.f32 %v978_v11, %v924_v39  ;;  %v306_v40 = vsel %vm969_vm14, %v901_v14, %v302_v5  ;;  %vm1041_vm7 = vmor %vm253_vm4, %vm254_vm5 }
 0x110   :  { %v296_v49 = vsel %vm960_vm12, %v905_v17, %v292_v56  ;;  %v239_v17 = vmul.f32 %v947_v58, %v238_v59  ;;  %v189_v14 = vmul.f32 %v169_v42, %v774_v34  ;;  %v356_v42 = vmul.f32 %v306_v40, %v795_v53 }
 0x111   :  { %v250_v10 = vmul.f32 0.5, %v249_v3  ;;  %v355_v30 = vmul.f32 %v296_v49, %v792_v52  ;;  %v226_v2 = vsel %vm1005_vm3, %v911_v22, %v222_v0  ;;  %v229_v33 = vmul.f32 %v978_v11, %v228_v28  ;;  %v1018_v52 = vld [vmem:[%s1190_s2] ss:$0 sm:$0xff] }
 0x112   :  { %v154_v21 = vpop.xlane.xlu0 %153  ;;  %v240_v32 = vmul.f32 0.5, %v239_v17  ;;  %v348_v44 = vmul.f32 %v226_v2, %v799_v55  ;;  %v1031_v45 = vadd.f32 1e-06, %v189_v14  ;;  %v157_v50 = vpop.xlane.xlu2 %156  ;;  %v388_v51 = vadd.f32 %v1018_v52, %v371_v20 }
 0x113   :  { %v251_v18 = vsub.f32 1.5, %v250_v10  ;;  %v230_v43 = vmul.f32 0.5, %v229_v33  ;;  %v372_v41 = vmul.f32 %v983_v12, %v355_v30  ;;  %v364_v54 = vmul.f32 %v983_v12, %v347_v35 }
 0x114   :  { %v1024_v19 = vpop.eup %597  ;;  %v241_v22 = vsub.f32 1.5, %v240_v32  ;;  %vm244_vm8 = vweird.f32 %v947_v58  ;;  %599 = vrsqrt.f32 %v1022_v36  ;;  %vm234_vm9 = vweird.f32 %v978_v11 }
 0x115   :  { %v252_v25 = vmul.f32 %v928_v46, %v251_v18  ;;  %v231_v24 = vsub.f32 1.5, %v230_v43  ;;  %v328_v47 = vmul.f32 %v1024_v19, %v945_v57  ;;  %v373_v3 = vmul.f32 %v983_v12, %v356_v42  ;;  %vm1062_vm11 = vmor %vm243_vm6, %vm244_vm8 }
 0x116   :  { %v242_v55 = vmul.f32 %v947_v58, %v241_v22  ;;  %601 = vrsqrt.f32 %v1031_v45  ;;  %v185_v16 = vmul.f32 %v157_v50, %v774_v34  ;;  %v389_v4 = vadd.f32 %v1018_v52, %v372_v41  ;;  %vm1067_vm12 = vmor %vm233_vm10, %vm234_vm9 }
 0x117   :  { %v232_v56 = vmul.f32 %v978_v11, %v231_v24  ;;  %v329_v63 = vmul.f32 %v1024_v19, %v328_v47  ;;  %v365_v5 = vmul.f32 %v983_v12, %v348_v44  ;;  %v256_v7 = vsel %vm1041_vm7, %v928_v46, %v252_v25 }
 0x118   :  { %v184_v39 = vmul.f32 %v154_v21, %v774_v34  ;;  %v1071_v0 = vadd.f32 1e-06, %v185_v16  ;;  %v381_v60 = vadd.f32 %v1018_v52, %v364_v54  ;;  %v246_v13 = vsel %vm1062_vm11, %v947_v58, %v242_v55 }
 0x119   :  { %v330_v49 = vmul.f32 0.5, %v329_v63  ;;  %v236_v46 = vsel %vm1067_vm12, %v978_v11, %v232_v56  ;;  %v414_v21 = vsel %vm44_vm0, %v388_v51, 0.0  ;;  %v351_v23 = vmul.f32 %v256_v7, %v817_v6 }
 0x11a   :  { %v178_v48 = vpop.xlane.xlu0 %177  ;;  %v1081_v15 = vadd.f32 1e-06, %v184_v39  ;;  %v600_v17 = vpop.eup %599  ;;  %603 = vrsqrt.f32 %v1071_v0  ;;  %v390_v40 = vadd.f32 %v1018_v52, %v373_v3  ;;  %v415_v30 = vsel %vm44_vm0, %v389_v4, 0.0 }
 0x11b   :  { %v192_v10 = vmul.f32 %v178_v48, %v774_v34  ;;  %v382_v58 = vadd.f32 %v1018_v52, %v365_v5  ;;  %v318_v31 = vmul.f32 %v600_v17, %v1022_v36  ;;  %v350_v32 = vmul.f32 %v246_v13, %v820_v1 }
 0x11c   :  { %v602_v11 = vpop.eup %601  ;;  %v349_v62 = vmul.f32 %v236_v46, %v810_v61  ;;  %v331_v2 = vsub.f32 1.5, %v330_v49  ;;  %605 = vrsqrt.f32 %v1081_v15  ;;  %v395_v6 = vsel %vm44_vm0, %v381_v60, 0.0 }
 0x11d   :  { %v1086_v28 = vadd.f32 1e-06, %v192_v10  ;;  %vm333_vm13 = vweird.f32 %v945_v57  ;;  %v319_v18 = vmul.f32 %v600_v17, %v318_v31  ;;  %v308_v33 = vmul.f32 %v602_v11, %v1031_v45 }
 0x11e   :  { %v416_v14 = vadd.f32 %v415_v30, %v414_v21  ;;  %v368_v20 = vmul.f32 %v983_v12, %v351_v23  ;;  %vm334_vm14 = vweird.f32 %v1024_v19  ;;  %v417_v1 = vsel %vm44_vm0, %v390_v40, 0.0 }
 0x11f   :  { %607 = vrsqrt.f32 %v1086_v28  ;;  %v396_v61 = vsel %vm44_vm0, %v382_v58, 0.0  ;;  %v320_v35 = vmul.f32 0.5, %v319_v18  ;;  %v309_v22 = vmul.f32 %v602_v11, %v308_v33  ;;  %vm1109_vm2 = vmor %vm333_vm13, %vm334_vm14 }
 0x120   :  { %v604_v43 = vpop.eup %603  ;;  %v367_v42 = vmul.f32 %v983_v12, %v350_v32  ;;  %v366_v44 = vmul.f32 %v983_v12, %v349_v62  ;;  %v332_v41 = vmul.f32 %v1024_v19, %v331_v2  ;;  %vm323_vm15 = vweird.f32 %v1022_v36 }
 0x121   :  { %v321_v24 = vsub.f32 1.5, %v320_v35  ;;  %vm324_vm3 = vweird.f32 %v600_v17  ;;  %v310_v47 = vmul.f32 0.5, %v309_v22  ;;  %v268_v50 = vmul.f32 %v604_v43, %v1071_v0 }
 0x122   :  { %v606_v51 = vpop.eup %605  ;;  %v397_v54 = vadd.f32 %v396_v61, %v395_v6  ;;  %v1115_v53 = vadd.f32 %v1018_v52, %v368_v20  ;;  %v418_v55 = vadd.f32 %v417_v1, %v416_v14  ;;  %vm314_vm4 = vweird.f32 %v602_v11  ;;  %vm325_vm5 = vmor %vm323_vm15, %vm324_vm3 }
 0x123   :  { %v322_v56 = vmul.f32 %v600_v17, %v321_v24  ;;  %v311_v63 = vsub.f32 1.5, %v310_v47  ;;  %v269_v48 = vmul.f32 %v604_v43, %v268_v50  ;;  %v258_v57 = vmul.f32 %v606_v51, %v1081_v15 }
 0x124   :  { %v384_v16 = vadd.f32 %v1018_v52, %v367_v42  ;;  %v383_v4 = vadd.f32 %v1018_v52, %v366_v44  ;;  %v336_v5 = vsel %vm1109_vm2, %v1024_v19, %v332_v41  ;;  %vm313_vm6 = vweird.f32 %v1031_v45 }
 0x125   :  { %v608_v3 = vpop.eup %607  ;;  %v326_v7 = vsel %vm325_vm5, %v600_v17, %v322_v56  ;;  %v312_v59 = vmul.f32 %v602_v11, %v311_v63  ;;  %v270_v39 = vmul.f32 0.5, %v269_v48  ;;  %v259_v8 = vmul.f32 %v606_v51, %v258_v57  ;;  %vm315_vm7 = vmor %vm313_vm6, %vm314_vm4 }
 0x126   :  { %v358_v49 = vmul.f32 %v326_v7, %v843_v27  ;;  %vm273_vm8 = vweird.f32 %v1071_v0  ;;  %v338_v10 = vmul.f32 %v608_v3, %v1086_v28  ;;  %vm274_vm9 = vweird.f32 %v604_v43 }
 0x127   :  { %v316_v60 = vsel %vm315_vm7, %v602_v11, %v312_v59  ;;  %v271_v19 = vsub.f32 1.5, %v270_v39  ;;  %v260_v13 = vmul.f32 0.5, %v259_v8  ;;  %v398_v36 = vsel %vm44_vm0, %v383_v4, 0.0  ;;  %vm275_vm11 = vmor %vm273_vm8, %vm274_vm9 }
 0x128   :  { %v359_v45 = vmul.f32 %v336_v5, %v840_v26  ;;  %v357_v46 = vmul.f32 %v316_v60, %v827_v9  ;;  %v339_v17 = vmul.f32 %v608_v3, %v338_v10  ;;  %v375_v21 = vmul.f32 %v983_v12, %v358_v49 }
 0x129   :  { %v272_v27 = vmul.f32 %v604_v43, %v271_v19  ;;  %v261_v23 = vsub.f32 1.5, %v260_v13  ;;  %vm264_vm10 = vweird.f32 %v606_v51  ;;  %v400_v40 = vsel %vm44_vm0, %v384_v16, 0.0 }
 0x12a   :  { %v374_v30 = vmul.f32 %v983_v12, %v357_v46  ;;  %v340_v58 = vmul.f32 0.5, %v339_v17  ;;  %v640_v31 = vmov 50.0   ;;  %v399_v11 = vadd.f32 %v398_v36, %v397_v54 }
 0x12b   :  { %609 = vrcp.f32 %v640_v31  ;;  %v276_v26 = vsel %vm275_vm11, %v604_v43, %v272_v27  ;;  %v262_v32 = vmul.f32 %v606_v51, %v261_v23  ;;  %vm263_vm12 = vweird.f32 %v1081_v15 }
 0x12c   :  { %v391_v9 = vadd.f32 %v1018_v52, %v374_v30  ;;  %v353_v62 = vmul.f32 %v276_v26, %v860_v37  ;;  %vm265_vm13 = vmor %vm263_vm12, %vm264_vm10  ;;  %v341_v2 = vsub.f32 1.5, %v340_v58  ;;  %vm344_vm14 = vweird.f32 %v608_v3 }
 0x12d   :  { %v376_v6 = vmul.f32 %v983_v12, %v359_v45  ;;  %v392_v0 = vadd.f32 %v1018_v52, %v375_v21  ;;  %v266_v18 = vsel %vm265_vm13, %v606_v51, %v262_v32  ;;  %vm343_vm15 = vweird.f32 %v1086_v28 }
 0x12e   :  { %v419_v33 = vsel %vm44_vm0, %v391_v9, 0.0  ;;  %v370_v14 = vmul.f32 %v983_v12, %v353_v62  ;;  %v352_v15 = vmul.f32 %v266_v18, %v848_v29  ;;  %v342_v20 = vmul.f32 %v608_v3, %v341_v2  ;;  %vm345_vm2 = vmor %vm343_vm15, %vm344_vm14  ;;  %v570_v62 = vld [vmem:[%s1193_s5 + $0x8] sm:$0xff]  ;;  %v569_v2 = vld [vmem:[%s1193_s5] sm:$0xff] }
 0x12f   :  { %v401_v1 = vadd.f32 %v400_v40, %v399_v11  ;;  %v420_v61 = vadd.f32 %v419_v33, %v418_v55  ;;  %v393_v43 = vadd.f32 %v1018_v52, %v376_v6  ;;  %v421_v42 = vsel %vm44_vm0, %v392_v0, 0.0  ;;  %535 = vmatpush.bf16.msra.mxu0 %v570_v62 }
 0x130   :  { %v369_v35 = vmul.f32 %v983_v12, %v352_v15  ;;  %v346_v22 = vsel %vm345_vm2, %v608_v3, %v342_v20  ;;  %v402_v44 = vsel %vm44_vm0, %v1115_v53, 0.0  ;;  %v387_v41 = vadd.f32 %v1018_v52, %v370_v14 }
 0x131   :  { %v610_v37 = vpop.eup %609  ;;  %v360_v28 = vmul.f32 %v346_v22, %v863_v38  ;;  %v422_v25 = vadd.f32 %v421_v42, %v420_v61  ;;  %v403_v47 = vadd.f32 %v402_v44, %v401_v1  ;;  %v423_v54 = vsel %vm44_vm0, %v393_v43, 0.0 }
 0x132   :  { %v386_v29 = vadd.f32 %v1018_v52, %v369_v35  ;;  %v434_v50 = vmul.f32 50.0, %v610_v37  ;;  %v406_v38 = vsel %vm63_vm1, %v387_v41, 0.0  ;;  %vm438_vm3 = vweird.f32 %v610_v37 }
 0x133   :  { %v377_v24 = vmul.f32 %v983_v12, %v360_v28  ;;  %v424_v63 = vadd.f32 %v423_v54, %v422_v25  ;;  %vm446_vm4 = vcmask 1041409   ;;  %536 = vmatpush.bf16.msra.mxu0 %v569_v2  ;;  %vm542_vm7 = vcmask 74752  }
 0x134   :  { %v404_v51 = vsel %vm44_vm0, %v386_v29, 0.0  ;;  %v435_v57 = vsub.f32 1.0, %v434_v50 }
 0x135   :  { %v394_v55 = vadd.f32 %v1018_v52, %v377_v24  ;;  %v405_v56 = vadd.f32 %v404_v51, %v403_v47 }
 0x136   :  { %v436_v5 = vmul.f32 %v610_v37, %v435_v57 }
 0x137   :  { %v407_v53 = vadd.f32 %v406_v38, %v405_v56  ;;  %v425_v48 = vsel %vm63_vm1, %v394_v55, 0.0  ;;  %v578_v56 = vld [vmem:[%s1194_s6] ss:$0 sm:$0xff] }
 0x138   :  { %v426_v3 = vadd.f32 %v425_v48, %v424_v63  ;;  %v437_v49 = vadd.f32 %v610_v37, %v436_v5 }
 0x139   :  { %v408_v16 = vrot.slane %v407_v53, 4 }
 0x13a   :  { %v427_v4 = vrot.slane %v426_v3, 4  ;;  %v439_v13 = vsel %vm438_vm3, %v610_v37, %v437_v49  ;;  %v576_v37 = vld [vmem:[%s1191_s3] ss:$0 sm:$0xff] }
 0x13b   :  { %v409_v12 = vadd.f32 %v408_v16, %v407_v53 }
 0x13c   :  { %v428_v7 = vadd.f32 %v427_v4, %v426_v3 }
 0x13d   :  { %v410_v59 = vrot.slane %v409_v12, 2 }
 0x13e   :  { %v429_v39 = vrot.slane %v428_v7, 2 }
 0x13f   :  { %v411_v8 = vadd.f32 %v410_v59, %v409_v12 }
 0x140   :  { %v430_v10 = vadd.f32 %v429_v39, %v428_v7 }
 0x141   :  { %v412_v52 = vrot.slane %v411_v8, 1 }
 0x142   :  { %v431_v60 = vrot.slane %v430_v10, 1 }
 0x143   :  { %v413_v19 = vadd.f32 %v412_v52, %v411_v8 }
 0x144   :  { %v432_v36 = vadd.f32 %v431_v60, %v430_v10 }
 0x145   :  { %v440_v45 = vmul.f32 %v439_v13, %v413_v19 }
 0x146   :  { %v441_v46 = vmul.f32 %v439_v13, %v432_v36 }
 0x148   :  { %v447_v17 = vsel %vm446_vm4, %v441_v46, %v440_v45 }
 0x149   :  { %v449_v21 = vsel %vm63_vm1, %v447_v17, 0.0 }
 0x14a   :  { %450 = vadd.xlane.f32.xlu1 %v449_v21 }
 0x1bd   :  { %v451_v27 = vpop.xlane.xlu1 %450 }
 0x1be   :  { %v452_v23 = vmul.f32 %v451_v27, %v774_v34 }
 0x1c0   :  { %v454_v40 = vrot.slane %v452_v23, 1  ;;  %v457_v30 = vsub.f32 %v440_v45, %v452_v23 }
 0x1c2   :  { %v458_v58 = vsub.f32 %v441_v46, %v454_v40  ;;  %v459_v11 = vmul.f32 %v457_v30, %v457_v30 }
 0x1c4   :  { %v460_v31 = vmul.f32 %v458_v58, %v458_v58 }
 0x1c6   :  { %v463_v26 = vrot.slane %v460_v31, 7 }
 0x1c8   :  { %v464_v32 = vsel %vm446_vm4, %v463_v26, %v459_v11 }
 0x1c9   :  { %v466_v9 = vsel %vm63_vm1, %v464_v32, 0.0 }
 0x1ca   :  { %467 = vadd.xlane.f32.xlu2 %v466_v9 }
 0x23d   :  { %v468_v6 = vpop.xlane.xlu2 %467 }
 0x23e   :  { %v469_v0 = vmul.f32 %v468_v6, %v774_v34  ;;  %v577_v34 = vld [vmem:[%s1192_s4] ss:$0 sm:$0xff]  ;;  %s641_s4 = smov [#allocation2]  }
 0x23f   :  { %s549_s15 = sshll.u32 %s641_s4, 4  ;;  %s550_s15 = int_to_ptr.vmem [resolvable:$true] %s549_s15 }
 0x240   :  { %v470_v18 = vadd.f32 1e-06, %v469_v0 }
 0x242   :  { %611 = vrsqrt.f32 %v470_v18  ;;  %vm477_vm5 = vweird.f32 %v470_v18 }
 0x248   :  { %v612_v33 = vpop.eup %611 }
 0x249   :  { %v472_v14 = vmul.f32 %v612_v33, %v470_v18  ;;  %vm478_vm1 = vweird.f32 %v612_v33 }
 0x24a   :  { %vm479_vm6 = vmor %vm477_vm5, %vm478_vm1 }
 0x24b   :  { %v473_v15 = vmul.f32 %v612_v33, %v472_v14 }
 0x24d   :  { %v474_v20 = vmul.f32 0.5, %v473_v15 }
 0x24f   :  { %v475_v1 = vsub.f32 1.5, %v474_v20 }
 0x251   :  { %v476_v61 = vmul.f32 %v612_v33, %v475_v1 }
 0x253   :  { %v480_v35 = vsel %vm479_vm6, %v612_v33, %v476_v61 }
 0x254   :  { %v482_v22 = vrot.slane %v480_v35, 1  ;;  %v485_v43 = vmul.f32 %v480_v35, %v457_v30 }
 0x256   :  { %v486_v42 = vmul.f32 %v482_v22, %v458_v58  ;;  %v490_v28 = vmul.f32 %v576_v37, %v485_v43 }
 0x258   :  { %v491_v44 = vmul.f32 %v576_v37, %v486_v42  ;;  %v495_v41 = vadd.f32 %v577_v34, %v490_v28 }
 0x25a   :  { %v496_v29 = vadd.f32 %v577_v34, %v491_v44  ;;  %v497_v25 = vpack.c.bf16 %v495_v41, %v495_v41 }
 0x25c   :  { %v498_v24 = vpack.c.bf16 %v496_v29, %v496_v29  ;;  %v509_v50 = vunpack.c.l.b16 %v497_v25 }
 0x25e   :  { %v510_v47 = vunpack.c.l.b16 %v498_v24 }
 0x260   :  { %v511_v51 = vrot.slane %v510_v47, 7 }
 0x262   :  { %v512_v54 = vsel %vm446_vm4, %v511_v51, %v509_v50 }
 0x263   :  { %v513_v55 = vpack.c.b16 %v512_v54, %v512_v54 }
 0x265   :  { %568 = vmatmul.msk.bf16.vlgmr.msra.gmra.mxu0 %vm44_vm0, %v513_v55 }
 0x2e2   :  { %v538_v38 = vpop.f32.mrf.mxu0 }
 0x2e3   :  { %v539_v63 = vadd.f32 %v578_v56, %v538_v38 }
 0x2e5   :  { %543 = vst.msk [vmem:[#allocation2] sm:$0x3] %vm542_vm7, %v539_v63 }
 0x2e6   :  { %554 = dma.vmem_to_hbm [thread:$0]  %s550_s15, 32, %s552_s18, [#allocation3]  }
 0x2ea   :  { %v540_v53 = vpop.f32.mrf.mxu0 }
 0x2eb   :  { %637 = dma.done.wait [#allocation3], 32  }
 0x2ec   :  { %638 = vsyncadd [#allocation3], 4294967264 }
 0x2ed   :  { %559 = vsyncpa [#allocation3], 1 }

// kernel: _lambda_.8
= control target key start
LH: loop header
LB: loop body
LE: loop exit
PB: predicated region body
PF: predicated region fallthrough
CT: control target
= control target key end

     0   :  { %s2789_s25 = smov 0   ;;  %s2791_s26 = smov 0   ;;  %s3602_s0 = inlined_call_operand.vmem [shape: f32[2,67,32], index: 0, kind: input, shape index: {}]   ;;  %s3603_s1 = inlined_call_operand.vmem [shape: f32[2,1,32], index: 1, kind: input, shape index: {}]   ;;  %s3604_s2 = inlined_call_operand.vmem [shape: f32[2,1,32], index: 2, kind: input, shape index: {}]   ;;  %s3605_s3 = inlined_call_operand.vmem [shape: bf16[2,32,96], index: 3, kind: input, shape index: {}]   ;;  %s3606_s4 = inlined_call_operand.vmem [shape: f32[2,1,96], index: 4, kind: input, shape index: {}]   ;;  %s3607_s5 = inlined_call_operand.vmem [shape: bf16[2,32,32], index: 5, kind: input, shape index: {}]   ;;  %s3608_s6 = inlined_call_operand.vmem [shape: f32[2,1,32], index: 6, kind: input, shape index: {}]   ;;  %s3609_s7 = inlined_call_operand.vmem [shape: f32[2,1,32], index: 7, kind: input, shape index: {}]   ;;  %s3610_s8 = inlined_call_operand.vmem [shape: f32[2,1,32], index: 8, kind: input, shape index: {}]   ;;  %s3611_s9 = inlined_call_operand.vmem [shape: bf16[2,32,128], index: 9, kind: input, shape index: {}]   ;;  %s3612_s10 = inlined_call_operand.vmem [shape: f32[2,1,128], index: 10, kind: input, shape index: {}]   ;;  %s3613_s11 = inlined_call_operand.vmem [shape: bf16[2,128,32], index: 11, kind: input, shape index: {}]   ;;  %s3614_s12 = inlined_call_operand.vmem [shape: f32[2,1,32], index: 12, kind: input, shape index: {}]   ;;  %s3615_s13 = inlined_call_operand.vmem [shape: f32[2,67,32], index: 13, kind: output, shape index: {}]  }
   0x1   :  { %3620 = sst [smem:[#allocation9_spill]] %s3602_s0  ;;  %s2793_s27 = smov 0  }
   0x2   :  { %3621 = sst [smem:[#allocation10_spill]] %s3603_s1  ;;  %s2795_s28 = smov 0  }
   0x3   :  { %3622 = sst [smem:[#allocation11_spill]] %s3604_s2  ;;  %s2797_s29 = smov 0  }
   0x4   :  { %3623 = sst [smem:[#allocation12_spill]] %s3605_s3 }
   0x5   :  { %3624 = sst [smem:[#allocation13_spill]] %s3607_s5 }
   0x6 LB: > { %3625 = sst [smem:[#allocation3_spill]] %s2693_s25  ;;  %s32_s30 = sadd.s32 1, %s2701_s27  ;;  %s2709_s29 = sphi %s2797_s29, %s23_s29   ;;  %s2705_s28 = sphi %s2795_s28, %s3648_s28   ;;  %s2701_s27 = sphi %s2793_s27, %s3647_s27   ;;  %s2697_s26 = sphi %s2791_s26, %s3646_s26   ;;  %s2693_s25 = sphi %s2789_s25, %s3645_s25  }
   0x7   : > { %3626 = sst [smem:[#allocation4_spill]] %s2701_s27  ;;  %s35_s14 = sadd.s32 1, %s2705_s28 }
   0x8   : > { %3627 = sst [smem:[#allocation5_spill]] %s2705_s28  ;;  %p33_p0 = scmp.ge.s32.totalorder %s32_s30, 2 }
   0x9   : > { %3628 = sst [smem:[#allocation6_spill]] %s2709_s29  ;;  %p2354_p1 = scmp.ge.s32.totalorder %s2709_s29, 1 }
   0xa   : > { %p503_p2 = scmp.lt.s32.totalorder %s2709_s29, 5  ;;  %s3650_s30 = smov (%p33_p0, %s32_s30), 0 }
   0xb   : > { %3629 = sst [smem:[#allocation7_spill]] %s3650_s30  ;;  %s3652_s14 = smov (!%p33_p0, %s35_s14), %s2705_s28 }
   0xc   : > { %p504_p3 = pnand %p2354_p1, %p503_p2  ;;  %p37_p4 = scmp.ge.s32.totalorder %s3652_s14, 2 }
   0xd   : > { %p591_p5 = scmp.lt.s32.totalorder (!%p504_p3), %s2697_s26, 1  ;;  %p596_p6 = scmp.lt.s32.totalorder (!%p504_p3), %s2693_s25, 1 }
   0xe   : > { %s3654_s14 = smov (%p37_p4, %s3652_s14), 0  ;;  %507 = sbr.rel (%p504_p3) target bundleno = 2270 (0x8de), region = 72 }
   0xf   : > { %3630 = sst [smem:[#allocation8_spill]] %s3654_s14 }
  0x10   : > { %s3633_s0 = sld [smem:[#allocation9_spill]] (!%p504_p3) }
  0x11   : > { %s3634_s3 = sld [smem:[#allocation12_spill]] (!%p504_p3) }
  0x12   : > { %s3635_s5 = sld [smem:[#allocation13_spill]] (!%p504_p3) }
  0x13   : > { %s3656_s26 = smov (!%p591_p5, %s2697_s26), 1 }
  0x14   : > { %s2823_s15 = scalar_select %p596_p6, %s2693_s25, 1 }
  0x15   : > { %s2477_s16 = smul.u32 72, %s3656_s26 }
  0x16   : > { %s2459_s30 = sshll.u32 %s2823_s15, 4  ;;  %s631_s17 = scalar_lea.vmem %s3612_s10, %s2823_s15 }
  0x17   : > { %s2836_s14 = scalar_lea.vmem %s3633_s0, %s2477_s16  ;;  %s2842_s29 = scalar_lea.vmem %s3634_s3, %s2459_s30 }
  0x18   : > { %s2851_s20 = scalar_lea.vmem %s3635_s5, %s2459_s30  ;;  %s623_s3 = scalar_lea.vmem %s3610_s8, %s2823_s15 }
  0x19   : > { %s2868_s26 = scalar_lea.vmem %s3611_s9, %s2459_s30  ;;  %s2462_s5 = sshll.u32 %s2823_s15, 6 }
  0x1a   : > { %s639_s23 = scalar_lea.vmem %s3614_s12, %s2823_s15  ;;  %s2882_s2 = scalar_lea.vmem %s3613_s11, %s2462_s5 }
  0x1b   : > { %s2887_s1 = scalar_lea.vmem %s3615_s13, %s2477_s16  ;;  %s3636_s30 = sld [smem:[#allocation3_spill]] }
  0x21   : > { %p2365_p7 = scmp.ne.s32.totalorder %s3636_s30, 0 }
  0x23   : > { %649 = sbr.rel (%p2365_p7) target bundleno = 50 (0x32), region = 76 }
  0x28   : > { %v650_v0 = vld [vmem:[%s2836_s14] sm:$0xff]  ;;  %vm659_vm0 = vcmask 261120   ;;  %v651_v1 = vld [vmem:[%s2836_s14 + $0x8] sm:$0xff]  ;;  %v652_v2 = vld [vmem:[%s2836_s14 + $0x10] sm:$0xff]  ;;  %vm668_vm1 = vcmask 256000  }
  0x29   : > { %660 = vst.msk [vmem:[%s2887_s1] sm:$0xff] %vm659_vm0, %v650_v0  ;;  %v653_v3 = vld [vmem:[%s2836_s14 + $0x18] sm:$0xff]  ;;  %v654_v4 = vld [vmem:[%s2836_s14 + $0x20] sm:$0xff]  ;;  %v655_v5 = vld [vmem:[%s2836_s14 + $0x28] sm:$0xff] }
  0x2a   : > { %661 = vst.msk [vmem:[%s2887_s1 + $0x8] sm:$0xff] %vm659_vm0, %v651_v1  ;;  %v656_v6 = vld [vmem:[%s2836_s14 + $0x30] sm:$0xff]  ;;  %v657_v7 = vld [vmem:[%s2836_s14 + $0x38] sm:$0xff]  ;;  %v658_v8 = vld [vmem:[%s2836_s14 + $0x40] sm:$0x7] }
  0x2b   : > { %662 = vst.msk [vmem:[%s2887_s1 + $0x10] sm:$0xff] %vm659_vm0, %v652_v2 }
  0x2c   : > { %663 = vst.msk [vmem:[%s2887_s1 + $0x18] sm:$0xff] %vm659_vm0, %v653_v3 }
  0x2d   : > { %664 = vst.msk [vmem:[%s2887_s1 + $0x20] sm:$0xff] %vm659_vm0, %v654_v4 }
  0x2e   : > { %665 = vst.msk [vmem:[%s2887_s1 + $0x28] sm:$0xff] %vm659_vm0, %v655_v5 }
  0x2f   : > { %666 = vst.msk [vmem:[%s2887_s1 + $0x30] sm:$0xff] %vm659_vm0, %v656_v6 }
  0x30   : > { %667 = vst.msk [vmem:[%s2887_s1 + $0x38] sm:$0xff] %vm659_vm0, %v657_v7 }
  0x31   : > { %669 = vst.msk [vmem:[%s2887_s1 + $0x40] sm:$0x7] %vm668_vm1, %v658_v8 }
  0x32 PF: > { %v672_v9 = vld [vmem:[%s2887_s1 + $0x10] sm:$0xff]  ;;  %vm681_vm2 = vcmask 261120   ;;  %v670_v10 = vld [vmem:[%s2887_s1] sm:$0xff]  ;;  %v671_v16 = vld [vmem:[%s2887_s1 + $0x8] sm:$0xff]  ;;  %v2711_v23 = vmov 32.0   ;;  %vm706_vm4 = vcmask 256000   ;;  %s3641_s24 = scalar_lea.vmem %s3606_s4, %s2823_s15  ;;  %s3642_s25 = scalar_lea.vmem %s3608_s6, %s2823_s15 }
  0x33   : > { %v688_v12 = vsel %vm681_vm2, %v672_v9, 0.0  ;;  %v682_v13 = vsel %vm681_vm2, %v670_v10, 0.0  ;;  %v673_v15 = vld [vmem:[%s2887_s1 + $0x18] sm:$0xff]  ;;  %v685_v19 = vsel %vm681_vm2, %v671_v16, 0.0  ;;  %2534 = vrcp.f32 %v2711_v23  ;;  %v2464_v6 = vld [vmem:[%s2842_s29 + $0x8] sm:$0xff]  ;;  %s3637_s14 = sld [smem:[#allocation10_spill]] }
  0x34   : > { %v2919_v11 = vld [vmem:[%s2887_s1 + $0x20] sm:$0xff]  ;;  %689 = vadd.xlane.f32.xlu1 %v688_v12  ;;  %683 = vadd.xlane.f32.xlu0 %v682_v13  ;;  %v691_v18 = vsel %vm681_vm2, %v673_v15, 0.0  ;;  %s3639_s18 = sld [smem:[#allocation11_spill]]  ;;  %s2712_s27 = smov 80  }
  0x35   : > { %v694_v14 = vsel %vm681_vm2, %v2919_v11, 0.0  ;;  %v675_v17 = vld [vmem:[%s2887_s1 + $0x28] sm:$0xff]  ;;  %958 = vmatpush.bf16.msra.mxu0 %v2464_v6  ;;  %s2713_s28 = smov 96   ;;  %s2714_s30 = smov 112  }
  0x36   : > { %695 = vadd.xlane.f32.xlu2 %v694_v14  ;;  %v697_v20 = vsel %vm681_vm2, %v675_v17, 0.0  ;;  %v676_v21 = vld [vmem:[%s2887_s1 + $0x30] sm:$0xff]  ;;  %s2715_s5 = smov 48  }
  0x37   : > { %v700_v22 = vsel %vm681_vm2, %v676_v21, 0.0  ;;  %v677_v44 = vld [vmem:[%s2887_s1 + $0x38] sm:$0xff] }
  0x38   : > { %v703_v49 = vsel %vm681_vm2, %v677_v44, 0.0  ;;  %v678_v58 = vld [vmem:[%s2887_s1 + $0x40] sm:$0x7] }
  0x39   : > { %v2535_v24 = vpop.eup %2534  ;;  %v707_v62 = vsel %vm706_vm4, %v678_v58, 0.0  ;;  %s3638_s16 = scalar_lea.vmem %s3637_s14, %s2823_s15  ;;  %s2718_s14 = smov 16  }
  0x3a   : > { %v711_v25 = vmul.f32 32.0, %v2535_v24  ;;  %vm715_vm3 = vweird.f32 %v2535_v24  ;;  %s3640_s22 = scalar_lea.vmem %s3639_s18, %s2823_s15  ;;  %s3643_s18 = scalar_lea.vmem %s3609_s7, %s2823_s15 }
  0x3c   : > { %692 = vadd.xlane.f32.xlu1 %v691_v18  ;;  %686 = vadd.xlane.f32.xlu0 %v685_v19  ;;  %v712_v26 = vsub.f32 1.0, %v711_v25 }
  0x3e   : > { %698 = vadd.xlane.f32.xlu2 %v697_v20  ;;  %v713_v27 = vmul.f32 %v2535_v24, %v712_v26 }
  0x40   : > { %v714_v28 = vadd.f32 %v2535_v24, %v713_v27 }
  0x42   : > { %v2933_v29 = vsel %vm715_vm3, %v2535_v24, %v714_v28 }
  0x46   : > { %701 = vadd.xlane.f32.xlu2 %v700_v22 }
  0xa7   : > { %v690_v30 = vpop.xlane.xlu1 %689  ;;  %v684_v31 = vpop.xlane.xlu0 %683 }
  0xa8   : > { %v717_v32 = vmul.f32 %v2933_v29, %v684_v31  ;;  %v719_v42 = vmul.f32 %v2933_v29, %v690_v30 }
  0xa9   : > { %v696_v33 = vpop.xlane.xlu2 %695 }
  0xaa   : > { %v2936_v34 = vsub.f32 %v670_v10, %v717_v32  ;;  %v2957_v51 = vsub.f32 %v672_v9, %v719_v42  ;;  %v721_v56 = vmul.f32 %v2933_v29, %v696_v33  ;;  %v2463_v9 = vld [vmem:[%s2842_s29] sm:$0xff]  ;;  %s2717_s29 = smov 64  }
  0xab   : > { %959 = vmatpush.bf16.msra.mxu0 %v2463_v9 }
  0xac   : > { %v735_v35 = vmul.f32 %v2936_v34, %v2936_v34  ;;  %v737_v59 = vmul.f32 %v2957_v51, %v2957_v51  ;;  %v2973_v63 = vsub.f32 %v2919_v11, %v721_v56 }
  0xae   : > { %v744_v36 = vsel %vm681_vm2, %v735_v35, 0.0  ;;  %v750_v0 = vsel %vm681_vm2, %v737_v59, 0.0  ;;  %v739_v2 = vmul.f32 %v2973_v63, %v2973_v63 }
  0xaf   : > { %v693_v37 = vpop.xlane.xlu1 %692  ;;  %745 = vadd.xlane.f32.xlu0 %v744_v36  ;;  %v687_v38 = vpop.xlane.xlu0 %686 }
  0xb0   : > { %v720_v39 = vmul.f32 %v2933_v29, %v693_v37  ;;  %v718_v40 = vmul.f32 %v2933_v29, %v687_v38  ;;  %v756_v4 = vsel %vm681_vm2, %v739_v2, 0.0 }
  0xb1   : > { %v699_v41 = vpop.xlane.xlu2 %698 }
  0xb2   : > { %v722_v43 = vmul.f32 %v2933_v29, %v699_v41  ;;  %v2946_v45 = vsub.f32 %v673_v15, %v720_v39  ;;  %v2948_v46 = vsub.f32 %v671_v16, %v718_v40 }
  0xb4   : > { %v2950_v47 = vsub.f32 %v675_v17, %v722_v43  ;;  %v738_v48 = vmul.f32 %v2946_v45, %v2946_v45  ;;  %v736_v50 = vmul.f32 %v2948_v46, %v2948_v46 }
  0xb6   : > { %v753_v52 = vsel %vm681_vm2, %v738_v48, 0.0  ;;  %v747_v53 = vsel %vm681_vm2, %v736_v50, 0.0  ;;  %v740_v55 = vmul.f32 %v2950_v47, %v2950_v47 }
  0xb7   : > { %754 = vadd.xlane.f32.xlu2 %v753_v52  ;;  %704 = vadd.xlane.f32.xlu0 %v703_v49 }
  0xb8   : > { %748 = vadd.xlane.f32.xlu1 %v747_v53  ;;  %v759_v61 = vsel %vm681_vm2, %v740_v55, 0.0 }
  0xb9   : > { %v702_v54 = vpop.xlane.xlu2 %701 }
  0xba   : > { %v723_v57 = vmul.f32 %v2933_v29, %v702_v54 }
  0xbc   : > { %v2968_v60 = vsub.f32 %v676_v21, %v723_v57 }
  0xbe   : > { %v741_v1 = vmul.f32 %v2968_v60, %v2968_v60 }
  0xbf   : > { %760 = vadd.xlane.f32.xlu2 %v759_v61  ;;  %708 = vadd.xlane.f32.xlu0 %v707_v62 }
  0xc0   : > { %751 = vadd.xlane.f32.xlu1 %v750_v0  ;;  %v762_v3 = vsel %vm681_vm2, %v741_v1, 0.0 }
  0xc7   : > { %763 = vadd.xlane.f32.xlu0 %v762_v3  ;;  %v3028_v3 = vld [vmem:[%s3640_s22] ss:$0 sm:$0xff] }
  0xc8   : > { %757 = vadd.xlane.f32.xlu1 %v756_v4 }
 0x122   : > { %v746_v5 = vpop.xlane.xlu0 %745 }
 0x123   : > { %v771_v7 = vmul.f32 %v746_v5, %v2933_v29 }
 0x125   : > { %v780_v8 = vadd.f32 1e-06, %v771_v7 }
 0x127   : > { %2536 = vrsqrt.f32 %v780_v8  ;;  %vm795_vm6 = vweird.f32 %v780_v8 }
 0x12a   : > { %v755_v10 = vpop.xlane.xlu2 %754  ;;  %v705_v11 = vpop.xlane.xlu0 %704 }
 0x12b   : > { %v774_v12 = vmul.f32 %v755_v10, %v2933_v29  ;;  %v749_v13 = vpop.xlane.xlu1 %748  ;;  %v724_v14 = vmul.f32 %v2933_v29, %v705_v11 }
 0x12c   : > { %v772_v15 = vmul.f32 %v749_v13, %v2933_v29 }
 0x12d   : > { %v2537_v16 = vpop.eup %2536  ;;  %v2988_v17 = vadd.f32 1e-06, %v774_v12  ;;  %v2990_v18 = vsub.f32 %v677_v44, %v724_v14 }
 0x12e   : > { %v790_v19 = vmul.f32 %v2537_v16, %v780_v8  ;;  %v781_v20 = vadd.f32 1e-06, %v772_v15  ;;  %vm796_vm5 = vweird.f32 %v2537_v16 }
 0x12f   : > { %2538 = vrsqrt.f32 %v2988_v17  ;;  %v742_v21 = vmul.f32 %v2990_v18, %v2990_v18  ;;  %vm797_vm7 = vmor %vm795_vm6, %vm796_vm5  ;;  %vm825_vm13 = vweird.f32 %v2988_v17 }
 0x130   : > { %v791_v22 = vmul.f32 %v2537_v16, %v790_v19  ;;  %2540 = vrsqrt.f32 %v781_v20  ;;  %vm805_vm8 = vweird.f32 %v781_v20 }
 0x131   : > { %v765_v23 = vsel %vm681_vm2, %v742_v21, 0.0 }
 0x132   : > { %v792_v24 = vmul.f32 0.5, %v791_v22  ;;  %766 = vadd.xlane.f32.xlu1 %v765_v23  ;;  %v709_v25 = vpop.xlane.xlu0 %708  ;;  %v761_v26 = vpop.xlane.xlu2 %760 }
 0x133   : > { %v752_v27 = vpop.xlane.xlu1 %751  ;;  %v725_v28 = vmul.f32 %v2933_v29, %v709_v25  ;;  %v776_v36 = vmul.f32 %v761_v26, %v2933_v29 }
 0x134   : > { %v793_v30 = vsub.f32 1.5, %v792_v24  ;;  %v773_v31 = vmul.f32 %v752_v27, %v2933_v29 }
 0x135   : > { %v2998_v32 = vpop.eup %2538  ;;  %v3000_v33 = vsub.f32 %v678_v58, %v725_v28  ;;  %v3007_v43 = vadd.f32 1e-06, %v776_v36  ;;  %v3019_v58 = vld [vmem:[%s3638_s16] ss:$0 sm:$0xff] }
 0x136   : > { %v2541_v35 = vpop.eup %2540  ;;  %v782_v37 = vadd.f32 1e-06, %v773_v31  ;;  %v794_v38 = vmul.f32 %v2537_v16, %v793_v30  ;;  %v820_v39 = vmul.f32 %v2998_v32, %v2988_v17  ;;  %vm826_vm14 = vweird.f32 %v2998_v32 }
 0x137   : > { %v800_v40 = vmul.f32 %v2541_v35, %v781_v20  ;;  %v743_v42 = vmul.f32 %v3000_v33, %v3000_v33  ;;  %vm806_vm9 = vweird.f32 %v2541_v35  ;;  %vm827_vm0 = vmor %vm825_vm13, %vm826_vm14  ;;  %vm845_vm5 = vweird.f32 %v3007_v43 }
 0x138   : > { %2542 = vrsqrt.f32 %v782_v37  ;;  %v798_v44 = vsel %vm797_vm7, %v2537_v16, %v794_v38  ;;  %v821_v48 = vmul.f32 %v2998_v32, %v820_v39  ;;  %vm807_vm10 = vmor %vm805_vm8, %vm806_vm9  ;;  %vm815_vm11 = vweird.f32 %v782_v37 }
 0x139   : > { %v801_v41 = vmul.f32 %v2541_v35, %v800_v40  ;;  %v768_v52 = vsel %vm706_vm4, %v743_v42, 0.0  ;;  %v879_v56 = vmul.f32 %v798_v44, %v2936_v34  ;;  %2544 = vrsqrt.f32 %v3007_v43 }
 0x13a   : > { %769 = vadd.xlane.f32.xlu2 %v768_v52  ;;  %v822_v59 = vmul.f32 0.5, %v821_v48  ;;  %v764_v44 = vpop.xlane.xlu0 %763 }
 0x13b   : > { %v802_v49 = vmul.f32 0.5, %v801_v41  ;;  %v758_v50 = vpop.xlane.xlu1 %757  ;;  %v891_v34 = vmul.f32 %v3019_v58, %v879_v56  ;;  %v777_v48 = vmul.f32 %v764_v44, %v2933_v29 }
 0x13c   : > { %v775_v53 = vmul.f32 %v758_v50, %v2933_v29  ;;  %v823_v4 = vsub.f32 1.5, %v822_v59 }
 0x13d   : > { %v803_v54 = vsub.f32 1.5, %v802_v49  ;;  %v903_v9 = vadd.f32 %v3028_v3, %v891_v34  ;;  %v786_v49 = vadd.f32 1e-06, %v777_v48 }
 0x13e   : > { %v2543_v55 = vpop.eup %2542  ;;  %v784_v57 = vadd.f32 1e-06, %v775_v53  ;;  %v824_v11 = vmul.f32 %v2998_v32, %v823_v4 }
 0x13f   : > { %v804_v61 = vmul.f32 %v2541_v35, %v803_v54  ;;  %v810_v62 = vmul.f32 %v2543_v55, %v782_v37  ;;  %vm816_vm12 = vweird.f32 %v2543_v55  ;;  %v2545_v6 = vpop.eup %2544  ;;  %vm855_vm9 = vweird.f32 %v786_v49 }
 0x140   : > { %2546 = vrsqrt.f32 %v784_v57  ;;  %vm817_vm15 = vmor %vm815_vm11, %vm816_vm12  ;;  %v840_v12 = vmul.f32 %v2545_v6, %v3007_v43  ;;  %v828_v17 = vsel %vm827_vm0, %v2998_v32, %v824_v11  ;;  %vm835_vm1 = vweird.f32 %v784_v57 }
 0x141   : > { %v808_v0 = vsel %vm807_vm10, %v2541_v35, %v804_v61  ;;  %v811_v1 = vmul.f32 %v2543_v55, %v810_v62  ;;  %v882_v23 = vmul.f32 %v828_v17, %v2946_v45  ;;  %vm846_vm6 = vweird.f32 %v2545_v6 }
 0x142   : > { %v880_v2 = vmul.f32 %v808_v0, %v2948_v46  ;;  %v841_v20 = vmul.f32 %v2545_v6, %v840_v12  ;;  %vm847_vm8 = vmor %vm845_vm5, %vm846_vm6  ;;  %2548 = vrsqrt.f32 %v786_v49  ;;  %vm1213_vm5 = vcmask 1040384  }
 0x143   : > { %v812_v5 = vmul.f32 0.5, %v811_v1  ;;  %v894_v27 = vmul.f32 %v3019_v58, %v882_v23  ;;  %vm1214_vm6 = vcmask 1041408  }
 0x144   : > { %v892_v7 = vmul.f32 %v3019_v58, %v880_v2  ;;  %v842_v24 = vmul.f32 0.5, %v841_v20 }
 0x145   : > { %v813_v46 = vsub.f32 1.5, %v812_v5 }
 0x146   : > { %v2547_v8 = vpop.eup %2546  ;;  %v904_v10 = vadd.f32 %v3028_v3, %v892_v7  ;;  %v843_v28 = vsub.f32 1.5, %v842_v24 }
 0x147   : > { %v814_v13 = vmul.f32 %v2543_v55, %v813_v46  ;;  %v830_v14 = vmul.f32 %v2547_v8, %v784_v57  ;;  %vm836_vm3 = vweird.f32 %v2547_v8 }
 0x148   : > { %v912_v15 = vpack.c.bf16 %v904_v10, %v903_v9  ;;  %vm837_vm7 = vmor %vm835_vm1, %vm836_vm3  ;;  %v844_v32 = vmul.f32 %v2545_v6, %v843_v28  ;;  %v2549_v50 = vpop.eup %2548  ;;  %vm1005_vm3 = vcmask 130048  }
 0x149   : > { %v818_v16 = vsel %vm817_vm15, %v2543_v55, %v814_v13  ;;  %v831_v19 = vmul.f32 %v2547_v8, %v830_v14  ;;  %vm856_vm10 = vweird.f32 %v2549_v50 }
 0x14a   : > { %2374 = vmatmul.msk.bf16.vlgmr.msra.gmra.mxu0 %vm681_vm2, %v912_v15  ;;  %v881_v21 = vmul.f32 %v818_v16, %v2957_v51  ;;  %v906_v51 = vadd.f32 %v3028_v3, %v894_v27  ;;  %v848_v36 = vsel %vm847_vm8, %v2545_v6, %v844_v32  ;;  %vm857_vm11 = vmor %vm855_vm9, %vm856_vm10  ;;  %v2528_v27 = vld [vmem:[%s3641_s24] ss:$0 sm:$0xff]  ;;  %vm1103_vm8 = vcmask 542720  }
 0x14b   : > { %v832_v22 = vmul.f32 0.5, %v831_v19  ;;  %v884_v38 = vmul.f32 %v848_v36, %v2950_v47  ;;  %vm1560_vm9 = vcmask 261248   ;;  %vm1261_vm10 = vcmask 124928  }
 0x14c   : > { %v893_v25 = vmul.f32 %v3019_v58, %v881_v21 }
 0x14d   : > { %v833_v26 = vsub.f32 1.5, %v832_v22  ;;  %v896_v40 = vmul.f32 %v3019_v58, %v884_v38 }
 0x14e   : > { %v905_v30 = vadd.f32 %v3028_v3, %v893_v25 }
 0x14f   : > { %v834_v31 = vmul.f32 %v2547_v8, %v833_v26  ;;  %v908_v42 = vadd.f32 %v3028_v3, %v896_v40 }
 0x150   : > { %v913_v45 = vpack.c.bf16 %v906_v51, %v905_v30 }
 0x151   : > { %v838_v35 = vsel %vm837_vm7, %v2547_v8, %v834_v31  ;;  %vm1078_vm7 = vcmask 547840  }
 0x152   : > { %v883_v37 = vmul.f32 %v838_v35, %v2973_v63  ;;  %v850_v63 = vmul.f32 %v2549_v50, %v786_v49 }
 0x154   : > { %v895_v39 = vmul.f32 %v3019_v58, %v883_v37  ;;  %v851_v52 = vmul.f32 %v2549_v50, %v850_v63 }
 0x156   : > { %v907_v41 = vadd.f32 %v3028_v3, %v895_v39  ;;  %v852_v55 = vmul.f32 0.5, %v851_v52 }
 0x158   : > { %v914_v43 = vpack.c.bf16 %v908_v42, %v907_v41  ;;  %v853_v56 = vsub.f32 1.5, %v852_v55 }
 0x15a   : > { %2375 = vmatmul.msk.bf16.gmra.mxu0 %vm681_vm2, %v913_v45  ;;  %v854_v62 = vmul.f32 %v2549_v50, %v853_v56 }
 0x15c   : > { %v858_v34 = vsel %vm857_vm11, %v2549_v50, %v854_v62  ;;  %vm1569_vm11 = vcmask 256128  }
 0x15d   : > { %v885_v6 = vmul.f32 %v858_v34, %v2968_v60 }
 0x15f   : > { %v897_v11 = vmul.f32 %v3019_v58, %v885_v6 }
 0x161   : > { %v909_v15 = vadd.f32 %v3028_v3, %v897_v11 }
 0x16a   : > { %2376 = vmatmul.msk.bf16.gmra.mxu0 %vm681_vm2, %v914_v43 }
 0x1a5   : > { %v767_v47 = vpop.xlane.xlu1 %766 }
 0x1a6   : > { %v778_v53 = vmul.f32 %v767_v47, %v2933_v29 }
 0x1a8   : > { %v787_v54 = vadd.f32 1e-06, %v778_v53 }
 0x1aa   : > { %2550 = vrsqrt.f32 %v787_v54  ;;  %vm865_vm13 = vweird.f32 %v787_v54 }
 0x1ad   : > { %v770_v57 = vpop.xlane.xlu2 %769 }
 0x1ae   : > { %v779_v61 = vmul.f32 %v770_v57, %v2933_v29 }
 0x1b0   : > { %v2551_v59 = vpop.eup %2550  ;;  %v788_v1 = vadd.f32 1e-06, %v779_v61 }
 0x1b1   : > { %v860_v0 = vmul.f32 %v2551_v59, %v787_v54  ;;  %vm866_vm12 = vweird.f32 %v2551_v59 }
 0x1b2   : > { %2552 = vrsqrt.f32 %v788_v1  ;;  %vm867_vm14 = vmor %vm865_vm13, %vm866_vm12  ;;  %vm875_vm15 = vweird.f32 %v788_v1 }
 0x1b3   : > { %v861_v2 = vmul.f32 %v2551_v59, %v860_v0 }
 0x1b5   : > { %v862_v4 = vmul.f32 0.5, %v861_v2 }
 0x1b7   : > { %v863_v5 = vsub.f32 1.5, %v862_v4 }
 0x1b8   : > { %v2553_v46 = vpop.eup %2552 }
 0x1b9   : > { %v864_v7 = vmul.f32 %v2551_v59, %v863_v5  ;;  %v870_v9 = vmul.f32 %v2553_v46, %v788_v1  ;;  %vm876_vm0 = vweird.f32 %v2553_v46 }
 0x1ba   : > { %vm877_vm1 = vmor %vm875_vm15, %vm876_vm0 }
 0x1bb   : > { %v868_v8 = vsel %vm867_vm14, %v2551_v59, %v864_v7  ;;  %v871_v12 = vmul.f32 %v2553_v46, %v870_v9 }
 0x1bc   : > { %v886_v10 = vmul.f32 %v868_v8, %v2990_v18  ;;  %v2716_v8 = vmov 65535  }
 0x1bd   : > { %v872_v14 = vmul.f32 0.5, %v871_v12  ;;  %v1215_v9 = vsel %vm1213_vm5, 4294967295, %v2716_v8 }
 0x1be   : > { %v898_v13 = vmul.f32 %v3019_v58, %v886_v10  ;;  %v3111_v10 = vsel %vm1214_vm6, %v1215_v9, 0 }
 0x1bf   : > { %v873_v19 = vsub.f32 1.5, %v872_v14 }
 0x1c0   : > { %v910_v16 = vadd.f32 %v3028_v3, %v898_v13 }
 0x1c1   : > { %v874_v17 = vmul.f32 %v2553_v46, %v873_v19 }
 0x1c2   : > { %v915_v60 = vpack.c.bf16 %v910_v16, %v909_v15 }
 0x1c3   : > { %v878_v18 = vsel %vm877_vm1, %v2553_v46, %v874_v17 }
 0x1c4   : > { %2377 = vmatmul.msk.bf16.gmra.mxu0 %vm681_vm2, %v915_v60  ;;  %v887_v20 = vmul.f32 %v878_v18, %v3000_v33 }
 0x1c6   : > { %v899_v22 = vmul.f32 %v3019_v58, %v887_v20 }
 0x1c7   : > { %v961_v21 = vpop.f32.mrf.mxu0 }
 0x1c8   : > { %v911_v23 = vadd.f32 %v3028_v3, %v899_v22  ;;  %v962_v36 = vadd.f32 %v2528_v27, %v961_v21 }
 0x1ca   : > { %v916_v25 = vpack.c.bf16 %v911_v23, %v911_v23 }
 0x1cf   : > { %v963_v24 = vpop.f32.mrf.mxu0 }
 0x1d0   : > { %v964_v35 = vadd.f32 %v2528_v27, %v963_v24 }
 0x1d2   : > { %v3078_v37 = vpack.c.bf16 %v964_v35, %v962_v36 }
 0x1d4   : > { %2378 = vmatmul.msk.bf16.gmra.mxu0 %vm681_vm2, %v916_v25 }
 0x1d7   : > { %v966_v26 = vpop.f32.mrf.mxu0 }
 0x1d8   : > { %v967_v30 = vadd.f32 %v2528_v27, %v966_v26 }
 0x1df   : > { %v968_v28 = vpop.f32.mrf.mxu0 }
 0x1e0   : > { %v969_v31 = vadd.f32 %v2528_v27, %v968_v28 }
 0x1e2   : > { %v3073_v51 = vpack.c.bf16 %v969_v31, %v967_v30 }
 0x1e7   : > { %v971_v33 = vpop.f32.mrf.mxu0 }
 0x1e8   : > { %v972_v58 = vadd.f32 %v2528_v27, %v971_v33 }
 0x1ef   : > { %v973_v32 = vpop.f32.mrf.mxu0 }
 0x1f0   : > { %v974_v45 = vadd.f32 %v2528_v27, %v973_v32 }
 0x1f2   : > { %v3075_v3 = vpack.c.bf16 %v974_v45, %v972_v58 }
 0x1f4   : > { %1277 = vrot.lane.b32.xlu2 %v3075_v3, %s2712_s27 }
 0x1fc   : > { %1273 = vrot.lane.b32.xlu2 %v3078_v37, %s2712_s27 }
 0x241   : > { %v976_v38 = vpop.f32.mrf.mxu0 }
 0x242   : > { %v977_v40 = vadd.f32 %v2528_v27, %v976_v38 }
 0x249   : > { %v978_v39 = vpop.f32.mrf.mxu0 }
 0x24a   : > { %v979_v41 = vadd.f32 %v2528_v27, %v978_v39 }
 0x24c   : > { %v3081_v42 = vpack.c.bf16 %v979_v41, %v977_v40 }
 0x24e   : > { %1001 = vrot.lane.b32.xlu2 %v3081_v42, %s2713_s28  ;;  %1279 = vrot.lane.b32.xlu1 %v3081_v42, %s2712_s27  ;;  %v1278_v50 = vpop.permute.xlu2 %1277 }
 0x24f   : > { %v1305_v2 = vsel %vm1005_vm3, %v1278_v50, 0 }
 0x251   : > { %v981_v43 = vpop.f32.mrf.mxu0 }
 0x252   : > { %v982_v44 = vadd.f32 %v2528_v27, %v981_v43 }
 0x254   : > { %v3085_v48 = vpack.c.bf16 %v982_v44, %v982_v44 }
 0x256   : > { %1281 = vrot.lane.b32.xlu0 %v3085_v48, %s2712_s27  ;;  %997 = vrot.lane.b32.xlu2 %v3073_v51, %s2713_s28  ;;  %v1274_v52 = vpop.permute.xlu2 %1273 }
 0x257   : > { %1003 = vrot.lane.b32.xlu1 %v3085_v48, %s2713_s28  ;;  %v1299_v13 = vsel %vm1005_vm3, %v1274_v52, 0 }
 0x259   : > { %v983_v49 = vpop.f32.mrf.mxu0 }
 0x25e   : > { %1275 = vrot.lane.b32.xlu0 %v3073_v51, %s2712_s27  ;;  %1269 = vrot.lane.b32.xlu2 %v3081_v42, %s2714_s30 }
 0x25f   : > { %999 = vrot.lane.b32.xlu1 %v3075_v3, %s2713_s28 }
 0x266   : > { %1263 = vrot.lane.b32.xlu0 %v3078_v37, %s2714_s30  ;;  %1463 = vrot.lane.b32.xlu2 %v3075_v3, %s2715_s5 }
 0x267   : > { %995 = vrot.lane.b32.xlu1 %v3078_v37, %s2713_s28 }
 0x26e   : > { %1265 = vrot.lane.b32.xlu0 %v3073_v51, %s2714_s30 }
 0x26f   : > { %1271 = vrot.lane.b32.xlu1 %v3085_v48, %s2714_s30 }
 0x276   : > { %1267 = vrot.lane.b32.xlu0 %v3075_v3, %s2714_s30 }
 0x277   : > { %1467 = vrot.lane.b32.xlu1 %v3085_v48, %s2715_s5 }
 0x27e   : > { %1465 = vrot.lane.b32.xlu0 %v3081_v42, %s2715_s5 }
 0x286   : > { %1461 = vrot.lane.b32.xlu0 %v3073_v51, %s2715_s5 }
 0x28e   : > { %1459 = vrot.lane.b32.xlu0 %v3078_v37, %s2715_s5 }
 0x2a8   : > { %v1002_v56 = vpop.permute.xlu2 %1001 }
 0x2a9   : > { %v1031_v62 = vsel %vm1005_vm3, %v1002_v56, 0 }
 0x2b0   : > { %v998_v4 = vpop.permute.xlu2 %997 }
 0x2b1   : > { %v1025_v46 = vsel %vm1005_vm3, %v998_v4, 0 }
 0x2b8   : > { %v1270_v14 = vpop.permute.xlu2 %1269 }
 0x2c0   : > { %v1280_v63 = vpop.permute.xlu1 %1279  ;;  %v1464_v60 = vpop.permute.xlu2 %1463 }
 0x2c1   : > { %v1308_v61 = vsel %vm1005_vm3, %v1280_v63, 0 }
 0x2c8   : > { %v1282_v47 = vpop.permute.xlu0 %1281 }
 0x2c9   : > { %v1004_v53 = vpop.permute.xlu1 %1003  ;;  %v1311_v54 = vsel %vm1005_vm3, %v1282_v47, 0 }
 0x2ca   : > { %v1034_v55 = vsel %vm1005_vm3, %v1004_v53, 0  ;;  %1316 = vmatpush.bf16.xpose.msra.mxu3 %v1311_v54 }
 0x2cb   : > { %1039 = vmatpush.bf16.xpose.msra.mxu1 %v1034_v55 }
 0x2d0   : > { %v1276_v57 = vpop.permute.xlu0 %1275 }
 0x2d1   : > { %v1000_v59 = vpop.permute.xlu1 %999  ;;  %v1302_v7 = vsel %vm1005_vm3, %v1276_v57, 0 }
 0x2d2   : > { %1317 = vmatpush.bf16.xpose.msra.mxu3 %v1308_v61  ;;  %v1028_v34 = vsel %vm1005_vm3, %v1000_v59, 0 }
 0x2d3   : > { %1040 = vmatpush.bf16.xpose.msra.mxu1 %v1031_v62 }
 0x2d8   : > { %v1264_v0 = vpop.permute.xlu0 %1263 }
 0x2d9   : > { %v996_v1 = vpop.permute.xlu1 %995 }
 0x2da   : > { %1318 = vmatpush.bf16.xpose.msra.mxu3 %v1305_v2  ;;  %v1022_v16 = vsel %vm1005_vm3, %v996_v1, 0 }
 0x2db   : > { %1041 = vmatpush.bf16.xpose.msra.mxu1 %v1028_v34 }
 0x2e0   : > { %v1266_v5 = vpop.permute.xlu0 %1265 }
 0x2e1   : > { %v1272_v6 = vpop.permute.xlu1 %1271 }
 0x2e2   : > { %1319 = vmatpush.bf16.xpose.msra.mxu3 %v1302_v7 }
 0x2e3   : > { %1042 = vmatpush.bf16.xpose.msra.mxu1 %v1025_v46 }
 0x2e8   : > { %v1268_v11 = vpop.permute.xlu0 %1267 }
 0x2e9   : > { %v1468_v12 = vpop.permute.xlu1 %1467 }
 0x2ea   : > { %v1489_v15 = vand.u32 %v1468_v12, %v3111_v10  ;;  %1320 = vmatpush.bf16.xpose.msra.mxu3 %v1299_v13 }
 0x2eb   : > { %1043 = vmatpush.bf16.xpose.msra.mxu1 %v1022_v16 }
 0x2ec   : > { %1494 = vmatpush.bf16.msrb.mxu0 %v1489_v15 }
 0x2f0   : > { %v1466_v19 = vpop.permute.xlu0 %1465 }
 0x2f1   : > { %2389 = vmatmul.msk.bf16.vlgmr.msra.gmra.mxu3 %vm1005_vm3, %v1264_v0  ;;  %1495 = vmatpush.bf16.msrb.mxu0 %v1466_v19 }
 0x2f2   : > { %2379 = vmatmul.msk.bf16.vlgmr.msra.gmra.mxu1 %vm1005_vm3, %v3078_v37 }
 0x2f5   : > { %1496 = vmatpush.bf16.msrb.mxu0 %v1464_v60 }
 0x2f8   : > { %v1462_v17 = vpop.permute.xlu0 %1461 }
 0x2f9   : > { %1497 = vmatpush.bf16.msrb.mxu0 %v1462_v17 }
 0x300   : > { %v1460_v18 = vpop.permute.xlu0 %1459 }
 0x301   : > { %2390 = vmatmul.msk.bf16.gmra.mxu3 %vm1005_vm3, %v1266_v5  ;;  %1498 = vmatpush.bf16.msrb.mxu0 %v1460_v18 }
 0x302   : > { %2380 = vmatmul.msk.bf16.gmra.mxu1 %vm1005_vm3, %v3073_v51 }
 0x311   : > { %2391 = vmatmul.msk.bf16.gmra.mxu3 %vm1005_vm3, %v1268_v11 }
 0x312   : > { %2381 = vmatmul.msk.bf16.gmra.mxu1 %vm1005_vm3, %v3075_v3 }
 0x321   : > { %2392 = vmatmul.msk.bf16.gmra.mxu3 %vm1005_vm3, %v1270_v14 }
 0x322   : > { %2382 = vmatmul.msk.bf16.gmra.mxu1 %vm1005_vm3, %v3081_v42 }
 0x331   : > { %2393 = vmatmul.msk.bf16.gmra.mxu3 %vm1005_vm3, %v1272_v6 }
 0x332   : > { %2383 = vmatmul.msk.bf16.gmra.mxu1 %vm1005_vm3, %v3085_v48 }
 0x36f   : > { %v1045_v20 = vpop.f32.mrf.mxu1 }
 0x370   : > { %v3131_v21 = vmul.f32 0.25, %v1045_v20 }
 0x372   : > { %v1079_v22 = vsel %vm1078_vm7, %v3131_v21, -inf }
 0x373   : > { %1080 = vmax.xlane.f32.xlu2 %v1079_v22 }
 0x374   : > { %v1322_v23 = vpop.f32.mrf.mxu3 }
 0x375   : > { %v3135_v24 = vmul.f32 0.25, %v1322_v23 }
 0x377   : > { %v1047_v25 = vpop.f32.mrf.mxu1  ;;  %v1355_v26 = vsel %vm1078_vm7, %v3135_v24, -inf }
 0x378   : > { %v3139_v27 = vmul.f32 0.25, %v1047_v25  ;;  %1356 = vmax.xlane.f32.xlu0 %v1355_v26 }
 0x37a   : > { %v1082_v28 = vsel %vm1078_vm7, %v3139_v27, -inf }
 0x37b   : > { %1083 = vmax.xlane.f32.xlu1 %v1082_v28 }
 0x37c   : > { %v1324_v30 = vpop.f32.mrf.mxu3 }
 0x37d   : > { %v3143_v31 = vmul.f32 0.25, %v1324_v30 }
 0x37f   : > { %v1050_v33 = vpop.f32.mrf.mxu1  ;;  %v1358_v32 = vsel %vm1078_vm7, %v3143_v31, -inf }
 0x380   : > { %v3147_v58 = vmul.f32 0.25, %v1050_v33  ;;  %1359 = vmax.xlane.f32.xlu2 %v1358_v32 }
 0x382   : > { %v1085_v45 = vsel %vm1078_vm7, %v3147_v58, -inf }
 0x383   : > { %1086 = vmax.xlane.f32.xlu0 %v1085_v45 }
 0x384   : > { %v1327_v35 = vpop.f32.mrf.mxu3 }
 0x385   : > { %v3151_v36 = vmul.f32 0.25, %v1327_v35 }
 0x387   : > { %v1052_v38 = vpop.f32.mrf.mxu1  ;;  %v1361_v39 = vsel %vm1078_vm7, %v3151_v36, -inf }
 0x388   : > { %v3155_v40 = vmul.f32 0.25, %v1052_v38  ;;  %1362 = vmax.xlane.f32.xlu1 %v1361_v39 }
 0x38a   : > { %v1088_v41 = vsel %vm1078_vm7, %v3155_v40, -inf }
 0x38b   : > { %1089 = vmax.xlane.f32.xlu2 %v1088_v41 }
 0x38c   : > { %v1329_v43 = vpop.f32.mrf.mxu3 }
 0x38d   : > { %v3159_v44 = vmul.f32 0.25, %v1329_v43 }
 0x38f   : > { %v1055_v49 = vpop.f32.mrf.mxu1  ;;  %v1364_v50 = vsel %vm1078_vm7, %v3159_v44, -inf }
 0x390   : > { %v3163_v63 = vmul.f32 0.25, %v1055_v49  ;;  %1365 = vmax.xlane.f32.xlu0 %v1364_v50 }
 0x392   : > { %v1091_v52 = vsel %vm1078_vm7, %v3163_v63, -inf }
 0x393   : > { %1092 = vmax.xlane.f32.xlu2 %v1091_v52 }
 0x394   : > { %v1332_v47 = vpop.f32.mrf.mxu3 }
 0x395   : > { %v3167_v53 = vmul.f32 0.25, %v1332_v47 }
 0x397   : > { %v1057_v54 = vpop.f32.mrf.mxu1  ;;  %v1367_v55 = vsel %vm1078_vm7, %v3167_v53, -inf }
 0x398   : > { %1368 = vmax.xlane.f32.xlu0 %v1367_v55  ;;  %v3171_v56 = vmul.f32 0.25, %v1057_v54 }
 0x39a   : > { %v1094_v0 = vsel %vm1078_vm7, %v3171_v56, -inf }
 0x39c   : > { %v1334_v57 = vpop.f32.mrf.mxu3 }
 0x39d   : > { %v3173_v59 = vmul.f32 0.25, %v1334_v57 }
 0x39f   : > { %v1060_v61 = vpop.f32.mrf.mxu1  ;;  %v1370_v62 = vsel %vm1078_vm7, %v3173_v59, -inf }
 0x3a0   : > { %1371 = vmax.xlane.f32.xlu2 %v1370_v62  ;;  %1095 = vmax.xlane.f32.xlu0 %v1094_v0  ;;  %v3208_v33 = vmul.f32 0.25, %v1060_v61 }
 0x3a2   : > { %v1097_v41 = vsel %vm1078_vm7, %v3208_v33, -inf }
 0x3a4   : > { %v1337_v1 = vpop.f32.mrf.mxu3 }
 0x3a5   : > { %v3179_v2 = vmul.f32 0.25, %v1337_v1 }
 0x3a7   : > { %v1062_v34 = vpop.f32.mrf.mxu1  ;;  %v1373_v4 = vsel %vm1078_vm7, %v3179_v2, -inf }
 0x3a8   : > { %1374 = vmax.xlane.f32.xlu0 %v1373_v4  ;;  %v3183_v5 = vmul.f32 0.25, %v1062_v34 }
 0x3aa   : > { %v1100_v9 = vsel %vm1078_vm7, %v3183_v5, -inf }
 0x3ac   : > { %v1339_v6 = vpop.f32.mrf.mxu3 }
 0x3ad   : > { %v3185_v7 = vmul.f32 0.25, %v1339_v6 }
 0x3af   : > { %v3187_v46 = vpop.f32.mrf.mxu1  ;;  %v1376_v8 = vsel %vm1078_vm7, %v3185_v7, -inf }
 0x3b0   : > { %1377 = vmax.xlane.f32.xlu2 %v1376_v8  ;;  %1101 = vmax.xlane.f32.xlu0 %v1100_v9 }
 0x3b4   : > { %v1342_v11 = vpop.f32.mrf.mxu3 }
 0x3b7   : > { %v1067_v12 = vpop.f32.mrf.mxu1 }
 0x3bc   : > { %v1344_v13 = vpop.f32.mrf.mxu3 }
 0x3e6   : > { %v1081_v14 = vpop.xlane.xlu2 %1080 }
 0x3e7   : > { %v1107_v15 = vsub.f32 %v3131_v21, %v1081_v14  ;;  %v3202_v21 = vmul.f32 0.25, %v1342_v11 }
 0x3e9   : > { %v1116_v16 = vmul.f32 1.442695, %v1107_v15  ;;  %v1379_v30 = vsel %vm1103_vm8, %v3202_v21, -inf }
 0x3eb   : > { %2554 = vpow2.f32 %v1116_v16  ;;  %v1357_v19 = vpop.xlane.xlu0 %1356 }
 0x3ec   : > { %v1382_v60 = vsub.f32 %v3135_v24, %v1357_v19 }
 0x3ee   : > { %v1391_v17 = vmul.f32 1.442695, %v1382_v60  ;;  %v1084_v22 = vpop.xlane.xlu1 %1083 }
 0x3f0   : > { %2556 = vpow2.f32 %v1391_v17 }
 0x3f1   : > { %v3195_v18 = vpop.eup %2554 }
 0x3f2   : > { %v1134_v20 = vsel %vm1078_vm7, %v3195_v18, 0.0 }
 0x3f3   : > { %1135 = vadd.xlane.f32.xlu0 %v1134_v20  ;;  %v1360_v23 = vpop.xlane.xlu2 %1359 }
 0x3f4   : > { %v1383_v25 = vsub.f32 %v3143_v31, %v1360_v23 }
 0x3f6   : > { %v3200_v26 = vpop.eup %2556  ;;  %v1393_v28 = vmul.f32 1.442695, %v1383_v25  ;;  %v1087_v32 = vpop.xlane.xlu0 %1086 }
 0x3f7   : > { %v1409_v24 = vsel %vm1078_vm7, %v3200_v26, 0.0 }
 0x3f8   : > { %2558 = vpow2.f32 %v1393_v28  ;;  %1410 = vadd.xlane.f32.xlu2 %v1409_v24 }
 0x3fb   : > { %1380 = vmax.xlane.f32.xlu0 %v1379_v30  ;;  %v1363_v45 = vpop.xlane.xlu1 %1362 }
 0x3fc   : > { %v1384_v31 = vsub.f32 %v3151_v36, %v1363_v45 }
 0x3fe   : > { %v3211_v35 = vpop.eup %2558  ;;  %v1395_v38 = vmul.f32 1.442695, %v1384_v31  ;;  %v1090_v43 = vpop.xlane.xlu2 %1089 }
 0x3ff   : > { %v1412_v39 = vsel %vm1078_vm7, %v3211_v35, 0.0  ;;  %v1110_v13 = vsub.f32 %v3155_v40, %v1090_v43 }
 0x400   : > { %2560 = vpow2.f32 %v1395_v38  ;;  %1413 = vadd.xlane.f32.xlu1 %v1412_v39  ;;  %1098 = vmax.xlane.f32.xlu2 %v1097_v41 }
 0x403   : > { %v1366_v49 = vpop.xlane.xlu0 %1365 }
 0x404   : > { %v1385_v50 = vsub.f32 %v3159_v44, %v1366_v49 }
 0x406   : > { %v3218_v52 = vpop.eup %2560  ;;  %v1397_v47 = vmul.f32 1.442695, %v1385_v50  ;;  %v1093_v54 = vpop.xlane.xlu2 %1092 }
 0x407   : > { %v1415_v36 = vsel %vm1078_vm7, %v3218_v52, 0.0  ;;  %v1111_v60 = vsub.f32 %v3163_v63, %v1093_v54 }
 0x408   : > { %2562 = vpow2.f32 %v1397_v47  ;;  %1416 = vadd.xlane.f32.xlu1 %v1415_v36  ;;  %v3281_v36 = vmul.f32 0.25, %v3187_v46 }
 0x40b   : > { %v1369_v55 = vpop.xlane.xlu0 %1368 }
 0x40c   : > { %v1386_v57 = vsub.f32 %v3167_v53, %v1369_v55 }
 0x40e   : > { %v3223_v61 = vpop.eup %2562  ;;  %v1399_v62 = vmul.f32 1.442695, %v1386_v57 }
 0x40f   : > { %v1418_v0 = vsel %vm1078_vm7, %v3223_v61, 0.0 }
 0x410   : > { %2564 = vpow2.f32 %v1399_v62  ;;  %1419 = vadd.xlane.f32.xlu1 %v1418_v0  ;;  %v1104_v0 = vsel %vm1103_vm8, %v3281_v36, -inf }
 0x413   : > { %v1372_v44 = vpop.xlane.xlu2 %1371  ;;  %v1096_v9 = vpop.xlane.xlu0 %1095 }
 0x414   : > { %v1387_v1 = vsub.f32 %v3173_v59, %v1372_v44  ;;  %v1109_v59 = vsub.f32 %v3147_v58, %v1087_v32  ;;  %v1112_v28 = vsub.f32 %v3171_v56, %v1096_v9 }
 0x416   : > { %v3228_v34 = vpop.eup %2564  ;;  %v1401_v4 = vmul.f32 1.442695, %v1387_v1  ;;  %v1120_v11 = vmul.f32 1.442695, %v1109_v59  ;;  %v1126_v24 = vmul.f32 1.442695, %v1112_v28 }
 0x417   : > { %v1421_v6 = vsel %vm1078_vm7, %v3228_v34, 0.0 }
 0x418   : > { %2566 = vpow2.f32 %v1401_v4  ;;  %1190 = vrot.lane.b32.xlu2 %v3081_v42, %s2717_s29  ;;  %1422 = vadd.xlane.f32.xlu0 %v1421_v6  ;;  %v1108_v42 = vsub.f32 %v3139_v27, %v1084_v22  ;;  %v1124_v22 = vmul.f32 1.442695, %v1111_v60 }
 0x419   : > { %2568 = vpow2.f32 %v1120_v11 }
 0x41a   : > { %v1118_v12 = vmul.f32 1.442695, %v1108_v42 }
 0x41b   : > { %v1375_v14 = vpop.xlane.xlu0 %1374 }
 0x41c   : > { %2570 = vpow2.f32 %v1118_v12 }
 0x41e   : > { %v3233_v53 = vpop.eup %2566 }
 0x41f   : > { %v1424_v8 = vsel %vm1078_vm7, %v3233_v53, 0.0  ;;  %v3245_v15 = vpop.eup %2568 }
 0x420   : > { %1188 = vrot.lane.b32.xlu2 %v3075_v3, %s2717_s29  ;;  %1425 = vadd.xlane.f32.xlu0 %v1424_v8  ;;  %v1388_v3 = vsub.f32 %v3179_v2, %v1375_v14  ;;  %v1140_v58 = vsel %vm1078_vm7, %v3245_v15, 0.0 }
 0x422   : > { %v3247_v16 = vpop.eup %2570 }
 0x423   : > { %v1137_v40 = vsel %vm1078_vm7, %v3247_v16, 0.0  ;;  %v1102_v25 = vpop.xlane.xlu0 %1101 }
 0x424   : > { %v1114_v39 = vsub.f32 %v3183_v5, %v1102_v25 }
 0x426   : > { %v1130_v47 = vmul.f32 1.442695, %v1114_v39 }
 0x428   : > { %1186 = vrot.lane.b32.xlu2 %v3073_v51, %s2717_s29  ;;  %v1122_v51 = vmul.f32 1.442695, %v1110_v13 }
 0x429   : > { %1192 = vrot.lane.b32.xlu1 %v3085_v48, %s2717_s29  ;;  %v1378_v48 = vpop.xlane.xlu2 %1377 }
 0x42a   : > { %2572 = vpow2.f32 %v1122_v51  ;;  %v1389_v27 = vsub.f32 %v3185_v7, %v1378_v48 }
 0x42c   : > { %v1405_v2 = vmul.f32 1.442695, %v1389_v27 }
 0x430   : > { %v3254_v19 = vpop.eup %2572 }
 0x431   : > { %v1143_v20 = vsel %vm1078_vm7, %v3254_v19, 0.0 }
 0x434   : > { %1184 = vrot.lane.b32.xlu0 %v3078_v37, %s2717_s29  ;;  %v1403_v37 = vmul.f32 1.442695, %v1388_v3 }
 0x436   : > { %2574 = vpow2.f32 %v1403_v37 }
 0x437   : > { %2576 = vpow2.f32 %v1405_v2 }
 0x438   : > { %2578 = vpow2.f32 %v1124_v22 }
 0x439   : > { %2580 = vpow2.f32 %v1126_v24 }
 0x43c   : > { %v3257_v17 = vpop.eup %2574 }
 0x43d   : > { %v1427_v7 = vsel %vm1078_vm7, %v3257_v17, 0.0  ;;  %v3263_v23 = vpop.eup %2576 }
 0x43e   : > { %v1430_v63 = vsel %vm1078_vm7, %v3263_v23, 0.0  ;;  %v3268_v30 = vpop.eup %2578 }
 0x43f   : > { %v1146_v45 = vsel %vm1078_vm7, %v3268_v30, 0.0  ;;  %v3274_v38 = vpop.eup %2580 }
 0x440   : > { %v1149_v41 = vsel %vm1078_vm7, %v3274_v38, 0.0 }
 0x451   : > { %1141 = vadd.xlane.f32.xlu2 %v1140_v58 }
 0x453   : > { %1138 = vadd.xlane.f32.xlu1 %v1137_v40 }
 0x45b   : > { %1144 = vadd.xlane.f32.xlu1 %v1143_v20 }
 0x45e   : > { %1428 = vadd.xlane.f32.xlu0 %v1427_v7 }
 0x463   : > { %1431 = vadd.xlane.f32.xlu1 %v1430_v63 }
 0x466   : > { %v3270_v32 = vpop.xlane.xlu0 %1135 }
 0x46b   : > { %v1411_v31 = vpop.xlane.xlu2 %1410  ;;  %1147 = vadd.xlane.f32.xlu1 %v1146_v45 }
 0x46c   : > { %2582 = vrcp.f32 %v1411_v31 }
 0x46e   : > { %v1381_v56 = vpop.xlane.xlu0 %1380 }
 0x46f   : > { %v1390_v54 = vsub.f32 %v3202_v21, %v1381_v56 }
 0x471   : > { %v1407_v62 = vmul.f32 1.442695, %v1390_v54 }
 0x472   : > { %v2583_v57 = vpop.eup %2582 }
 0x473   : > { %v1099_v43 = vpop.xlane.xlu2 %1098  ;;  %1150 = vadd.xlane.f32.xlu1 %v1149_v41  ;;  %v1414_v49 = vpop.xlane.xlu1 %1413  ;;  %v1445_v44 = vmul.f32 %v2583_v57, %v3200_v26 }
 0x474   : > { %v1113_v50 = vsub.f32 %v3208_v33, %v1099_v43  ;;  %2584 = vrcp.f32 %v1414_v49 }
 0x476   : > { %v1128_v55 = vmul.f32 1.442695, %v1113_v50 }
 0x478   : > { %2586 = vpow2.f32 %v1128_v55 }
 0x479   : > { %2588 = vpow2.f32 %v1130_v47 }
 0x47a   : > { %v2585_v5 = vpop.eup %2584  ;;  %2590 = vpow2.f32 %v1407_v62 }
 0x47b   : > { %v1446_v33 = vmul.f32 %v2585_v5, %v3211_v35  ;;  %1105 = vmax.xlane.f32.xlu1 %v1104_v0  ;;  %v1417_v1 = vpop.xlane.xlu1 %1416  ;;  %v1191_v51 = vpop.permute.xlu2 %1190 }
 0x47c   : > { %2592 = vrcp.f32 %v1417_v1 }
 0x47d   : > { %v1454_v4 = vpack.c.bf16 %v1446_v33, %v1445_v44 }
 0x47e   : > { %v3288_v46 = vpop.eup %2586 }
 0x47f   : > { %v3290_v21 = vpop.eup %2588  ;;  %2394 = vmatmul.msk.bf16.vlgmr.msrb.gmra.mxu0 %vm1078_vm7, %v1454_v4  ;;  %v1152_v6 = vsel %vm1078_vm7, %v3288_v46, 0.0 }
 0x480   : > { %1153 = vadd.xlane.f32.xlu2 %v1152_v6  ;;  %v1155_v26 = vsel %vm1078_vm7, %v3290_v21, 0.0  ;;  %v3297_v8 = vpop.eup %2590 }
 0x481   : > { %v1433_v59 = vsel %vm1103_vm8, %v3297_v8, 0.0 }
 0x482   : > { %v2593_v9 = vpop.eup %2592 }
 0x483   : > { %1156 = vadd.xlane.f32.xlu1 %v1155_v26  ;;  %v1420_v35 = vpop.xlane.xlu1 %1419  ;;  %v1447_v12 = vmul.f32 %v2593_v9, %v3218_v52  ;;  %v1189_v52 = vpop.permute.xlu2 %1188 }
 0x484   : > { %2594 = vrcp.f32 %v1420_v35 }
 0x488   : > { %1434 = vadd.xlane.f32.xlu2 %v1433_v59 }
 0x48a   : > { %v2595_v42 = vpop.eup %2594 }
 0x48b   : > { %v1423_v11 = vpop.xlane.xlu0 %1422  ;;  %v1448_v13 = vmul.f32 %v2595_v42, %v3223_v61  ;;  %v1187_v61 = vpop.permute.xlu2 %1186 }
 0x48c   : > { %2596 = vrcp.f32 %v1423_v11 }
 0x48d   : > { %v1455_v14 = vpack.c.bf16 %v1448_v13, %v1447_v12  ;;  %v2466_v12 = vld [vmem:[%s2851_s20 + $0x8] sm:$0xff] }
 0x48f   : > { %2395 = vmatmul.msk.bf16.gmra.mxu0 %vm1078_vm7, %v1455_v14 }
 0x492   : > { %v2597_v48 = vpop.eup %2596 }
 0x493   : > { %v1426_v3 = vpop.xlane.xlu0 %1425  ;;  %v1449_v27 = vmul.f32 %v2597_v48, %v3228_v34 }
 0x494   : > { %2598 = vrcp.f32 %v1426_v3 }
 0x495   : > { %2600 = vrcp.f32 %v3270_v32 }
 0x49a   : > { %v2599_v37 = vpop.eup %2598 }
 0x49b   : > { %v1193_v58 = vpop.permute.xlu1 %1192  ;;  %v1450_v40 = vmul.f32 %v2599_v37, %v3233_v53  ;;  %v2601_v34 = vpop.eup %2600 }
 0x49c   : > { %v1218_v2 = vand.u32 %v3111_v10, %v1193_v58  ;;  %v1170_v10 = vmul.f32 %v2601_v34, %v3195_v18 }
 0x49d   : > { %v1456_v60 = vpack.c.bf16 %v1450_v40, %v1449_v27 }
 0x49e   : > { %1223 = vmatpush.bf16.msra.mxu2 %v1218_v2 }
 0x49f   : > { %2396 = vmatmul.msk.bf16.gmra.mxu0 %vm1078_vm7, %v1456_v60 }
 0x4a2   : > { %1224 = vmatpush.bf16.msra.mxu2 %v1191_v51 }
 0x4a6   : > { %1225 = vmatpush.bf16.msra.mxu2 %v1189_v52  ;;  %v1185_v20 = vpop.permute.xlu0 %1184 }
 0x4aa   : > { %1226 = vmatpush.bf16.msra.mxu2 %v1187_v61 }
 0x4ae   : > { %1227 = vmatpush.bf16.msra.mxu2 %v1185_v20 }
 0x4b2   : > { %1626 = vmatpush.bf16.msrb.mxu2 %v2466_v12 }
 0x4c4   : > { %v1142_v63 = vpop.xlane.xlu2 %1141 }
 0x4c6   : > { %v1139_v22 = vpop.xlane.xlu1 %1138 }
 0x4c7   : > { %2602 = vrcp.f32 %v1139_v22 }
 0x4cd   : > { %v2603_v7 = vpop.eup %2602 }
 0x4ce   : > { %v1145_v53 = vpop.xlane.xlu1 %1144  ;;  %v1171_v25 = vmul.f32 %v2603_v7, %v3247_v16 }
 0x4cf   : > { %2604 = vrcp.f32 %v1145_v53 }
 0x4d0   : > { %v1179_v28 = vpack.c.bf16 %v1171_v25, %v1170_v10  ;;  %2606 = vrcp.f32 %v1142_v63 }
 0x4d1   : > { %v1429_v24 = vpop.xlane.xlu0 %1428 }
 0x4d2   : > { %2384 = vmatmul.msk.bf16.vlgmr.msra.gmra.mxu2 %vm1078_vm7, %v1179_v28  ;;  %2608 = vrcp.f32 %v1429_v24 }
 0x4d5   : > { %v2605_v32 = vpop.eup %2604 }
 0x4d6   : > { %v1432_v45 = vpop.xlane.xlu1 %1431  ;;  %v2607_v31 = vpop.eup %2606  ;;  %v1173_v56 = vmul.f32 %v2605_v32, %v3254_v19 }
 0x4d7   : > { %2610 = vrcp.f32 %v1432_v45  ;;  %v1172_v18 = vmul.f32 %v2607_v31, %v3245_v15 }
 0x4d8   : > { %v2609_v39 = vpop.eup %2608 }
 0x4d9   : > { %v1451_v16 = vmul.f32 %v2609_v39, %v3257_v17  ;;  %v1180_v50 = vpack.c.bf16 %v1173_v56, %v1172_v18 }
 0x4dd   : > { %v2611_v41 = vpop.eup %2610 }
 0x4de   : > { %v1148_v43 = vpop.xlane.xlu1 %1147  ;;  %v1452_v49 = vmul.f32 %v2611_v41, %v3263_v23 }
 0x4df   : > { %2612 = vrcp.f32 %v1148_v43 }
 0x4e0   : > { %v1457_v47 = vpack.c.bf16 %v1452_v49, %v1451_v16 }
 0x4e2   : > { %2385 = vmatmul.msk.bf16.gmra.mxu2 %vm1078_vm7, %v1180_v50  ;;  %2397 = vmatmul.msk.bf16.gmra.mxu0 %vm1078_vm7, %v1457_v47 }
 0x4e5   : > { %v2613_v55 = vpop.eup %2612 }
 0x4e6   : > { %v1151_v54 = vpop.xlane.xlu1 %1150  ;;  %v1174_v5 = vmul.f32 %v2613_v55, %v3268_v30 }
 0x4e7   : > { %2614 = vrcp.f32 %v1151_v54 }
 0x4ed   : > { %v2615_v57 = vpop.eup %2614 }
 0x4ee   : > { %v1106_v19 = vpop.xlane.xlu1 %1105  ;;  %v1175_v15 = vmul.f32 %v2615_v57, %v3274_v38 }
 0x4ef   : > { %v1115_v17 = vsub.f32 %v3281_v36, %v1106_v19 }
 0x4f0   : > { %v1181_v62 = vpack.c.bf16 %v1175_v15, %v1174_v5 }
 0x4f1   : > { %v1132_v23 = vmul.f32 1.442695, %v1115_v17 }
 0x4f2   : > { %2386 = vmatmul.msk.bf16.gmra.mxu2 %vm1078_vm7, %v1181_v62 }
 0x4f3   : > { %2616 = vpow2.f32 %v1132_v23  ;;  %v1154_v0 = vpop.xlane.xlu2 %1153  ;;  %v2529_v23 = vld [vmem:[%s3642_s25] ss:$0 sm:$0xff] }
 0x4f4   : > { %2618 = vrcp.f32 %v1154_v0 }
 0x4f6   : > { %v1157_v44 = vpop.xlane.xlu1 %1156 }
 0x4f7   : > { %2620 = vrcp.f32 %v1157_v44 }
 0x4f9   : > { %v2617_v33 = vpop.eup %2616 }
 0x4fa   : > { %v1158_v1 = vsel %vm1103_vm8, %v2617_v33, 0.0  ;;  %v2619_v4 = vpop.eup %2618 }
 0x4fb   : > { %v1435_v6 = vpop.xlane.xlu2 %1434  ;;  %1159 = vadd.xlane.f32.xlu1 %v1158_v1  ;;  %v1176_v36 = vmul.f32 %v2619_v4, %v3288_v46 }
 0x4fc   : > { %2622 = vrcp.f32 %v1435_v6  ;;  %v1500_v30 = vpop.f32.mrf.mxu0 }
 0x4fd   : > { %v2621_v38 = vpop.eup %2620  ;;  %1533 = vrot.lane.b32.xlu0 %v1500_v30, %s2718_s14 }
 0x4fe   : > { %v1177_v26 = vmul.f32 %v2621_v38, %v3290_v21  ;;  %v2663_v38 = vld [vmem:[%s2887_s1 + $0x8] sm:$0xff] }
 0x500   : > { %v1182_v35 = vpack.c.bf16 %v1177_v26, %v1176_v36 }
 0x502   : > { %v2623_v59 = vpop.eup %2622  ;;  %2387 = vmatmul.msk.bf16.gmra.mxu2 %vm1078_vm7, %v1182_v35 }
 0x503   : > { %v1453_v9 = vmul.f32 %v2623_v59, %v3297_v8  ;;  %v2465_v8 = vld [vmem:[%s2851_s20] sm:$0xff] }
 0x504   : > { %v1502_v42 = vpop.f32.mrf.mxu0  ;;  %1627 = vmatpush.bf16.msrb.mxu2 %v2465_v8 }
 0x505   : > { %1535 = vrot.lane.b32.xlu2 %v1502_v42, %s2718_s14  ;;  %v1458_v11 = vpack.c.bf16 %v1453_v9, %v1453_v9  ;;  %v2664_v9 = vld [vmem:[%s2887_s1 + $0x10] sm:$0xff] }
 0x507   : > { %2398 = vmatmul.msk.bf16.gmra.mxu0 %vm1078_vm7, %v1458_v11 }
 0x50c   : > { %v1505_v13 = vpop.f32.mrf.mxu0 }
 0x514   : > { %v1507_v14 = vpop.f32.mrf.mxu0  ;;  %1537 = vrot.lane.b32.xlu1 %v1505_v13, %s2718_s14 }
 0x515   : > { %1539 = vrot.lane.b32.xlu0 %v1507_v14, %s2718_s14  ;;  %v2665_v14 = vld [vmem:[%s2887_s1 + $0x18] sm:$0xff] }
 0x51c   : > { %v1510_v46 = vpop.f32.mrf.mxu0 }
 0x51d   : > { %1541 = vrot.lane.b32.xlu2 %v1510_v46, %s2718_s14 }
 0x524   : > { %v1512_v21 = vpop.f32.mrf.mxu0 }
 0x525   : > { %1543 = vrot.lane.b32.xlu0 %v1512_v21, %s2718_s14 }
 0x555   : > { %v1229_v3 = vpop.f32.mrf.mxu2 }
 0x556   : > { %1253 = vst.msk [vmem:[#allocation2] sm:$0xff] %vm1005_vm3, %v1229_v3 }
 0x55d   : > { %v1231_v51 = vpop.f32.mrf.mxu2 }
 0x55e   : > { %1254 = vst.msk [vmem:[#allocation2 + $0x8] sm:$0xff] %vm1005_vm3, %v1231_v51  ;;  %v2666_v51 = vld [vmem:[%s2887_s1 + $0x20] sm:$0xff] }
 0x55f   : > { %v1536_v48 = vpop.permute.xlu2 %1535  ;;  %v1515_v37 = vpop.f32.mrf.mxu0 }
 0x560   : > { %1562 = vst.msk [vmem:[#allocation2 + $0x8] sm:$0xff] %vm1560_vm9, %v1536_v48  ;;  %1545 = vrot.lane.b32.xlu1 %v1515_v37, %s2718_s14 }
 0x565   : > { %v1234_v58 = vpop.f32.mrf.mxu2 }
 0x566   : > { %1255 = vst.msk [vmem:[#allocation2 + $0x10] sm:$0xff] %vm1005_vm3, %v1234_v58 }
 0x567   : > { %v1517_v27 = vpop.f32.mrf.mxu0  ;;  %v1572_v24 = vld [vmem:[#allocation2 + $0x8] sm:$0xff] }
 0x568   : > { %1547 = vrot.lane.b32.xlu2 %v1517_v27, %s2718_s14 }
 0x56d   : > { %v1236_v40 = vpop.f32.mrf.mxu2 }
 0x56e   : > { %1256 = vst.msk [vmem:[#allocation2 + $0x18] sm:$0xff] %vm1005_vm3, %v1236_v40  ;;  %v1160_v2 = vpop.xlane.xlu1 %1159  ;;  %v2667_v40 = vld [vmem:[%s2887_s1 + $0x28] sm:$0xff] }
 0x56f   : > { %2624 = vrcp.f32 %v1160_v2  ;;  %v1534_v60 = vpop.permute.xlu0 %1533 }
 0x570   : > { %1561 = vst.msk [vmem:[#allocation2] sm:$0xff] %vm1560_vm9, %v1534_v60 }
 0x575   : > { %v2625_v52 = vpop.eup %2624  ;;  %v1239_v61 = vpop.f32.mrf.mxu2 }
 0x576   : > { %1257 = vst.msk [vmem:[#allocation2 + $0x20] sm:$0xff] %vm1005_vm3, %v1239_v61  ;;  %v1178_v20 = vmul.f32 %v2625_v52, %v2617_v33  ;;  %v2662_v33 = vld [vmem:[%s2887_s1] sm:$0xff] }
 0x577   : > { %v1542_v22 = vpop.permute.xlu2 %1541  ;;  %v1571_v25 = vld [vmem:[#allocation2] sm:$0xff] }
 0x578   : > { %1565 = vst.msk [vmem:[#allocation2 + $0x20] sm:$0xff] %vm1560_vm9, %v1542_v22  ;;  %v1183_v34 = vpack.c.bf16 %v1178_v20, %v1178_v20  ;;  %v1580_v45 = vpack.c.bf16 %v1572_v24, %v1571_v25  ;;  %v2668_v20 = vld [vmem:[%s2887_s1 + $0x30] sm:$0xff] }
 0x57a   : > { %2388 = vmatmul.msk.bf16.gmra.mxu2 %vm1078_vm7, %v1183_v34 }
 0x57d   : > { %v1241_v7 = vpop.f32.mrf.mxu2 }
 0x57e   : > { %1258 = vst.msk [vmem:[#allocation2 + $0x28] sm:$0xff] %vm1005_vm3, %v1241_v7 }
 0x57f   : > { %v1575_v16 = vld [vmem:[#allocation2 + $0x20] sm:$0xff] }
 0x584   : > { %v1520_v53 = vpop.f32.mrf.mxu0 }
 0x585   : > { %1549 = vrot.lane.b32.xlu0 %v1520_v53, %s2718_s14  ;;  %v1244_v10 = vpop.f32.mrf.mxu2 }
 0x586   : > { %1259 = vst.msk [vmem:[#allocation2 + $0x30] sm:$0xff] %vm1005_vm3, %v1244_v10  ;;  %v1538_v28 = vpop.permute.xlu1 %1537 }
 0x587   : > { %1563 = vst.msk [vmem:[#allocation2 + $0x10] sm:$0xff] %vm1560_vm9, %v1538_v28  ;;  %v1540_v63 = vpop.permute.xlu0 %1539 }
 0x588   : > { %1564 = vst.msk [vmem:[#allocation2 + $0x18] sm:$0xff] %vm1560_vm9, %v1540_v63 }
 0x58a   : > { %2407 = vmatmul.msk.bf16.vlgmr.msrb.gmra.mxu2 %vm681_vm2, %v1580_v45 }
 0x58c   : > { %v1522_v32 = vpop.f32.mrf.mxu0 }
 0x58d   : > { %v1246_v31 = vpop.f32.mrf.mxu2 }
 0x58e   : > { %1260 = vst.msk [vmem:[#allocation2 + $0x38] sm:$0xff] %vm1005_vm3, %v1246_v31  ;;  %v1573_v39 = vld [vmem:[#allocation2 + $0x10] sm:$0xff] }
 0x58f   : > { %v1574_v56 = vld [vmem:[#allocation2 + $0x18] sm:$0xff] }
 0x590   : > { %v1581_v43 = vpack.c.bf16 %v1574_v56, %v1573_v39  ;;  %v2669_v39 = vld [vmem:[%s2887_s1 + $0x38] sm:$0xff] }
 0x597   : > { %v1544_v41 = vpop.permute.xlu0 %1543 }
 0x598   : > { %1566 = vst.msk [vmem:[#allocation2 + $0x28] sm:$0xff] %vm1560_vm9, %v1544_v41 }
 0x59a   : > { %2408 = vmatmul.msk.bf16.gmra.mxu2 %vm681_vm2, %v1581_v43 }
 0x59f   : > { %v1576_v18 = vld [vmem:[#allocation2 + $0x28] sm:$0xff] }
 0x5a0   : > { %v1582_v49 = vpack.c.bf16 %v1576_v18, %v1575_v16 }
 0x5aa   : > { %2409 = vmatmul.msk.bf16.gmra.mxu2 %vm681_vm2, %v1582_v49 }
 0x5c2   : > { %v1548_v50 = vpop.permute.xlu2 %1547 }
 0x5c3   : > { %1568 = vst.msk [vmem:[#allocation2 + $0x38] sm:$0xff] %vm1560_vm9, %v1548_v50 }
 0x5ca   : > { %v1578_v55 = vld [vmem:[#allocation2 + $0x38] sm:$0xff] }
 0x5d2   : > { %v1546_v47 = vpop.permute.xlu1 %1545 }
 0x5d3   : > { %1567 = vst.msk [vmem:[#allocation2 + $0x30] sm:$0xff] %vm1560_vm9, %v1546_v47 }
 0x5da   : > { %v1577_v54 = vld [vmem:[#allocation2 + $0x30] sm:$0xff] }
 0x5db   : > { %v1583_v57 = vpack.c.bf16 %v1578_v55, %v1577_v54  ;;  %v2670_v55 = vld [vmem:[%s2887_s1 + $0x40] sm:$0x7] }
 0x5dd   : > { %2410 = vmatmul.msk.bf16.gmra.mxu2 %vm681_vm2, %v1583_v57 }
 0x5f7   : > { %v1550_v5 = vpop.permute.xlu0 %1549 }
 0x5fd   : > { %v1249_v19 = vpop.f32.mrf.mxu2 }
 0x5fe   : > { %1262 = vst.msk [vmem:[#allocation2 + $0x40] sm:$0x7] %vm1261_vm10, %v1249_v19 }
 0x5ff   : > { %1570 = vst.msk [vmem:[#allocation2 + $0x40] sm:$0x7] %vm1569_vm11, %v1550_v5 }
 0x605   : > { %v1251_v15 = vpop.f32.mrf.mxu2 }
 0x606   : > { %v1579_v17 = vld [vmem:[#allocation2 + $0x40] sm:$0x7] }
 0x607   : > { %v1584_v62 = vpack.c.bf16 %v1579_v17, %v1579_v17 }
 0x609   : > { %2411 = vmatmul.msk.bf16.gmra.mxu2 %vm681_vm2, %v1584_v62 }
 0x60d   : > { %v1629_v0 = vpop.f32.mrf.mxu2 }
 0x60e   : > { %v1630_v44 = vadd.f32 %v2529_v23, %v1629_v0 }
 0x610   : > { %v3367_v1 = vadd.f32 %v2662_v33, %v1630_v44 }
 0x612   : > { %v1664_v4 = vsel %vm681_vm2, %v3367_v1, 0.0 }
 0x613   : > { %1665 = vadd.xlane.f32.xlu1 %v1664_v4 }
 0x615   : > { %v1631_v6 = vpop.f32.mrf.mxu2 }
 0x616   : > { %v1632_v30 = vadd.f32 %v2529_v23, %v1631_v6 }
 0x618   : > { %v3372_v36 = vadd.f32 %v2663_v38, %v1632_v30 }
 0x61a   : > { %v1667_v26 = vsel %vm681_vm2, %v3372_v36, 0.0 }
 0x61b   : > { %1668 = vadd.xlane.f32.xlu2 %v1667_v26 }
 0x61d   : > { %v1634_v35 = vpop.f32.mrf.mxu2 }
 0x61e   : > { %v1635_v59 = vadd.f32 %v2529_v23, %v1634_v35 }
 0x620   : > { %v3377_v42 = vadd.f32 %v2664_v9, %v1635_v59 }
 0x622   : > { %v1670_v11 = vsel %vm681_vm2, %v3377_v42, 0.0 }
 0x623   : > { %1671 = vadd.xlane.f32.xlu0 %v1670_v11 }
 0x625   : > { %v1636_v12 = vpop.f32.mrf.mxu2 }
 0x626   : > { %v1637_v13 = vadd.f32 %v2529_v23, %v1636_v12 }
 0x628   : > { %v3382_v46 = vadd.f32 %v2665_v14, %v1637_v13 }
 0x62a   : > { %v1673_v21 = vsel %vm681_vm2, %v3382_v46, 0.0 }
 0x62b   : > { %1674 = vadd.xlane.f32.xlu1 %v1673_v21 }
 0x62d   : > { %v1639_v8 = vpop.f32.mrf.mxu2 }
 0x62e   : > { %v1640_v3 = vadd.f32 %v2529_v23, %v1639_v8 }
 0x630   : > { %v3387_v48 = vadd.f32 %v2666_v51, %v1640_v3 }
 0x632   : > { %v1676_v37 = vsel %vm681_vm2, %v3387_v48, 0.0 }
 0x633   : > { %1677 = vadd.xlane.f32.xlu2 %v1676_v37  ;;  %v2468_v37 = vld [vmem:[%s2868_s26 + $0x8] sm:$0xff] }
 0x634   : > { %1932 = vmatpush.bf16.msrb.mxu1 %v2468_v37 }
 0x635   : > { %v1641_v58 = vpop.f32.mrf.mxu2 }
 0x636   : > { %v1642_v27 = vadd.f32 %v2529_v23, %v1641_v58 }
 0x638   : > { %v3392_v2 = vadd.f32 %v2667_v40, %v1642_v27  ;;  %v2467_v40 = vld [vmem:[%s2868_s26] sm:$0xff] }
 0x639   : > { %1933 = vmatpush.bf16.msrb.mxu1 %v2467_v40 }
 0x63a   : > { %v1679_v60 = vsel %vm681_vm2, %v3392_v2, 0.0 }
 0x63b   : > { %1680 = vadd.xlane.f32.xlu0 %v1679_v60 }
 0x660   : > { %v1644_v52 = vpop.f32.mrf.mxu2 }
 0x661   : > { %v1645_v61 = vadd.f32 %v2529_v23, %v1644_v52 }
 0x663   : > { %v3397_v22 = vadd.f32 %v2668_v20, %v1645_v61 }
 0x665   : > { %v1682_v34 = vsel %vm681_vm2, %v3397_v22, 0.0 }
 0x666   : > { %1683 = vadd.xlane.f32.xlu0 %v1682_v34 }
 0x668   : > { %v1646_v7 = vpop.f32.mrf.mxu2 }
 0x669   : > { %v1647_v24 = vadd.f32 %v2529_v23, %v1646_v7 }
 0x66b   : > { %v3410_v56 = vadd.f32 %v2669_v39, %v1647_v24 }
 0x66d   : > { %v1685_v50 = vsel %vm681_vm2, %v3410_v56, 0.0 }
 0x686   : > { %v1666_v53 = vpop.xlane.xlu1 %1665 }
 0x687   : > { %v1691_v10 = vmul.f32 %v1666_v53, %v2933_v29 }
 0x689   : > { %v3403_v25 = vsub.f32 %v3367_v1, %v1691_v10 }
 0x68b   : > { %v1709_v28 = vmul.f32 %v3403_v25, %v3403_v25 }
 0x68c   : > { %v1649_v63 = vpop.f32.mrf.mxu2 }
 0x68d   : > { %v1718_v45 = vsel %vm681_vm2, %v1709_v28, 0.0  ;;  %v1650_v16 = vadd.f32 %v2529_v23, %v1649_v63 }
 0x68e   : > { %v1669_v32 = vpop.xlane.xlu2 %1668  ;;  %1719 = vadd.xlane.f32.xlu1 %v1718_v45 }
 0x68f   : > { %v1692_v31 = vmul.f32 %v1669_v32, %v2933_v29  ;;  %v3422_v57 = vadd.f32 %v2670_v55, %v1650_v16 }
 0x691   : > { %v3413_v41 = vsub.f32 %v3372_v36, %v1692_v31  ;;  %v1688_v17 = vsel %vm706_vm4, %v3422_v57, 0.0 }
 0x693   : > { %v1710_v43 = vmul.f32 %v3413_v41, %v3413_v41 }
 0x694   : > { %v1651_v18 = vpop.f32.mrf.mxu2 }
 0x695   : > { %v1721_v49 = vsel %vm681_vm2, %v1710_v43, 0.0 }
 0x696   : > { %1722 = vadd.xlane.f32.xlu2 %v1721_v49  ;;  %v1672_v47 = vpop.xlane.xlu0 %1671  ;;  %1686 = vadd.xlane.f32.xlu1 %v1685_v50 }
 0x697   : > { %v1693_v54 = vmul.f32 %v1672_v47, %v2933_v29 }
 0x699   : > { %v3425_v19 = vsub.f32 %v3377_v42, %v1693_v54 }
 0x69b   : > { %v1711_v5 = vmul.f32 %v3425_v19, %v3425_v19 }
 0x69d   : > { %v1724_v15 = vsel %vm681_vm2, %v1711_v5, 0.0 }
 0x69e   : > { %1725 = vadd.xlane.f32.xlu2 %v1724_v15  ;;  %1689 = vadd.xlane.f32.xlu1 %v1688_v17  ;;  %v1675_v62 = vpop.xlane.xlu1 %1674 }
 0x69f   : > { %v1694_v23 = vmul.f32 %v1675_v62, %v2933_v29 }
 0x6a1   : > { %v3434_v0 = vsub.f32 %v3382_v46, %v1694_v23 }
 0x6a3   : > { %v1712_v44 = vmul.f32 %v3434_v0, %v3434_v0 }
 0x6a5   : > { %v1727_v33 = vsel %vm681_vm2, %v1712_v44, 0.0 }
 0x6a6   : > { %v1678_v4 = vpop.xlane.xlu2 %1677  ;;  %1728 = vadd.xlane.f32.xlu0 %v1727_v33 }
 0x6a7   : > { %v1695_v6 = vmul.f32 %v1678_v4, %v2933_v29 }
 0x6a9   : > { %v3441_v30 = vsub.f32 %v3387_v48, %v1695_v6 }
 0x6ab   : > { %v1713_v38 = vmul.f32 %v3441_v30, %v3441_v30 }
 0x6ad   : > { %v1730_v26 = vsel %vm681_vm2, %v1713_v38, 0.0 }
 0x6ae   : > { %1731 = vadd.xlane.f32.xlu2 %v1730_v26  ;;  %v1681_v35 = vpop.xlane.xlu0 %1680  ;;  %v3486_v26 = vld [vmem:[%s3643_s18] ss:$0 sm:$0xff] }
 0x6af   : > { %v1696_v59 = vmul.f32 %v1681_v35, %v2933_v29 }
 0x6b1   : > { %v3448_v9 = vsub.f32 %v3392_v2, %v1696_v59 }
 0x6b3   : > { %v1714_v11 = vmul.f32 %v3448_v9, %v3448_v9 }
 0x6b5   : > { %v1733_v12 = vsel %vm681_vm2, %v1714_v11, 0.0 }
 0x6b6   : > { %1734 = vadd.xlane.f32.xlu0 %v1733_v12 }
 0x6d9   : > { %v1684_v13 = vpop.xlane.xlu0 %1683 }
 0x6da   : > { %v1697_v14 = vmul.f32 %v1684_v13, %v2933_v29 }
 0x6dc   : > { %v3455_v21 = vsub.f32 %v3397_v22, %v1697_v14 }
 0x6de   : > { %v1715_v8 = vmul.f32 %v3455_v21, %v3455_v21 }
 0x6e0   : > { %v1736_v3 = vsel %vm681_vm2, %v1715_v8, 0.0 }
 0x6e1   : > { %1737 = vadd.xlane.f32.xlu1 %v1736_v3 }
 0x701   : > { %v1720_v51 = vpop.xlane.xlu1 %1719 }
 0x702   : > { %v1745_v58 = vmul.f32 %v1720_v51, %v2933_v29 }
 0x704   : > { %v1754_v27 = vadd.f32 1e-06, %v1745_v58 }
 0x706   : > { %2626 = vrsqrt.f32 %v1754_v27  ;;  %vm1769_vm13 = vweird.f32 %v1754_v27 }
 0x709   : > { %v1723_v60 = vpop.xlane.xlu2 %1722  ;;  %v1687_v52 = vpop.xlane.xlu1 %1686 }
 0x70a   : > { %v1746_v61 = vmul.f32 %v1723_v60, %v2933_v29  ;;  %v1698_v20 = vmul.f32 %v1687_v52, %v2933_v29 }
 0x70c   : > { %v2627_v34 = vpop.eup %2626  ;;  %v1755_v7 = vadd.f32 1e-06, %v1746_v61  ;;  %v3466_v53 = vsub.f32 %v3410_v56, %v1698_v20 }
 0x70d   : > { %v1764_v10 = vmul.f32 %v2627_v34, %v1754_v27  ;;  %vm1770_vm12 = vweird.f32 %v2627_v34 }
 0x70e   : > { %2628 = vrsqrt.f32 %v1755_v7  ;;  %v1716_v28 = vmul.f32 %v3466_v53, %v3466_v53  ;;  %vm1771_vm14 = vmor %vm1769_vm13, %vm1770_vm12  ;;  %vm1779_vm0 = vweird.f32 %v1755_v7 }
 0x70f   : > { %v1765_v63 = vmul.f32 %v2627_v34, %v1764_v10 }
 0x710   : > { %v1739_v24 = vsel %vm681_vm2, %v1716_v28, 0.0 }
 0x711   : > { %v1766_v45 = vmul.f32 0.5, %v1765_v63  ;;  %v1726_v32 = vpop.xlane.xlu2 %1725  ;;  %1740 = vadd.xlane.f32.xlu2 %v1739_v24  ;;  %v1690_v31 = vpop.xlane.xlu1 %1689 }
 0x712   : > { %v1747_v39 = vmul.f32 %v1726_v32, %v2933_v29  ;;  %v1699_v43 = vmul.f32 %v1690_v31, %v2933_v29 }
 0x713   : > { %v1767_v18 = vsub.f32 1.5, %v1766_v45 }
 0x714   : > { %v2629_v16 = vpop.eup %2628  ;;  %v1756_v49 = vadd.f32 1e-06, %v1747_v39  ;;  %v3474_v50 = vsub.f32 %v3422_v57, %v1699_v43 }
 0x715   : > { %v1768_v47 = vmul.f32 %v2627_v34, %v1767_v18  ;;  %v1774_v54 = vmul.f32 %v2629_v16, %v1755_v7  ;;  %vm1780_vm15 = vweird.f32 %v2629_v16 }
 0x716   : > { %2630 = vrsqrt.f32 %v1756_v49  ;;  %v1717_v55 = vmul.f32 %v3474_v50, %v3474_v50  ;;  %vm1781_vm1 = vmor %vm1779_vm0, %vm1780_vm15  ;;  %vm1789_vm5 = vweird.f32 %v1756_v49 }
 0x717   : > { %v1775_v5 = vmul.f32 %v2629_v16, %v1774_v54  ;;  %v1772_v17 = vsel %vm1771_vm14, %v2627_v34, %v1768_v47 }
 0x718   : > { %v1742_v15 = vsel %vm706_vm4, %v1717_v55, 0.0  ;;  %v1853_v6 = vmul.f32 %v1772_v17, %v3403_v25  ;;  %v3495_v25 = vld [vmem:[%s623_s3] ss:$0 sm:$0xff] }
 0x719   : > { %v1776_v62 = vmul.f32 0.5, %v1775_v5  ;;  %v1729_v23 = vpop.xlane.xlu0 %1728  ;;  %1743 = vadd.xlane.f32.xlu0 %v1742_v15 }
 0x71a   : > { %v1748_v44 = vmul.f32 %v1729_v23, %v2933_v29  ;;  %v1865_v14 = vmul.f32 %v3486_v26, %v1853_v6 }
 0x71b   : > { %v1777_v33 = vsub.f32 1.5, %v1776_v62 }
 0x71c   : > { %v2631_v4 = vpop.eup %2630  ;;  %v1757_v38 = vadd.f32 1e-06, %v1748_v44  ;;  %v1877_v60 = vadd.f32 %v3495_v25, %v1865_v14 }
 0x71d   : > { %v1778_v35 = vmul.f32 %v2629_v16, %v1777_v33  ;;  %v1784_v59 = vmul.f32 %v2631_v4, %v1756_v49  ;;  %vm1790_vm3 = vweird.f32 %v2631_v4 }
 0x71e   : > { %2632 = vrsqrt.f32 %v1757_v38  ;;  %vm1791_vm6 = vmor %vm1789_vm5, %vm1790_vm3  ;;  %vm1799_vm8 = vweird.f32 %v1757_v38 }
 0x71f   : > { %v1782_v11 = vsel %vm1781_vm1, %v2629_v16, %v1778_v35  ;;  %v1785_v12 = vmul.f32 %v2631_v4, %v1784_v59 }
 0x720   : > { %v1854_v13 = vmul.f32 %v1782_v11, %v3413_v41 }
 0x721   : > { %v1786_v8 = vmul.f32 0.5, %v1785_v12  ;;  %v1732_v3 = vpop.xlane.xlu2 %1731 }
 0x722   : > { %v1749_v51 = vmul.f32 %v1732_v3, %v2933_v29  ;;  %v1866_v37 = vmul.f32 %v3486_v26, %v1854_v13 }
 0x723   : > { %v1787_v58 = vsub.f32 1.5, %v1786_v8 }
 0x724   : > { %v2633_v27 = vpop.eup %2632  ;;  %v1758_v40 = vadd.f32 1e-06, %v1749_v51  ;;  %v1878_v41 = vadd.f32 %v3495_v25, %v1866_v37 }
 0x725   : > { %v1788_v52 = vmul.f32 %v2631_v4, %v1787_v58  ;;  %v1794_v61 = vmul.f32 %v2633_v27, %v1757_v38  ;;  %vm1800_vm7 = vweird.f32 %v2633_v27 }
 0x726   : > { %2634 = vrsqrt.f32 %v1758_v40  ;;  %v1886_v20 = vpack.c.bf16 %v1878_v41, %v1877_v60  ;;  %vm1801_vm9 = vmor %vm1799_vm8, %vm1800_vm7  ;;  %vm1809_vm11 = vweird.f32 %v1758_v40 }
 0x727   : > { %v1795_v34 = vmul.f32 %v2633_v27, %v1794_v61  ;;  %v1792_v7 = vsel %vm1791_vm6, %v2631_v4, %v1788_v52  ;;  %v2476_v61 = vld [vmem:[%s2882_s2 + $0x38] sm:$0xff] }
 0x728   : > { %2420 = vmatmul.msk.bf16.vlgmr.msrb.gmra.mxu1 %vm681_vm2, %v1886_v20  ;;  %v1855_v32 = vmul.f32 %v1792_v7, %v3425_v19  ;;  %2113 = vmatpush.bf16.msrb.mxu3 %v2476_v61  ;;  %v2475_v20 = vld [vmem:[%s2882_s2 + $0x30] sm:$0xff] }
 0x729   : > { %v1796_v10 = vmul.f32 0.5, %v1795_v34  ;;  %v1735_v28 = vpop.xlane.xlu0 %1734 }
 0x72a   : > { %v1750_v63 = vmul.f32 %v1735_v28, %v2933_v29  ;;  %v1867_v47 = vmul.f32 %v3486_v26, %v1855_v32  ;;  %v2474_v32 = vld [vmem:[%s2882_s2 + $0x28] sm:$0xff] }
 0x72b   : > { %v1797_v24 = vsub.f32 1.5, %v1796_v10 }
 0x72c   : > { %v2635_v45 = vpop.eup %2634  ;;  %v1759_v31 = vadd.f32 1e-06, %v1750_v63  ;;  %v1879_v17 = vadd.f32 %v3495_v25, %v1867_v47  ;;  %2114 = vmatpush.bf16.msrb.mxu3 %v2475_v20 }
 0x72d   : > { %v1798_v39 = vmul.f32 %v2633_v27, %v1797_v24  ;;  %v1804_v43 = vmul.f32 %v2635_v45, %v1758_v40  ;;  %vm1810_vm10 = vweird.f32 %v2635_v45 }
 0x72e   : > { %2636 = vrsqrt.f32 %v1759_v31  ;;  %vm1811_vm12 = vmor %vm1809_vm11, %vm1810_vm10  ;;  %vm1819_vm14 = vweird.f32 %v1759_v31 }
 0x72f   : > { %v1802_v18 = vsel %vm1801_vm9, %v2633_v27, %v1798_v39  ;;  %v1805_v16 = vmul.f32 %v2635_v45, %v1804_v43  ;;  %v2473_v39 = vld [vmem:[%s2882_s2 + $0x20] sm:$0xff] }
 0x730   : > { %v1856_v49 = vmul.f32 %v1802_v18, %v3434_v0  ;;  %2115 = vmatpush.bf16.msrb.mxu3 %v2474_v32 }
 0x731   : > { %v1806_v54 = vmul.f32 0.5, %v1805_v16 }
 0x732   : > { %v1868_v55 = vmul.f32 %v3486_v26, %v1856_v49 }
 0x733   : > { %v1807_v5 = vsub.f32 1.5, %v1806_v54 }
 0x734   : > { %v2637_v15 = vpop.eup %2636  ;;  %v1880_v19 = vadd.f32 %v3495_v25, %v1868_v55  ;;  %2116 = vmatpush.bf16.msrb.mxu3 %v2473_v39  ;;  %v2472_v55 = vld [vmem:[%s2882_s2 + $0x18] sm:$0xff] }
 0x735   : > { %v1808_v62 = vmul.f32 %v2635_v45, %v1807_v5  ;;  %v1814_v23 = vmul.f32 %v2637_v15, %v1759_v31  ;;  %vm1820_vm13 = vweird.f32 %v2637_v15 }
 0x736   : > { %v1887_v44 = vpack.c.bf16 %v1880_v19, %v1879_v17  ;;  %vm1821_vm15 = vmor %vm1819_vm14, %vm1820_vm13  ;;  %v2471_v17 = vld [vmem:[%s2882_s2 + $0x10] sm:$0xff] }
 0x737   : > { %v1815_v33 = vmul.f32 %v2637_v15, %v1814_v23  ;;  %v1812_v0 = vsel %vm1811_vm12, %v2635_v45, %v1808_v62 }
 0x738   : > { %2421 = vmatmul.msk.bf16.gmra.mxu1 %vm681_vm2, %v1887_v44  ;;  %v1857_v38 = vmul.f32 %v1812_v0, %v3441_v30  ;;  %2117 = vmatpush.bf16.msrb.mxu3 %v2472_v55 }
 0x739   : > { %v1816_v4 = vmul.f32 0.5, %v1815_v33 }
 0x73a   : > { %v1869_v12 = vmul.f32 %v3486_v26, %v1857_v38 }
 0x73b   : > { %v1817_v6 = vsub.f32 1.5, %v1816_v4 }
 0x73c   : > { %v1881_v14 = vadd.f32 %v3495_v25, %v1869_v12  ;;  %2118 = vmatpush.bf16.msrb.mxu3 %v2471_v17 }
 0x73d   : > { %v1818_v35 = vmul.f32 %v2637_v15, %v1817_v6  ;;  %v2470_v6 = vld [vmem:[%s2882_s2 + $0x8] sm:$0xff] }
 0x73f   : > { %v1822_v59 = vsel %vm1821_vm15, %v2637_v15, %v1818_v35 }
 0x740   : > { %v1858_v11 = vmul.f32 %v1822_v59, %v3448_v9  ;;  %2119 = vmatpush.bf16.msrb.mxu3 %v2470_v6  ;;  %v2469_v59 = vld [vmem:[%s2882_s2] sm:$0xff] }
 0x742   : > { %v1870_v13 = vmul.f32 %v3486_v26, %v1858_v11 }
 0x744   : > { %v1882_v8 = vadd.f32 %v3495_v25, %v1870_v13  ;;  %2120 = vmatpush.bf16.msrb.mxu3 %v2469_v59 }
 0x746   : > { %v1888_v3 = vpack.c.bf16 %v1882_v8, %v1881_v14 }
 0x748   : > { %2422 = vmatmul.msk.bf16.gmra.mxu1 %vm681_vm2, %v1888_v3 }
 0x754   : > { %v1738_v30 = vpop.xlane.xlu1 %1737 }
 0x755   : > { %v1751_v51 = vmul.f32 %v1738_v30, %v2933_v29 }
 0x757   : > { %v1760_v37 = vadd.f32 1e-06, %v1751_v51 }
 0x759   : > { %2638 = vrsqrt.f32 %v1760_v37  ;;  %vm1829_vm1 = vweird.f32 %v1760_v37 }
 0x75f   : > { %v2639_v58 = vpop.eup %2638 }
 0x760   : > { %v1824_v9 = vmul.f32 %v2639_v58, %v1760_v37  ;;  %vm1830_vm0 = vweird.f32 %v2639_v58 }
 0x761   : > { %vm1831_vm3 = vmor %vm1829_vm1, %vm1830_vm0 }
 0x762   : > { %v1825_v27 = vmul.f32 %v2639_v58, %v1824_v9 }
 0x764   : > { %v1826_v52 = vmul.f32 0.5, %v1825_v27 }
 0x766   : > { %v1827_v34 = vsub.f32 1.5, %v1826_v52 }
 0x768   : > { %v1828_v24 = vmul.f32 %v2639_v58, %v1827_v34 }
 0x76a   : > { %v1832_v43 = vsel %vm1831_vm3, %v2639_v58, %v1828_v24 }
 0x76b   : > { %v1859_v49 = vmul.f32 %v1832_v43, %v3455_v21 }
 0x76d   : > { %v1871_v62 = vmul.f32 %v3486_v26, %v1859_v49 }
 0x76f   : > { %v1883_v33 = vadd.f32 %v3495_v25, %v1871_v62 }
 0x784   : > { %v1741_v40 = vpop.xlane.xlu2 %1740 }
 0x785   : > { %v1752_v60 = vmul.f32 %v1741_v40, %v2933_v29 }
 0x787   : > { %v1761_v41 = vadd.f32 1e-06, %v1752_v60 }
 0x789   : > { %2640 = vrsqrt.f32 %v1761_v41  ;;  %vm1839_vm6 = vweird.f32 %v1761_v41 }
 0x78c   : > { %v1744_v7 = vpop.xlane.xlu0 %1743 }
 0x78d   : > { %v1753_v10 = vmul.f32 %v1744_v7, %v2933_v29 }
 0x78f   : > { %v2641_v28 = vpop.eup %2640  ;;  %v1762_v63 = vadd.f32 1e-06, %v1753_v10 }
 0x790   : > { %v1834_v45 = vmul.f32 %v2641_v28, %v1761_v41  ;;  %vm1840_vm5 = vweird.f32 %v2641_v28 }
 0x791   : > { %2642 = vrsqrt.f32 %v1762_v63  ;;  %vm1841_vm7 = vmor %vm1839_vm6, %vm1840_vm5  ;;  %vm1849_vm9 = vweird.f32 %v1762_v63 }
 0x792   : > { %v1835_v31 = vmul.f32 %v2641_v28, %v1834_v45 }
 0x794   : > { %v1836_v18 = vmul.f32 0.5, %v1835_v31 }
 0x796   : > { %v1837_v16 = vsub.f32 1.5, %v1836_v18 }
 0x797   : > { %v2643_v29 = vpop.eup %2642 }
 0x798   : > { %v1838_v47 = vmul.f32 %v2641_v28, %v1837_v16  ;;  %v1844_v54 = vmul.f32 %v2643_v29, %v1762_v63  ;;  %vm1850_vm8 = vweird.f32 %v2643_v29 }
 0x799   : > { %vm1851_vm10 = vmor %vm1849_vm9, %vm1850_vm8 }
 0x79a   : > { %v1842_v5 = vsel %vm1841_vm7, %v2641_v28, %v1838_v47  ;;  %v1845_v15 = vmul.f32 %v2643_v29, %v1844_v54 }
 0x79b   : > { %v1860_v19 = vmul.f32 %v1842_v5, %v3466_v53  ;;  %v3538_v53 = vld [vmem:[%s631_s17] ss:$0 sm:$0xff] }
 0x79c   : > { %v1846_v23 = vmul.f32 0.5, %v1845_v15 }
 0x79d   : > { %v1872_v44 = vmul.f32 %v3486_v26, %v1860_v19 }
 0x79e   : > { %v1847_v21 = vsub.f32 1.5, %v1846_v23 }
 0x79f   : > { %v1884_v0 = vadd.f32 %v3495_v25, %v1872_v44 }
 0x7a0   : > { %v1848_v4 = vmul.f32 %v2643_v29, %v1847_v21 }
 0x7a1   : > { %v1889_v38 = vpack.c.bf16 %v1884_v0, %v1883_v33 }
 0x7a2   : > { %v1852_v35 = vsel %vm1851_vm10, %v2643_v29, %v1848_v4 }
 0x7a3   : > { %2423 = vmatmul.msk.bf16.gmra.mxu1 %vm681_vm2, %v1889_v38  ;;  %v1861_v12 = vmul.f32 %v1852_v35, %v3474_v50 }
 0x7a5   : > { %v1935_v11 = vpop.f32.mrf.mxu1  ;;  %v1873_v8 = vmul.f32 %v3486_v26, %v1861_v12 }
 0x7a6   : > { %v1936_v13 = vadd.f32 %v3538_v53, %v1935_v11 }
 0x7a7   : > { %v1885_v37 = vadd.f32 %v3495_v25, %v1873_v8 }
 0x7a8   : > { %v1968_v14 = vmul.f32 0.044715, %v1936_v13  ;;  %v1959_v39 = vmul.f32 0.5, %v1936_v13 }
 0x7a9   : > { %v1890_v40 = vpack.c.bf16 %v1885_v37, %v1885_v37 }
 0x7aa   : > { %v1977_v3 = vmul.f32 %v1968_v14, %v1936_v13 }
 0x7ac   : > { %v1986_v30 = vmul.f32 %v1977_v3, %v1936_v13 }
 0x7ad   : > { %v1937_v51 = vpop.f32.mrf.mxu1 }
 0x7ae   : > { %v1938_v58 = vadd.f32 %v3538_v53, %v1937_v51  ;;  %v1995_v9 = vadd.f32 %v1986_v30, %v1936_v13 }
 0x7b0   : > { %v1969_v27 = vmul.f32 0.044715, %v1938_v58  ;;  %v2004_v41 = vmul.f32 0.7978846, %v1995_v9  ;;  %v1960_v43 = vmul.f32 0.5, %v1938_v58 }
 0x7b2   : > { %v1978_v60 = vmul.f32 %v1969_v27, %v1938_v58  ;;  %2644 = vtanh.f32 %v2004_v41 }
 0x7b3   : > { %2424 = vmatmul.msk.bf16.gmra.mxu1 %vm681_vm2, %v1890_v40 }
 0x7b4   : > { %v1987_v50 = vmul.f32 %v1978_v60, %v1938_v58 }
 0x7b5   : > { %v1940_v52 = vpop.f32.mrf.mxu1 }
 0x7b6   : > { %v1941_v61 = vadd.f32 %v3538_v53, %v1940_v52  ;;  %v1996_v20 = vadd.f32 %v1987_v50, %v1938_v58 }
 0x7b8   : > { %v1970_v26 = vmul.f32 0.044715, %v1941_v61  ;;  %v2005_v34 = vmul.f32 0.7978846, %v1996_v20  ;;  %v2645_v25 = vpop.eup %2644  ;;  %v1961_v59 = vmul.f32 0.5, %v1941_v61 }
 0x7b9   : > { %v2022_v45 = vadd.f32 1.0, %v2645_v25 }
 0x7ba   : > { %2646 = vtanh.f32 %v2005_v34  ;;  %v1979_v7 = vmul.f32 %v1970_v26, %v1941_v61 }
 0x7bb   : > { %v2031_v49 = vmul.f32 %v2022_v45, %v1959_v39 }
 0x7bc   : > { %v1988_v10 = vmul.f32 %v1979_v7, %v1941_v61 }
 0x7bd   : > { %v1942_v28 = vpop.f32.mrf.mxu1 }
 0x7be   : > { %v1943_v63 = vadd.f32 %v3538_v53, %v1942_v28  ;;  %v1997_v24 = vadd.f32 %v1988_v10, %v1941_v61 }
 0x7c0   : > { %v2647_v32 = vpop.eup %2646  ;;  %v1971_v31 = vmul.f32 0.044715, %v1943_v63  ;;  %v2006_v29 = vmul.f32 0.7978846, %v1997_v24  ;;  %v1962_v11 = vmul.f32 0.5, %v1943_v63 }
 0x7c1   : > { %v2023_v18 = vadd.f32 1.0, %v2647_v32 }
 0x7c2   : > { %v1980_v16 = vmul.f32 %v1971_v31, %v1943_v63  ;;  %2648 = vtanh.f32 %v2006_v29 }
 0x7c3   : > { %v2032_v47 = vmul.f32 %v2023_v18, %v1960_v43 }
 0x7c4   : > { %v1989_v54 = vmul.f32 %v1980_v16, %v1943_v63 }
 0x7c5   : > { %v1945_v55 = vpop.f32.mrf.mxu1  ;;  %v2040_v5 = vpack.c.bf16 %v2032_v47, %v2031_v49 }
 0x7c6   : > { %v1946_v15 = vadd.f32 %v3538_v53, %v1945_v55  ;;  %v1998_v17 = vadd.f32 %v1989_v54, %v1943_v63 }
 0x7c7   : > { %2121 = vmatmul.bf16.vlgmr.msrb.gmra.mxu3 %v2040_v5 }
 0x7c8   : > { %v1972_v19 = vmul.f32 0.044715, %v1946_v15  ;;  %v2007_v62 = vmul.f32 0.7978846, %v1998_v17  ;;  %v2649_v44 = vpop.eup %2648  ;;  %v1963_v60 = vmul.f32 0.5, %v1946_v15 }
 0x7c9   : > { %v2024_v6 = vadd.f32 1.0, %v2649_v44 }
 0x7ca   : > { %2650 = vtanh.f32 %v2007_v62  ;;  %v1981_v23 = vmul.f32 %v1972_v19, %v1946_v15 }
 0x7cb   : > { %v2033_v8 = vmul.f32 %v2024_v6, %v1961_v59  ;;  %v2533_v6 = vld [vmem:[%s639_s23] ss:$0 sm:$0xff] }
 0x7cc   : > { %v1990_v21 = vmul.f32 %v1981_v23, %v1946_v15 }
 0x7cd   : > { %v1947_v33 = vpop.f32.mrf.mxu1 }
 0x7ce   : > { %v1948_v0 = vadd.f32 %v3538_v53, %v1947_v33  ;;  %v1999_v4 = vadd.f32 %v1990_v21, %v1946_v15 }
 0x7d0   : > { %v2651_v38 = vpop.eup %2650  ;;  %v1973_v35 = vmul.f32 0.044715, %v1948_v0  ;;  %v2008_v14 = vmul.f32 0.7978846, %v1999_v4  ;;  %v1964_v41 = vmul.f32 0.5, %v1948_v0 }
 0x7d1   : > { %v2025_v12 = vadd.f32 1.0, %v2651_v38 }
 0x7d2   : > { %v1982_v13 = vmul.f32 %v1973_v35, %v1948_v0  ;;  %2652 = vtanh.f32 %v2008_v14 }
 0x7d3   : > { %v2034_v3 = vmul.f32 %v2025_v12, %v1962_v11 }
 0x7d4   : > { %v1991_v30 = vmul.f32 %v1982_v13, %v1948_v0 }
 0x7d5   : > { %v2041_v51 = vpack.c.bf16 %v2034_v3, %v2033_v8 }
 0x7d6   : > { %v2000_v37 = vadd.f32 %v1991_v30, %v1948_v0 }
 0x7d7   : > { %2126 = vmatmul.bf16.gmra.mxu3 %v2041_v51 }
 0x7d8   : > { %v2009_v58 = vmul.f32 0.7978846, %v2000_v37  ;;  %v2653_v9 = vpop.eup %2652 }
 0x7d9   : > { %v2026_v27 = vadd.f32 1.0, %v2653_v9 }
 0x7da   : > { %2654 = vtanh.f32 %v2009_v58 }
 0x7db   : > { %v2035_v52 = vmul.f32 %v2026_v27, %v1963_v60 }
 0x7e0   : > { %v2655_v40 = vpop.eup %2654 }
 0x7e1   : > { %v2027_v50 = vadd.f32 1.0, %v2655_v40 }
 0x7e3   : > { %v2036_v61 = vmul.f32 %v2027_v50, %v1964_v41 }
 0x7e5   : > { %v2042_v20 = vpack.c.bf16 %v2036_v61, %v2035_v52 }
 0x7e7   : > { %2131 = vmatmul.bf16.gmra.mxu3 %v2042_v20 }
 0x820   : > { %v1950_v26 = vpop.f32.mrf.mxu1 }
 0x821   : > { %v1951_v34 = vadd.f32 %v3538_v53, %v1950_v26 }
 0x823   : > { %v1974_v7 = vmul.f32 0.044715, %v1951_v34  ;;  %v1965_v23 = vmul.f32 0.5, %v1951_v34 }
 0x825   : > { %v1983_v25 = vmul.f32 %v1974_v7, %v1951_v34 }
 0x827   : > { %v1992_v10 = vmul.f32 %v1983_v25, %v1951_v34 }
 0x828   : > { %v1952_v28 = vpop.f32.mrf.mxu1 }
 0x829   : > { %v1953_v63 = vadd.f32 %v3538_v53, %v1952_v28  ;;  %v2001_v24 = vadd.f32 %v1992_v10, %v1951_v34 }
 0x82b   : > { %v1975_v45 = vmul.f32 0.044715, %v1953_v63  ;;  %v2010_v31 = vmul.f32 0.7978846, %v2001_v24  ;;  %v1966_v44 = vmul.f32 0.5, %v1953_v63 }
 0x82d   : > { %v1984_v32 = vmul.f32 %v1975_v45, %v1953_v63  ;;  %2656 = vtanh.f32 %v2010_v31 }
 0x82f   : > { %v1993_v39 = vmul.f32 %v1984_v32, %v1953_v63 }
 0x830   : > { %v1955_v43 = vpop.f32.mrf.mxu1 }
 0x831   : > { %v1956_v18 = vadd.f32 %v3538_v53, %v1955_v43  ;;  %v2002_v16 = vadd.f32 %v1993_v39, %v1953_v63 }
 0x833   : > { %v2011_v29 = vmul.f32 0.7978846, %v2002_v16  ;;  %v1976_v49 = vmul.f32 0.044715, %v1956_v18  ;;  %v2657_v54 = vpop.eup %2656  ;;  %v1967_v59 = vmul.f32 0.5, %v1956_v18 }
 0x834   : > { %v2028_v17 = vadd.f32 1.0, %v2657_v54 }
 0x835   : > { %2658 = vtanh.f32 %v2011_v29  ;;  %v1985_v47 = vmul.f32 %v1976_v49, %v1956_v18 }
 0x836   : > { %v2037_v33 = vmul.f32 %v2028_v17, %v1965_v23 }
 0x837   : > { %v1994_v55 = vmul.f32 %v1985_v47, %v1956_v18 }
 0x838   : > { %v1957_v5 = vpop.f32.mrf.mxu1 }
 0x839   : > { %v2003_v15 = vadd.f32 %v1994_v55, %v1956_v18 }
 0x83b   : > { %v2659_v19 = vpop.eup %2658  ;;  %v2012_v62 = vmul.f32 0.7978846, %v2003_v15 }
 0x83c   : > { %v2029_v21 = vadd.f32 1.0, %v2659_v19 }
 0x83d   : > { %2660 = vtanh.f32 %v2012_v62 }
 0x83e   : > { %v2038_v53 = vmul.f32 %v2029_v21, %v1966_v44 }
 0x840   : > { %v2043_v0 = vpack.c.bf16 %v2038_v53, %v2037_v33 }
 0x842   : > { %2136 = vmatmul.bf16.gmra.mxu3 %v2043_v0 }
 0x843   : > { %v2661_v4 = vpop.eup %2660 }
 0x844   : > { %v2030_v38 = vadd.f32 1.0, %v2661_v4 }
 0x846   : > { %v2039_v12 = vmul.f32 %v2030_v38, %v1967_v59 }
 0x848   : > { %v2044_v14 = vpack.c.bf16 %v2039_v12, %v2039_v12 }
 0x84a   : > { %v2122_v35 = vpop.f32.mrf.mxu3 }
 0x84b   : > { %v2123_v11 = vadd.f32 %v2533_v6, %v2122_v35 }
 0x84d   : > { %v2146_v13 = vadd.f32 %v2123_v11, %v3367_v1 }
 0x84f   : > { %2155 = vst.msk [vmem:[%s2887_s1] sm:$0xff] %vm681_vm2, %v2146_v13 }
 0x852   : > { %v2124_v8 = vpop.f32.mrf.mxu3  ;;  %2141 = vmatmul.bf16.gmra.mxu3 %v2044_v14 }
 0x853   : > { %v2125_v3 = vadd.f32 %v2533_v6, %v2124_v8 }
 0x855   : > { %v2147_v30 = vadd.f32 %v2125_v3, %v3372_v36 }
 0x857   : > { %2156 = vst.msk [vmem:[%s2887_s1 + $0x8] sm:$0xff] %vm681_vm2, %v2147_v30 }
 0x85a   : > { %v2127_v51 = vpop.f32.mrf.mxu3 }
 0x85b   : > { %v2128_v37 = vadd.f32 %v2533_v6, %v2127_v51 }
 0x85d   : > { %v2148_v58 = vadd.f32 %v2128_v37, %v3377_v42 }
 0x85f   : > { %2157 = vst.msk [vmem:[%s2887_s1 + $0x10] sm:$0xff] %vm681_vm2, %v2148_v58 }
 0x862   : > { %v2129_v1 = vpop.f32.mrf.mxu3 }
 0x863   : > { %v2130_v9 = vadd.f32 %v2533_v6, %v2129_v1 }
 0x865   : > { %v2149_v27 = vadd.f32 %v2130_v9, %v3382_v46 }
 0x867   : > { %2158 = vst.msk [vmem:[%s2887_s1 + $0x18] sm:$0xff] %vm681_vm2, %v2149_v27 }
 0x86a   : > { %v2132_v40 = vpop.f32.mrf.mxu3 }
 0x86b   : > { %v2133_v60 = vadd.f32 %v2533_v6, %v2132_v40 }
 0x86d   : > { %v2150_v36 = vadd.f32 %v2133_v60, %v3387_v48 }
 0x86f   : > { %2159 = vst.msk [vmem:[%s2887_s1 + $0x20] sm:$0xff] %vm681_vm2, %v2150_v36 }
 0x872   : > { %v2134_v41 = vpop.f32.mrf.mxu3 }
 0x873   : > { %v2135_v50 = vadd.f32 %v2533_v6, %v2134_v41 }
 0x875   : > { %v2151_v42 = vadd.f32 %v2135_v50, %v3392_v2 }
 0x877   : > { %2160 = vst.msk [vmem:[%s2887_s1 + $0x28] sm:$0xff] %vm681_vm2, %v2151_v42 }
 0x8c5   : > { %v2137_v52 = vpop.f32.mrf.mxu3 }
 0x8c6   : > { %v2138_v61 = vadd.f32 %v2533_v6, %v2137_v52 }
 0x8c8   : > { %v2152_v46 = vadd.f32 %v2138_v61, %v3397_v22 }
 0x8ca   : > { %2161 = vst.msk [vmem:[%s2887_s1 + $0x30] sm:$0xff] %vm681_vm2, %v2152_v46 }
 0x8cd   : > { %v2139_v20 = vpop.f32.mrf.mxu3 }
 0x8ce   : > { %v2140_v26 = vadd.f32 %v2533_v6, %v2139_v20 }
 0x8d0   : > { %v2153_v34 = vadd.f32 %v2140_v26, %v3410_v56 }
 0x8d2   : > { %2162 = vst.msk [vmem:[%s2887_s1 + $0x38] sm:$0xff] %vm681_vm2, %v2153_v34 }
 0x8d5   : > { %v2142_v48 = vpop.f32.mrf.mxu3 }
 0x8d6   : > { %v2143_v7 = vadd.f32 %v2533_v6, %v2142_v48 }
 0x8d8   : > { %v2154_v25 = vadd.f32 %v2143_v7, %v3422_v57 }
 0x8da   : > { %2163 = vst.msk [vmem:[%s2887_s1 + $0x40] sm:$0x7] %vm706_vm4, %v2154_v25 }
 0x8dd   : > { %v2144_v2 = vpop.f32.mrf.mxu3 }
 0x8de PF: > { %s3644_s15 = sld [smem:[#allocation6_spill]] }
 0x8df   : > { %s3645_s25 = sld [smem:[#allocation4_spill]] }
 0x8e0   : > { %s3646_s26 = sld [smem:[#allocation5_spill]] }
 0x8e1   : > { %s3647_s27 = sld [smem:[#allocation7_spill]] }
 0x8e2   : > { %s3648_s28 = sld [smem:[#allocation8_spill]] }
 0x8e4   : > { %s23_s29 = sadd.s32 1, %s3644_s15  }
 0x8e5   : > { %p20_p8 = scmp.ge.s32.totalorder %s23_s29, 6  }
 0x8e7   :  { %22 = sbr.rel (!%p20_p8) target bundleno = 6 (0x6), region = 142 }

</bundles_post_ra>
